<compile_context>
chip_gen: v7x
topology: tpu7x:2x2x1
jax: 0.10.0
libtpu: 0.0.40
codegen_flags: <defaults>
</compile_context>

<pallas_src>
import functools

import jax
import jax.numpy as jnp
from jax import lax
from jax.experimental import pallas as pl
from jax.experimental.pallas import tpu as pltpu

HID = 51            # LSTM hidden size of the module
HP = 64             # padded hidden size (lane friendly); zero padding keeps the math exact
GP = 4 * HP         # padded gate width, gate order [i, f, o, g]
X_COL = HID         # zero-padding column of h1 that carries the scalar input x_t
ONE_COL = HID + 1   # zero-padding column of h1 that carries the constant 1 (bias folding)
B2_ROW = HID        # row of W2 (== column of [h1|h2]) that holds the folded layer-2 bias


def _unroll(n):
    # Full unroll for short static trip counts, partial otherwise (keeps compile sane).
    return True if n <= 32 else 8


# ---------------------------------------------------------------------------
# Pallas kernel: whole recurrence (T teacher-forced + `future` autoregressive steps)
# in one invocation.
# ---------------------------------------------------------------------------
def sine_lstm_kernel(x_ref,       # (T, BP, 1)   per-step scalar input, batch on sublanes
                     w1_ref,      # (HP, GP)     fused layer-1 weights (w_hh1 rows | w_ih1 | b1)
                     w2_ref,      # (2*HP, GP)   fused layer-2 weights (w_ih2 | b2 | w_hh2)
                     wlin_ref,    # (1, HP)      linear head weight
                     blin_ref,    # (1, 1)       linear head bias
                     out_ref,     # (TF, BP)     all outputs, time on sublanes
                     h2hist_ref): # scratch (TF, BP, HP): h2 of every step (deferred head)
    T = x_ref.shape[0]
    TF, BP = out_ref.shape

    w1 = w1_ref[...]
    w2 = w2_ref[...]
    wlin = wlin_ref[...]          # (1, HP)
    blin = blin_ref[...]          # (1, 1)

    # Masks for injecting x_t / constant-1 into zero-padding columns (hoisted out of loops).
    lane_h = lax.broadcasted_iota(jnp.int32, (1, HP), 1)
    x_mask = lane_h == X_COL
    one_mask = lane_h == ONE_COL
    lane_s = lax.broadcasted_iota(jnp.int32, (1, 2 * HP), 1)
    s_one_mask = lane_s == B2_ROW

    def cell(gates, c):
        # gates: (BP, GP) in [i, f, o, g] order. One sigmoid over the 3*HP slab, one tanh.
        ifo = jax.nn.sigmoid(gates[:, :3 * HP])
        g = jnp.tanh(gates[:, 3 * HP:])
        i = ifo[:, 0 * HP:1 * HP]
        f = ifo[:, 1 * HP:2 * HP]
        o = ifo[:, 2 * HP:3 * HP]
        c_new = f * c + i * g
        h_new = o * jnp.tanh(c_new)
        return h_new, c_new

    def step(x_col, h1, c1, h2, c2):
        # Layer 1: x_t and the constant 1 ride in zero-padding columns of h1, so input
        # weight and bias are folded into a single K=64 matmul.
        h1_in = jnp.where(x_mask, x_col, h1)
        h1_in = jnp.where(one_mask, 1.0, h1_in)
        gates1 = jnp.dot(h1_in, w1, preferred_element_type=jnp.float32)
        h1, c1 = cell(gates1, c1)
        # Layer 2: both matmuls + bias fused into one K=128 matmul over [h1 | h2].
        s2 = jnp.concatenate([h1, h2], axis=1)      # (BP, 2*HP)
        s2 = jnp.where(s_one_mask, 1.0, s2)
        gates2 = jnp.dot(s2, w2, preferred_element_type=jnp.float32)
        h2, c2 = cell(gates2, c2)
        return h1, c1, h2, c2

    zeros = jnp.zeros((BP, HP), jnp.float32)
    carry = (zeros, zeros, zeros, zeros)

    # Phase 1: teacher forcing -- linear head fully off the critical path (h2 is stashed).
    def tf_body(t, carry):
        h1, c1, h2, c2 = carry
        x_col = x_ref[t]                            # (BP, 1)
        h1, c1, h2, c2 = step(x_col, h1, c1, h2, c2)
        h2hist_ref[t] = h2
        return (h1, c1, h2, c2)

    if T > 0:
        carry = lax.fori_loop(0, T, tf_body, carry, unroll=_unroll(T))

    # Phase 2: autoregressive -- previous step's head output feeds the next input.
    def ar_body(t, carry):
        h1, c1, h2, c2 = carry
        out_col = jnp.sum(h2 * wlin, axis=1, keepdims=True) + blin   # (BP, 1)
        h1, c1, h2, c2 = step(out_col, h1, c1, h2, c2)
        h2hist_ref[t] = h2
        return (h1, c1, h2, c2)

    if TF > T:
        lax.fori_loop(T, TF, ar_body, carry, unroll=_unroll(TF - T))

    # Deferred linear head: one batched multiply + lane reduce + a single store for all steps.
    h2_all = h2hist_ref[...]                                  # (TF, BP, HP)
    out_ref[...] = jnp.sum(h2_all * wlin, axis=-1) + blin     # (TF, BP)


# ---------------------------------------------------------------------------
# Parameter packing: pad 51 -> 64, reorder gates to [i, f, o, g], fuse input weights and
# biases into the hidden matmuls. Zero padding keeps the math exact.
# ---------------------------------------------------------------------------
def _gate_perm_cols(w):
    """(4*HID, K) in PyTorch [i,f,g,o] row order -> (K, GP) columns in [i,f,o,g] order."""
    wi, wf, wg, wo = jnp.split(w.astype(jnp.float32), 4, axis=0)
    out = jnp.zeros((w.shape[1], GP), jnp.float32)
    for idx, blk in enumerate((wi, wf, wo, wg)):
        out = out.at[:, idx * HP:idx * HP + HID].set(blk.T)
    return out


def _gate_perm_row(b):
    """(4*HID,) -> (GP,) in [i,f,o,g] order, per-gate padded."""
    bi, bf, bg, bo = jnp.split(b.astype(jnp.float32), 4)
    out = jnp.zeros((GP,), jnp.float32)
    for idx, blk in enumerate((bi, bf, bo, bg)):
        out = out.at[idx * HP:idx * HP + HID].set(blk)
    return out


def pack_params(raw):
    (w_ih1, w_hh1, b_ih1, b_hh1,
     w_ih2, w_hh2, b_ih2, b_hh2,
     lin_w, lin_b) = raw
    # Layer 1: rows 0..50 = w_hh1, row X_COL = w_ih1 (input dim 1), row ONE_COL = b_ih1 + b_hh1.
    w1 = jnp.zeros((HP, GP), jnp.float32)
    w1 = w1.at[:HID, :].set(_gate_perm_cols(w_hh1))
    w1 = w1.at[X_COL, :].set(_gate_perm_cols(w_ih1)[0])
    w1 = w1.at[ONE_COL, :].set(_gate_perm_row(b_ih1 + b_hh1))
    # Layer 2: rows 0..50 = w_ih2 (acts on h1), row B2_ROW = b2, rows 64..114 = w_hh2 (acts on h2).
    w2 = jnp.zeros((2 * HP, GP), jnp.float32)
    w2 = w2.at[:HID, :].set(_gate_perm_cols(w_ih2))
    w2 = w2.at[B2_ROW, :].set(_gate_perm_row(b_ih2 + b_hh2))
    w2 = w2.at[HP:HP + HID, :].set(_gate_perm_cols(w_hh2))
    # Linear head.
    wlin = jnp.zeros((1, HP), jnp.float32).at[:, :HID].set(lin_w.astype(jnp.float32))
    blin = lin_b.astype(jnp.float32).reshape(1, 1)
    return (w1, w2, wlin, blin)


# ---------------------------------------------------------------------------
# Wrapper
# ---------------------------------------------------------------------------
@functools.partial(jax.jit, static_argnames=("future",))
def sine_with_lstm(x, packed_params, future=0):
    # x: (B, T) float32 -> (B, T + future) float32
    w1, w2, wlin, blin = packed_params
    B, T = x.shape
    TF = T + future
    BP = max(8, ((B + 7) // 8) * 8)        # batch padded onto sublanes
    # Per-step scalar input, batch on sublanes: (T, BP, 1).
    x_k = jnp.zeros((T, BP, 1), jnp.float32).at[:, :B, 0].set(x.astype(jnp.float32).T)

    out = pl.pallas_call(
        sine_lstm_kernel,
        out_shape=jax.ShapeDtypeStruct((TF, BP), jnp.float32),
        in_specs=[pl.BlockSpec(memory_space=pltpu.MemorySpace.VMEM)] * 5,
        out_specs=pl.BlockSpec(memory_space=pltpu.MemorySpace.VMEM),
        scratch_shapes=[pltpu.VMEM((TF, BP, HP), jnp.float32)],
    )(x_k, w1, w2, wlin, blin)
    return out[:, :B].T                    # (B, T + future)


# ---------------------------------------------------------------------------
# Pure-JAX reference (unpadded, matches PyTorch LSTMCell/Linear semantics)
# ---------------------------------------------------------------------------
def _lstm_cell_ref(x, h, c, w_ih, w_hh, b_ih, b_hh):
    g = x @ w_ih.T + b_ih + h @ w_hh.T + b_hh
    i, f, gg, o = jnp.split(g, 4, axis=1)
    i, f, o = jax.nn.sigmoid(i), jax.nn.sigmoid(f), jax.nn.sigmoid(o)
    gg = jnp.tanh(gg)
    c = f * c + i * gg
    h = o * jnp.tanh(c)
    return h, c


def ref_forward(x, raw, future=0):
    (w_ih1, w_hh1, b_ih1, b_hh1,
     w_ih2, w_hh2, b_ih2, b_hh2,
     lin_w, lin_b) = raw
    B, T = x.shape
    h1 = c1 = h2 = c2 = jnp.zeros((B, HID), jnp.float32)
    outs = []
    out = None
    for t in range(T + future):
        xt = x[:, t:t + 1] if t < T else out
        h1, c1 = _lstm_cell_ref(xt, h1, c1, w_ih1, w_hh1, b_ih1, b_hh1)
        h2, c2 = _lstm_cell_ref(h1, h2, c2, w_ih2, w_hh2, b_ih2, b_hh2)
        out = h2 @ lin_w.T + lin_b
        outs.append(out)
    return jnp.concatenate(outs, axis=1)  # (B, T + future)


# ---------------------------------------------------------------------------
if __name__ == "__main__":
    B, T, FUTURE = 4, 8, 4

    key = jax.random.PRNGKey(0)
    keys = jax.random.split(key, 12)
    bound = 1.0 / (HID ** 0.5)

    def u(k, shape):
        return jax.random.uniform(k, shape, jnp.float32, -bound, bound)

    raw_params = (
        u(keys[0], (4 * HID, 1)),     # lstm1 weight_ih
        u(keys[1], (4 * HID, HID)),   # lstm1 weight_hh
        u(keys[2], (4 * HID,)),       # lstm1 bias_ih
        u(keys[3], (4 * HID,)),       # lstm1 bias_hh
        u(keys[4], (4 * HID, HID)),   # lstm2 weight_ih
        u(keys[5], (4 * HID, HID)),   # lstm2 weight_hh
        u(keys[6], (4 * HID,)),       # lstm2 bias_ih
        u(keys[7], (4 * HID,)),       # lstm2 bias_hh
        u(keys[8], (1, HID)),         # linear weight
        u(keys[9], (1,)),             # linear bias
    )
    packed = pack_params(raw_params)

    # Deterministic sine-wave style input, shape (B, T) like the PyTorch module.
    phase = jax.random.uniform(keys[10], (B, 1), jnp.float32, 0.0, 2.0 * jnp.pi)
    t_axis = jnp.arange(T, dtype=jnp.float32)[None, :]
    x = jnp.sin(0.4 * t_axis + phase).astype(jnp.float32)

    out = sine_with_lstm(x, packed, future=FUTURE)
    out = jax.block_until_ready(out)

    ref = ref_forward(x, raw_params, future=FUTURE)
    assert out.shape == (B, T + FUTURE), out.shape
    assert jnp.allclose(out, ref, atol=1e-3, rtol=1e-3), (
        f"max abs err = {float(jnp.max(jnp.abs(out - ref)))}")

    print("KERNEL_OK")
</pallas_src>

<mosaic_0001>
module attributes {stable_mosaic.version = 11 : i64} {
  func.func @sine_lstm_kernel(%arg0: memref<8x8x1xf32, #tpu.memory_space<vmem>>, %arg1: memref<64x256xf32, #tpu.memory_space<vmem>>, %arg2: memref<128x256xf32, #tpu.memory_space<vmem>>, %arg3: memref<1x64xf32, #tpu.memory_space<vmem>>, %arg4: memref<1x1xf32, #tpu.memory_space<vmem>>, %arg5: memref<12x8xf32, #tpu.memory_space<vmem>>, %arg6: memref<12x8x64xf32, #tpu.memory_space<vmem>>) attributes {dimension_semantics = [], scalar_prefetch = 0 : i64, scratch_operands = 1 : i64, tpu.core_type = #tpu.core_type<tc>} {
    %c0 = arith.constant 0 : index
    %c0_0 = arith.constant 0 : index
    %0 = vector.load %arg1[%c0, %c0_0] : memref<64x256xf32, #tpu.memory_space<vmem>>, vector<64x256xf32>
    %c0_1 = arith.constant 0 : index
    %c0_2 = arith.constant 0 : index
    %1 = vector.load %arg2[%c0_1, %c0_2] : memref<128x256xf32, #tpu.memory_space<vmem>>, vector<128x256xf32>
    %c0_3 = arith.constant 0 : index
    %c0_4 = arith.constant 0 : index
    %2 = vector.load %arg3[%c0_3, %c0_4] : memref<1x64xf32, #tpu.memory_space<vmem>>, vector<1x64xf32>
    %c0_5 = arith.constant 0 : index
    %c0_6 = arith.constant 0 : index
    %3 = vector.load %arg4[%c0_5, %c0_6] : memref<1x1xf32, #tpu.memory_space<vmem>>, vector<1x1xf32>
    %4 = tpu.iota {dimensions = array<i32: 1>} : vector<1x64xi32>
    %c51_i32 = arith.constant 51 : i32
    %5 = vector.broadcast %c51_i32 : i32 to vector<1x64xi32>
    %6 = arith.cmpi eq, %4, %5 : vector<1x64xi32>
    %c52_i32 = arith.constant 52 : i32
    %7 = vector.broadcast %c52_i32 : i32 to vector<1x64xi32>
    %8 = arith.cmpi eq, %4, %7 : vector<1x64xi32>
    %9 = tpu.iota {dimensions = array<i32: 1>} : vector<1x128xi32>
    %c51_i32_7 = arith.constant 51 : i32
    %10 = vector.broadcast %c51_i32_7 : i32 to vector<1x128xi32>
    %11 = arith.cmpi eq, %9, %10 : vector<1x128xi32>
    %cst = arith.constant 0.000000e+00 : f32
    %12 = vector.broadcast %cst : f32 to vector<8x64xf32>
    %c0_i32 = arith.constant 0 : i32
    %13 = arith.index_cast %c0_i32 : i32 to index
    %c0_8 = arith.constant 0 : index
    %c0_9 = arith.constant 0 : index
    %14 = vector.load %arg0[%13, %c0_8, %c0_9] : memref<8x8x1xf32, #tpu.memory_space<vmem>>, vector<1x8x1xf32>
    %15 = vector.shape_cast %14 : vector<1x8x1xf32> to vector<8x1xf32>
    %16 = vector.shape_cast %6 : vector<1x64xi1> to vector<1x64xi1>
    %17 = vector.broadcast %16 : vector<1x64xi1> to vector<8x64xi1>
    %18 = vector.shape_cast %15 : vector<8x1xf32> to vector<8x1xf32>
    %19 = vector.broadcast %18 : vector<8x1xf32> to vector<8x64xf32>
    %20 = arith.select %17, %19, %12 : vector<8x64xi1>, vector<8x64xf32>
    %cst_10 = arith.constant 1.000000e+00 : f32
    %21 = vector.shape_cast %8 : vector<1x64xi1> to vector<1x64xi1>
    %22 = vector.broadcast %21 : vector<1x64xi1> to vector<8x64xi1>
    %23 = vector.broadcast %cst_10 : f32 to vector<8x64xf32>
    %24 = arith.select %22, %23, %20 : vector<8x64xi1>, vector<8x64xf32>
    %cst_11 = arith.constant dense<0.000000e+00> : vector<8x256xf32>
    %25 = tpu.matmul %24, %0, %cst_11 {dimension_numbers = #tpu.dot_dimension_numbers<[1], [0], [0], [1], [0, 0, 1, 1], [], []>} : vector<8x64xf32>, vector<64x256xf32>, vector<8x256xf32> -> vector<8x256xf32>
    %26 = vector.extract_strided_slice %25 {offsets = [0, 0], sizes = [8, 192], strides = [1, 1]} : vector<8x256xf32> to vector<8x192xf32>
    %27 = arith.negf %26 : vector<8x192xf32>
    %28 = math.exp %27 : vector<8x192xf32>
    %cst_12 = arith.constant 1.000000e+00 : f32
    %29 = vector.broadcast %cst_12 : f32 to vector<8x192xf32>
    %30 = arith.addf %29, %28 : vector<8x192xf32>
    %31 = arith.divf %29, %30 : vector<8x192xf32>
    %32 = vector.extract_strided_slice %25 {offsets = [0, 192], sizes = [8, 64], strides = [1, 1]} : vector<8x256xf32> to vector<8x64xf32>
    %33 = math.tanh %32 : vector<8x64xf32>
    %34 = vector.extract_strided_slice %31 {offsets = [0, 0], sizes = [8, 64], strides = [1, 1]} : vector<8x192xf32> to vector<8x64xf32>
    %35 = vector.extract_strided_slice %31 {offsets = [0, 64], sizes = [8, 64], strides = [1, 1]} : vector<8x192xf32> to vector<8x64xf32>
    %36 = vector.extract_strided_slice %31 {offsets = [0, 128], sizes = [8, 64], strides = [1, 1]} : vector<8x192xf32> to vector<8x64xf32>
    %37 = arith.mulf %35, %12 : vector<8x64xf32>
    %38 = arith.mulf %34, %33 : vector<8x64xf32>
    %39 = arith.addf %37, %38 : vector<8x64xf32>
    %40 = math.tanh %39 : vector<8x64xf32>
    %41 = arith.mulf %36, %40 : vector<8x64xf32>
    %42 = tpu.concatenate %41, %12 in 1 : vector<8x64xf32>, vector<8x64xf32> -> vector<8x128xf32>
    %cst_13 = arith.constant 1.000000e+00 : f32
    %43 = vector.shape_cast %11 : vector<1x128xi1> to vector<1x128xi1>
    %44 = vector.broadcast %43 : vector<1x128xi1> to vector<8x128xi1>
    %45 = vector.broadcast %cst_13 : f32 to vector<8x128xf32>
    %46 = arith.select %44, %45, %42 : vector<8x128xi1>, vector<8x128xf32>
    %cst_14 = arith.constant dense<0.000000e+00> : vector<8x256xf32>
    %47 = tpu.matmul %46, %1, %cst_14 {dimension_numbers = #tpu.dot_dimension_numbers<[1], [0], [0], [1], [0, 0, 1, 1], [], []>} : vector<8x128xf32>, vector<128x256xf32>, vector<8x256xf32> -> vector<8x256xf32>
    %48 = vector.extract_strided_slice %47 {offsets = [0, 0], sizes = [8, 192], strides = [1, 1]} : vector<8x256xf32> to vector<8x192xf32>
    %49 = arith.negf %48 : vector<8x192xf32>
    %50 = math.exp %49 : vector<8x192xf32>
    %cst_15 = arith.constant 1.000000e+00 : f32
    %51 = vector.broadcast %cst_15 : f32 to vector<8x192xf32>
    %52 = arith.addf %51, %50 : vector<8x192xf32>
    %53 = arith.divf %51, %52 : vector<8x192xf32>
    %54 = vector.extract_strided_slice %47 {offsets = [0, 192], sizes = [8, 64], strides = [1, 1]} : vector<8x256xf32> to vector<8x64xf32>
    %55 = math.tanh %54 : vector<8x64xf32>
    %56 = vector.extract_strided_slice %53 {offsets = [0, 0], sizes = [8, 64], strides = [1, 1]} : vector<8x192xf32> to vector<8x64xf32>
    %57 = vector.extract_strided_slice %53 {offsets = [0, 64], sizes = [8, 64], strides = [1, 1]} : vector<8x192xf32> to vector<8x64xf32>
    %58 = vector.extract_strided_slice %53 {offsets = [0, 128], sizes = [8, 64], strides = [1, 1]} : vector<8x192xf32> to vector<8x64xf32>
    %59 = arith.mulf %57, %12 : vector<8x64xf32>
    %60 = arith.mulf %56, %55 : vector<8x64xf32>
    %61 = arith.addf %59, %60 : vector<8x64xf32>
    %62 = math.tanh %61 : vector<8x64xf32>
    %63 = arith.mulf %58, %62 : vector<8x64xf32>
    %64 = arith.index_cast %c0_i32 : i32 to index
    %c0_16 = arith.constant 0 : index
    %c0_17 = arith.constant 0 : index
    %65 = vector.load %arg6[%64, %c0_16, %c0_17] : memref<12x8x64xf32, #tpu.memory_space<vmem>>, vector<1x8x64xf32>
    %66 = vector.shape_cast %65 : vector<1x8x64xf32> to vector<8x64xf32>
    %67 = vector.shape_cast %63 : vector<8x64xf32> to vector<1x8x64xf32>
    tpu.vector_store %arg6[%64, %c0_16, %c0_17], %67 {strides = array<i32>} : memref<12x8x64xf32, #tpu.memory_space<vmem>>, vector<1x8x64xf32>,
    %c1_i32 = arith.constant 1 : i32
    %68 = arith.index_cast %c1_i32 : i32 to index
    %c0_18 = arith.constant 0 : index
    %c0_19 = arith.constant 0 : index
    %69 = vector.load %arg0[%68, %c0_18, %c0_19] : memref<8x8x1xf32, #tpu.memory_space<vmem>>, vector<1x8x1xf32>
    %70 = vector.shape_cast %69 : vector<1x8x1xf32> to vector<8x1xf32>
    %71 = vector.shape_cast %6 : vector<1x64xi1> to vector<1x64xi1>
    %72 = vector.broadcast %71 : vector<1x64xi1> to vector<8x64xi1>
    %73 = vector.shape_cast %70 : vector<8x1xf32> to vector<8x1xf32>
    %74 = vector.broadcast %73 : vector<8x1xf32> to vector<8x64xf32>
    %75 = arith.select %72, %74, %41 : vector<8x64xi1>, vector<8x64xf32>
    %cst_20 = arith.constant 1.000000e+00 : f32
    %76 = vector.shape_cast %8 : vector<1x64xi1> to vector<1x64xi1>
    %77 = vector.broadcast %76 : vector<1x64xi1> to vector<8x64xi1>
    %78 = vector.broadcast %cst_20 : f32 to vector<8x64xf32>
    %79 = arith.select %77, %78, %75 : vector<8x64xi1>, vector<8x64xf32>
    %cst_21 = arith.constant dense<0.000000e+00> : vector<8x256xf32>
    %80 = tpu.matmul %79, %0, %cst_21 {dimension_numbers = #tpu.dot_dimension_numbers<[1], [0], [0], [1], [0, 0, 1, 1], [], []>} : vector<8x64xf32>, vector<64x256xf32>, vector<8x256xf32> -> vector<8x256xf32>
    %81 = vector.extract_strided_slice %80 {offsets = [0, 0], sizes = [8, 192], strides = [1, 1]} : vector<8x256xf32> to vector<8x192xf32>
    %82 = arith.negf %81 : vector<8x192xf32>
    %83 = math.exp %82 : vector<8x192xf32>
    %cst_22 = arith.constant 1.000000e+00 : f32
    %84 = vector.broadcast %cst_22 : f32 to vector<8x192xf32>
    %85 = arith.addf %84, %83 : vector<8x192xf32>
    %86 = arith.divf %84, %85 : vector<8x192xf32>
    %87 = vector.extract_strided_slice %80 {offsets = [0, 192], sizes = [8, 64], strides = [1, 1]} : vector<8x256xf32> to vector<8x64xf32>
    %88 = math.tanh %87 : vector<8x64xf32>
    %89 = vector.extract_strided_slice %86 {offsets = [0, 0], sizes = [8, 64], strides = [1, 1]} : vector<8x192xf32> to vector<8x64xf32>
    %90 = vector.extract_strided_slice %86 {offsets = [0, 64], sizes = [8, 64], strides = [1, 1]} : vector<8x192xf32> to vector<8x64xf32>
    %91 = vector.extract_strided_slice %86 {offsets = [0, 128], sizes = [8, 64], strides = [1, 1]} : vector<8x192xf32> to vector<8x64xf32>
    %92 = arith.mulf %90, %39 : vector<8x64xf32>
    %93 = arith.mulf %89, %88 : vector<8x64xf32>
    %94 = arith.addf %92, %93 : vector<8x64xf32>
    %95 = math.tanh %94 : vector<8x64xf32>
    %96 = arith.mulf %91, %95 : vector<8x64xf32>
    %97 = tpu.concatenate %96, %63 in 1 : vector<8x64xf32>, vector<8x64xf32> -> vector<8x128xf32>
    %cst_23 = arith.constant 1.000000e+00 : f32
    %98 = vector.shape_cast %11 : vector<1x128xi1> to vector<1x128xi1>
    %99 = vector.broadcast %98 : vector<1x128xi1> to vector<8x128xi1>
    %100 = vector.broadcast %cst_23 : f32 to vector<8x128xf32>
    %101 = arith.select %99, %100, %97 : vector<8x128xi1>, vector<8x128xf32>
    %cst_24 = arith.constant dense<0.000000e+00> : vector<8x256xf32>
    %102 = tpu.matmul %101, %1, %cst_24 {dimension_numbers = #tpu.dot_dimension_numbers<[1], [0], [0], [1], [0, 0, 1, 1], [], []>} : vector<8x128xf32>, vector<128x256xf32>, vector<8x256xf32> -> vector<8x256xf32>
    %103 = vector.extract_strided_slice %102 {offsets = [0, 0], sizes = [8, 192], strides = [1, 1]} : vector<8x256xf32> to vector<8x192xf32>
    %104 = arith.negf %103 : vector<8x192xf32>
    %105 = math.exp %104 : vector<8x192xf32>
    %cst_25 = arith.constant 1.000000e+00 : f32
    %106 = vector.broadcast %cst_25 : f32 to vector<8x192xf32>
    %107 = arith.addf %106, %105 : vector<8x192xf32>
    %108 = arith.divf %106, %107 : vector<8x192xf32>
    %109 = vector.extract_strided_slice %102 {offsets = [0, 192], sizes = [8, 64], strides = [1, 1]} : vector<8x256xf32> to vector<8x64xf32>
    %110 = math.tanh %109 : vector<8x64xf32>
    %111 = vector.extract_strided_slice %108 {offsets = [0, 0], sizes = [8, 64], strides = [1, 1]} : vector<8x192xf32> to vector<8x64xf32>
    %112 = vector.extract_strided_slice %108 {offsets = [0, 64], sizes = [8, 64], strides = [1, 1]} : vector<8x192xf32> to vector<8x64xf32>
    %113 = vector.extract_strided_slice %108 {offsets = [0, 128], sizes = [8, 64], strides = [1, 1]} : vector<8x192xf32> to vector<8x64xf32>
    %114 = arith.mulf %112, %61 : vector<8x64xf32>
    %115 = arith.mulf %111, %110 : vector<8x64xf32>
    %116 = arith.addf %114, %115 : vector<8x64xf32>
    %117 = math.tanh %116 : vector<8x64xf32>
    %118 = arith.mulf %113, %117 : vector<8x64xf32>
    %119 = arith.index_cast %c1_i32 : i32 to index
    %c0_26 = arith.constant 0 : index
    %c0_27 = arith.constant 0 : index
    %120 = vector.load %arg6[%119, %c0_26, %c0_27] : memref<12x8x64xf32, #tpu.memory_space<vmem>>, vector<1x8x64xf32>
    %121 = vector.shape_cast %120 : vector<1x8x64xf32> to vector<8x64xf32>
    %122 = vector.shape_cast %118 : vector<8x64xf32> to vector<1x8x64xf32>
    tpu.vector_store %arg6[%119, %c0_26, %c0_27], %122 {strides = array<i32>} : memref<12x8x64xf32, #tpu.memory_space<vmem>>, vector<1x8x64xf32>,
    %c2_i32 = arith.constant 2 : i32
    %123 = arith.index_cast %c2_i32 : i32 to index
    %c0_28 = arith.constant 0 : index
    %c0_29 = arith.constant 0 : index
    %124 = vector.load %arg0[%123, %c0_28, %c0_29] : memref<8x8x1xf32, #tpu.memory_space<vmem>>, vector<1x8x1xf32>
    %125 = vector.shape_cast %124 : vector<1x8x1xf32> to vector<8x1xf32>
    %126 = vector.shape_cast %6 : vector<1x64xi1> to vector<1x64xi1>
    %127 = vector.broadcast %126 : vector<1x64xi1> to vector<8x64xi1>
    %128 = vector.shape_cast %125 : vector<8x1xf32> to vector<8x1xf32>
    %129 = vector.broadcast %128 : vector<8x1xf32> to vector<8x64xf32>
    %130 = arith.select %127, %129, %96 : vector<8x64xi1>, vector<8x64xf32>
    %cst_30 = arith.constant 1.000000e+00 : f32
    %131 = vector.shape_cast %8 : vector<1x64xi1> to vector<1x64xi1>
    %132 = vector.broadcast %131 : vector<1x64xi1> to vector<8x64xi1>
    %133 = vector.broadcast %cst_30 : f32 to vector<8x64xf32>
    %134 = arith.select %132, %133, %130 : vector<8x64xi1>, vector<8x64xf32>
    %cst_31 = arith.constant dense<0.000000e+00> : vector<8x256xf32>
    %135 = tpu.matmul %134, %0, %cst_31 {dimension_numbers = #tpu.dot_dimension_numbers<[1], [0], [0], [1], [0, 0, 1, 1], [], []>} : vector<8x64xf32>, vector<64x256xf32>, vector<8x256xf32> -> vector<8x256xf32>
    %136 = vector.extract_strided_slice %135 {offsets = [0, 0], sizes = [8, 192], strides = [1, 1]} : vector<8x256xf32> to vector<8x192xf32>
    %137 = arith.negf %136 : vector<8x192xf32>
    %138 = math.exp %137 : vector<8x192xf32>
    %cst_32 = arith.constant 1.000000e+00 : f32
    %139 = vector.broadcast %cst_32 : f32 to vector<8x192xf32>
    %140 = arith.addf %139, %138 : vector<8x192xf32>
    %141 = arith.divf %139, %140 : vector<8x192xf32>
    %142 = vector.extract_strided_slice %135 {offsets = [0, 192], sizes = [8, 64], strides = [1, 1]} : vector<8x256xf32> to vector<8x64xf32>
    %143 = math.tanh %142 : vector<8x64xf32>
    %144 = vector.extract_strided_slice %141 {offsets = [0, 0], sizes = [8, 64], strides = [1, 1]} : vector<8x192xf32> to vector<8x64xf32>
    %145 = vector.extract_strided_slice %141 {offsets = [0, 64], sizes = [8, 64], strides = [1, 1]} : vector<8x192xf32> to vector<8x64xf32>
    %146 = vector.extract_strided_slice %141 {offsets = [0, 128], sizes = [8, 64], strides = [1, 1]} : vector<8x192xf32> to vector<8x64xf32>
    %147 = arith.mulf %145, %94 : vector<8x64xf32>
    %148 = arith.mulf %144, %143 : vector<8x64xf32>
    %149 = arith.addf %147, %148 : vector<8x64xf32>
    %150 = math.tanh %149 : vector<8x64xf32>
    %151 = arith.mulf %146, %150 : vector<8x64xf32>
    %152 = tpu.concatenate %151, %118 in 1 : vector<8x64xf32>, vector<8x64xf32> -> vector<8x128xf32>
    %cst_33 = arith.constant 1.000000e+00 : f32
    %153 = vector.shape_cast %11 : vector<1x128xi1> to vector<1x128xi1>
    %154 = vector.broadcast %153 : vector<1x128xi1> to vector<8x128xi1>
    %155 = vector.broadcast %cst_33 : f32 to vector<8x128xf32>
    %156 = arith.select %154, %155, %152 : vector<8x128xi1>, vector<8x128xf32>
    %cst_34 = arith.constant dense<0.000000e+00> : vector<8x256xf32>
    %157 = tpu.matmul %156, %1, %cst_34 {dimension_numbers = #tpu.dot_dimension_numbers<[1], [0], [0], [1], [0, 0, 1, 1], [], []>} : vector<8x128xf32>, vector<128x256xf32>, vector<8x256xf32> -> vector<8x256xf32>
    %158 = vector.extract_strided_slice %157 {offsets = [0, 0], sizes = [8, 192], strides = [1, 1]} : vector<8x256xf32> to vector<8x192xf32>
    %159 = arith.negf %158 : vector<8x192xf32>
    %160 = math.exp %159 : vector<8x192xf32>
    %cst_35 = arith.constant 1.000000e+00 : f32
    %161 = vector.broadcast %cst_35 : f32 to vector<8x192xf32>
    %162 = arith.addf %161, %160 : vector<8x192xf32>
    %163 = arith.divf %161, %162 : vector<8x192xf32>
    %164 = vector.extract_strided_slice %157 {offsets = [0, 192], sizes = [8, 64], strides = [1, 1]} : vector<8x256xf32> to vector<8x64xf32>
    %165 = math.tanh %164 : vector<8x64xf32>
    %166 = vector.extract_strided_slice %163 {offsets = [0, 0], sizes = [8, 64], strides = [1, 1]} : vector<8x192xf32> to vector<8x64xf32>
    %167 = vector.extract_strided_slice %163 {offsets = [0, 64], sizes = [8, 64], strides = [1, 1]} : vector<8x192xf32> to vector<8x64xf32>
    %168 = vector.extract_strided_slice %163 {offsets = [0, 128], sizes = [8, 64], strides = [1, 1]} : vector<8x192xf32> to vector<8x64xf32>
    %169 = arith.mulf %167, %116 : vector<8x64xf32>
    %170 = arith.mulf %166, %165 : vector<8x64xf32>
    %171 = arith.addf %169, %170 : vector<8x64xf32>
    %172 = math.tanh %171 : vector<8x64xf32>
    %173 = arith.mulf %168, %172 : vector<8x64xf32>
    %174 = arith.index_cast %c2_i32 : i32 to index
    %c0_36 = arith.constant 0 : index
    %c0_37 = arith.constant 0 : index
    %175 = vector.load %arg6[%174, %c0_36, %c0_37] : memref<12x8x64xf32, #tpu.memory_space<vmem>>, vector<1x8x64xf32>
    %176 = vector.shape_cast %175 : vector<1x8x64xf32> to vector<8x64xf32>
    %177 = vector.shape_cast %173 : vector<8x64xf32> to vector<1x8x64xf32>
    tpu.vector_store %arg6[%174, %c0_36, %c0_37], %177 {strides = array<i32>} : memref<12x8x64xf32, #tpu.memory_space<vmem>>, vector<1x8x64xf32>,
    %c3_i32 = arith.constant 3 : i32
    %178 = arith.index_cast %c3_i32 : i32 to index
    %c0_38 = arith.constant 0 : index
    %c0_39 = arith.constant 0 : index
    %179 = vector.load %arg0[%178, %c0_38, %c0_39] : memref<8x8x1xf32, #tpu.memory_space<vmem>>, vector<1x8x1xf32>
    %180 = vector.shape_cast %179 : vector<1x8x1xf32> to vector<8x1xf32>
    %181 = vector.shape_cast %6 : vector<1x64xi1> to vector<1x64xi1>
    %182 = vector.broadcast %181 : vector<1x64xi1> to vector<8x64xi1>
    %183 = vector.shape_cast %180 : vector<8x1xf32> to vector<8x1xf32>
    %184 = vector.broadcast %183 : vector<8x1xf32> to vector<8x64xf32>
    %185 = arith.select %182, %184, %151 : vector<8x64xi1>, vector<8x64xf32>
    %cst_40 = arith.constant 1.000000e+00 : f32
    %186 = vector.shape_cast %8 : vector<1x64xi1> to vector<1x64xi1>
    %187 = vector.broadcast %186 : vector<1x64xi1> to vector<8x64xi1>
    %188 = vector.broadcast %cst_40 : f32 to vector<8x64xf32>
    %189 = arith.select %187, %188, %185 : vector<8x64xi1>, vector<8x64xf32>
    %cst_41 = arith.constant dense<0.000000e+00> : vector<8x256xf32>
    %190 = tpu.matmul %189, %0, %cst_41 {dimension_numbers = #tpu.dot_dimension_numbers<[1], [0], [0], [1], [0, 0, 1, 1], [], []>} : vector<8x64xf32>, vector<64x256xf32>, vector<8x256xf32> -> vector<8x256xf32>
    %191 = vector.extract_strided_slice %190 {offsets = [0, 0], sizes = [8, 192], strides = [1, 1]} : vector<8x256xf32> to vector<8x192xf32>
    %192 = arith.negf %191 : vector<8x192xf32>
    %193 = math.exp %192 : vector<8x192xf32>
    %cst_42 = arith.constant 1.000000e+00 : f32
    %194 = vector.broadcast %cst_42 : f32 to vector<8x192xf32>
    %195 = arith.addf %194, %193 : vector<8x192xf32>
    %196 = arith.divf %194, %195 : vector<8x192xf32>
    %197 = vector.extract_strided_slice %190 {offsets = [0, 192], sizes = [8, 64], strides = [1, 1]} : vector<8x256xf32> to vector<8x64xf32>
    %198 = math.tanh %197 : vector<8x64xf32>
    %199 = vector.extract_strided_slice %196 {offsets = [0, 0], sizes = [8, 64], strides = [1, 1]} : vector<8x192xf32> to vector<8x64xf32>
    %200 = vector.extract_strided_slice %196 {offsets = [0, 64], sizes = [8, 64], strides = [1, 1]} : vector<8x192xf32> to vector<8x64xf32>
    %201 = vector.extract_strided_slice %196 {offsets = [0, 128], sizes = [8, 64], strides = [1, 1]} : vector<8x192xf32> to vector<8x64xf32>
    %202 = arith.mulf %200, %149 : vector<8x64xf32>
    %203 = arith.mulf %199, %198 : vector<8x64xf32>
    %204 = arith.addf %202, %203 : vector<8x64xf32>
    %205 = math.tanh %204 : vector<8x64xf32>
    %206 = arith.mulf %201, %205 : vector<8x64xf32>
    %207 = tpu.concatenate %206, %173 in 1 : vector<8x64xf32>, vector<8x64xf32> -> vector<8x128xf32>
    %cst_43 = arith.constant 1.000000e+00 : f32
    %208 = vector.shape_cast %11 : vector<1x128xi1> to vector<1x128xi1>
    %209 = vector.broadcast %208 : vector<1x128xi1> to vector<8x128xi1>
    %210 = vector.broadcast %cst_43 : f32 to vector<8x128xf32>
    %211 = arith.select %209, %210, %207 : vector<8x128xi1>, vector<8x128xf32>
    %cst_44 = arith.constant dense<0.000000e+00> : vector<8x256xf32>
    %212 = tpu.matmul %211, %1, %cst_44 {dimension_numbers = #tpu.dot_dimension_numbers<[1], [0], [0], [1], [0, 0, 1, 1], [], []>} : vector<8x128xf32>, vector<128x256xf32>, vector<8x256xf32> -> vector<8x256xf32>
    %213 = vector.extract_strided_slice %212 {offsets = [0, 0], sizes = [8, 192], strides = [1, 1]} : vector<8x256xf32> to vector<8x192xf32>
    %214 = arith.negf %213 : vector<8x192xf32>
    %215 = math.exp %214 : vector<8x192xf32>
    %cst_45 = arith.constant 1.000000e+00 : f32
    %216 = vector.broadcast %cst_45 : f32 to vector<8x192xf32>
    %217 = arith.addf %216, %215 : vector<8x192xf32>
    %218 = arith.divf %216, %217 : vector<8x192xf32>
    %219 = vector.extract_strided_slice %212 {offsets = [0, 192], sizes = [8, 64], strides = [1, 1]} : vector<8x256xf32> to vector<8x64xf32>
    %220 = math.tanh %219 : vector<8x64xf32>
    %221 = vector.extract_strided_slice %218 {offsets = [0, 0], sizes = [8, 64], strides = [1, 1]} : vector<8x192xf32> to vector<8x64xf32>
    %222 = vector.extract_strided_slice %218 {offsets = [0, 64], sizes = [8, 64], strides = [1, 1]} : vector<8x192xf32> to vector<8x64xf32>
    %223 = vector.extract_strided_slice %218 {offsets = [0, 128], sizes = [8, 64], strides = [1, 1]} : vector<8x192xf32> to vector<8x64xf32>
    %224 = arith.mulf %222, %171 : vector<8x64xf32>
    %225 = arith.mulf %221, %220 : vector<8x64xf32>
    %226 = arith.addf %224, %225 : vector<8x64xf32>
    %227 = math.tanh %226 : vector<8x64xf32>
    %228 = arith.mulf %223, %227 : vector<8x64xf32>
    %229 = arith.index_cast %c3_i32 : i32 to index
    %c0_46 = arith.constant 0 : index
    %c0_47 = arith.constant 0 : index
    %230 = vector.load %arg6[%229, %c0_46, %c0_47] : memref<12x8x64xf32, #tpu.memory_space<vmem>>, vector<1x8x64xf32>
    %231 = vector.shape_cast %230 : vector<1x8x64xf32> to vector<8x64xf32>
    %232 = vector.shape_cast %228 : vector<8x64xf32> to vector<1x8x64xf32>
    tpu.vector_store %arg6[%229, %c0_46, %c0_47], %232 {strides = array<i32>} : memref<12x8x64xf32, #tpu.memory_space<vmem>>, vector<1x8x64xf32>,
    %c4_i32 = arith.constant 4 : i32
    %233 = arith.index_cast %c4_i32 : i32 to index
    %c0_48 = arith.constant 0 : index
    %c0_49 = arith.constant 0 : index
    %234 = vector.load %arg0[%233, %c0_48, %c0_49] : memref<8x8x1xf32, #tpu.memory_space<vmem>>, vector<1x8x1xf32>
    %235 = vector.shape_cast %234 : vector<1x8x1xf32> to vector<8x1xf32>
    %236 = vector.shape_cast %6 : vector<1x64xi1> to vector<1x64xi1>
    %237 = vector.broadcast %236 : vector<1x64xi1> to vector<8x64xi1>
    %238 = vector.shape_cast %235 : vector<8x1xf32> to vector<8x1xf32>
    %239 = vector.broadcast %238 : vector<8x1xf32> to vector<8x64xf32>
    %240 = arith.select %237, %239, %206 : vector<8x64xi1>, vector<8x64xf32>
    %cst_50 = arith.constant 1.000000e+00 : f32
    %241 = vector.shape_cast %8 : vector<1x64xi1> to vector<1x64xi1>
    %242 = vector.broadcast %241 : vector<1x64xi1> to vector<8x64xi1>
    %243 = vector.broadcast %cst_50 : f32 to vector<8x64xf32>
    %244 = arith.select %242, %243, %240 : vector<8x64xi1>, vector<8x64xf32>
    %cst_51 = arith.constant dense<0.000000e+00> : vector<8x256xf32>
    %245 = tpu.matmul %244, %0, %cst_51 {dimension_numbers = #tpu.dot_dimension_numbers<[1], [0], [0], [1], [0, 0, 1, 1], [], []>} : vector<8x64xf32>, vector<64x256xf32>, vector<8x256xf32> -> vector<8x256xf32>
    %246 = vector.extract_strided_slice %245 {offsets = [0, 0], sizes = [8, 192], strides = [1, 1]} : vector<8x256xf32> to vector<8x192xf32>
    %247 = arith.negf %246 : vector<8x192xf32>
    %248 = math.exp %247 : vector<8x192xf32>
    %cst_52 = arith.constant 1.000000e+00 : f32
    %249 = vector.broadcast %cst_52 : f32 to vector<8x192xf32>
    %250 = arith.addf %249, %248 : vector<8x192xf32>
    %251 = arith.divf %249, %250 : vector<8x192xf32>
    %252 = vector.extract_strided_slice %245 {offsets = [0, 192], sizes = [8, 64], strides = [1, 1]} : vector<8x256xf32> to vector<8x64xf32>
    %253 = math.tanh %252 : vector<8x64xf32>
    %254 = vector.extract_strided_slice %251 {offsets = [0, 0], sizes = [8, 64], strides = [1, 1]} : vector<8x192xf32> to vector<8x64xf32>
    %255 = vector.extract_strided_slice %251 {offsets = [0, 64], sizes = [8, 64], strides = [1, 1]} : vector<8x192xf32> to vector<8x64xf32>
    %256 = vector.extract_strided_slice %251 {offsets = [0, 128], sizes = [8, 64], strides = [1, 1]} : vector<8x192xf32> to vector<8x64xf32>
    %257 = arith.mulf %255, %204 : vector<8x64xf32>
    %258 = arith.mulf %254, %253 : vector<8x64xf32>
    %259 = arith.addf %257, %258 : vector<8x64xf32>
    %260 = math.tanh %259 : vector<8x64xf32>
    %261 = arith.mulf %256, %260 : vector<8x64xf32>
    %262 = tpu.concatenate %261, %228 in 1 : vector<8x64xf32>, vector<8x64xf32> -> vector<8x128xf32>
    %cst_53 = arith.constant 1.000000e+00 : f32
    %263 = vector.shape_cast %11 : vector<1x128xi1> to vector<1x128xi1>
    %264 = vector.broadcast %263 : vector<1x128xi1> to vector<8x128xi1>
    %265 = vector.broadcast %cst_53 : f32 to vector<8x128xf32>
    %266 = arith.select %264, %265, %262 : vector<8x128xi1>, vector<8x128xf32>
    %cst_54 = arith.constant dense<0.000000e+00> : vector<8x256xf32>
    %267 = tpu.matmul %266, %1, %cst_54 {dimension_numbers = #tpu.dot_dimension_numbers<[1], [0], [0], [1], [0, 0, 1, 1], [], []>} : vector<8x128xf32>, vector<128x256xf32>, vector<8x256xf32> -> vector<8x256xf32>
    %268 = vector.extract_strided_slice %267 {offsets = [0, 0], sizes = [8, 192], strides = [1, 1]} : vector<8x256xf32> to vector<8x192xf32>
    %269 = arith.negf %268 : vector<8x192xf32>
    %270 = math.exp %269 : vector<8x192xf32>
    %cst_55 = arith.constant 1.000000e+00 : f32
    %271 = vector.broadcast %cst_55 : f32 to vector<8x192xf32>
    %272 = arith.addf %271, %270 : vector<8x192xf32>
    %273 = arith.divf %271, %272 : vector<8x192xf32>
    %274 = vector.extract_strided_slice %267 {offsets = [0, 192], sizes = [8, 64], strides = [1, 1]} : vector<8x256xf32> to vector<8x64xf32>
    %275 = math.tanh %274 : vector<8x64xf32>
    %276 = vector.extract_strided_slice %273 {offsets = [0, 0], sizes = [8, 64], strides = [1, 1]} : vector<8x192xf32> to vector<8x64xf32>
    %277 = vector.extract_strided_slice %273 {offsets = [0, 64], sizes = [8, 64], strides = [1, 1]} : vector<8x192xf32> to vector<8x64xf32>
    %278 = vector.extract_strided_slice %273 {offsets = [0, 128], sizes = [8, 64], strides = [1, 1]} : vector<8x192xf32> to vector<8x64xf32>
    %279 = arith.mulf %277, %226 : vector<8x64xf32>
    %280 = arith.mulf %276, %275 : vector<8x64xf32>
    %281 = arith.addf %279, %280 : vector<8x64xf32>
    %282 = math.tanh %281 : vector<8x64xf32>
    %283 = arith.mulf %278, %282 : vector<8x64xf32>
    %284 = arith.index_cast %c4_i32 : i32 to index
    %c0_56 = arith.constant 0 : index
    %c0_57 = arith.constant 0 : index
    %285 = vector.load %arg6[%284, %c0_56, %c0_57] : memref<12x8x64xf32, #tpu.memory_space<vmem>>, vector<1x8x64xf32>
    %286 = vector.shape_cast %285 : vector<1x8x64xf32> to vector<8x64xf32>
    %287 = vector.shape_cast %283 : vector<8x64xf32> to vector<1x8x64xf32>
    tpu.vector_store %arg6[%284, %c0_56, %c0_57], %287 {strides = array<i32>} : memref<12x8x64xf32, #tpu.memory_space<vmem>>, vector<1x8x64xf32>,
    %c5_i32 = arith.constant 5 : i32
    %288 = arith.index_cast %c5_i32 : i32 to index
    %c0_58 = arith.constant 0 : index
    %c0_59 = arith.constant 0 : index
    %289 = vector.load %arg0[%288, %c0_58, %c0_59] : memref<8x8x1xf32, #tpu.memory_space<vmem>>, vector<1x8x1xf32>
    %290 = vector.shape_cast %289 : vector<1x8x1xf32> to vector<8x1xf32>
    %291 = vector.shape_cast %6 : vector<1x64xi1> to vector<1x64xi1>
    %292 = vector.broadcast %291 : vector<1x64xi1> to vector<8x64xi1>
    %293 = vector.shape_cast %290 : vector<8x1xf32> to vector<8x1xf32>
    %294 = vector.broadcast %293 : vector<8x1xf32> to vector<8x64xf32>
    %295 = arith.select %292, %294, %261 : vector<8x64xi1>, vector<8x64xf32>
    %cst_60 = arith.constant 1.000000e+00 : f32
    %296 = vector.shape_cast %8 : vector<1x64xi1> to vector<1x64xi1>
    %297 = vector.broadcast %296 : vector<1x64xi1> to vector<8x64xi1>
    %298 = vector.broadcast %cst_60 : f32 to vector<8x64xf32>
    %299 = arith.select %297, %298, %295 : vector<8x64xi1>, vector<8x64xf32>
    %cst_61 = arith.constant dense<0.000000e+00> : vector<8x256xf32>
    %300 = tpu.matmul %299, %0, %cst_61 {dimension_numbers = #tpu.dot_dimension_numbers<[1], [0], [0], [1], [0, 0, 1, 1], [], []>} : vector<8x64xf32>, vector<64x256xf32>, vector<8x256xf32> -> vector<8x256xf32>
    %301 = vector.extract_strided_slice %300 {offsets = [0, 0], sizes = [8, 192], strides = [1, 1]} : vector<8x256xf32> to vector<8x192xf32>
    %302 = arith.negf %301 : vector<8x192xf32>
    %303 = math.exp %302 : vector<8x192xf32>
    %cst_62 = arith.constant 1.000000e+00 : f32
    %304 = vector.broadcast %cst_62 : f32 to vector<8x192xf32>
    %305 = arith.addf %304, %303 : vector<8x192xf32>
    %306 = arith.divf %304, %305 : vector<8x192xf32>
    %307 = vector.extract_strided_slice %300 {offsets = [0, 192], sizes = [8, 64], strides = [1, 1]} : vector<8x256xf32> to vector<8x64xf32>
    %308 = math.tanh %307 : vector<8x64xf32>
    %309 = vector.extract_strided_slice %306 {offsets = [0, 0], sizes = [8, 64], strides = [1, 1]} : vector<8x192xf32> to vector<8x64xf32>
    %310 = vector.extract_strided_slice %306 {offsets = [0, 64], sizes = [8, 64], strides = [1, 1]} : vector<8x192xf32> to vector<8x64xf32>
    %311 = vector.extract_strided_slice %306 {offsets = [0, 128], sizes = [8, 64], strides = [1, 1]} : vector<8x192xf32> to vector<8x64xf32>
    %312 = arith.mulf %310, %259 : vector<8x64xf32>
    %313 = arith.mulf %309, %308 : vector<8x64xf32>
    %314 = arith.addf %312, %313 : vector<8x64xf32>
    %315 = math.tanh %314 : vector<8x64xf32>
    %316 = arith.mulf %311, %315 : vector<8x64xf32>
    %317 = tpu.concatenate %316, %283 in 1 : vector<8x64xf32>, vector<8x64xf32> -> vector<8x128xf32>
    %cst_63 = arith.constant 1.000000e+00 : f32
    %318 = vector.shape_cast %11 : vector<1x128xi1> to vector<1x128xi1>
    %319 = vector.broadcast %318 : vector<1x128xi1> to vector<8x128xi1>
    %320 = vector.broadcast %cst_63 : f32 to vector<8x128xf32>
    %321 = arith.select %319, %320, %317 : vector<8x128xi1>, vector<8x128xf32>
    %cst_64 = arith.constant dense<0.000000e+00> : vector<8x256xf32>
    %322 = tpu.matmul %321, %1, %cst_64 {dimension_numbers = #tpu.dot_dimension_numbers<[1], [0], [0], [1], [0, 0, 1, 1], [], []>} : vector<8x128xf32>, vector<128x256xf32>, vector<8x256xf32> -> vector<8x256xf32>
    %323 = vector.extract_strided_slice %322 {offsets = [0, 0], sizes = [8, 192], strides = [1, 1]} : vector<8x256xf32> to vector<8x192xf32>
    %324 = arith.negf %323 : vector<8x192xf32>
    %325 = math.exp %324 : vector<8x192xf32>
    %cst_65 = arith.constant 1.000000e+00 : f32
    %326 = vector.broadcast %cst_65 : f32 to vector<8x192xf32>
    %327 = arith.addf %326, %325 : vector<8x192xf32>
    %328 = arith.divf %326, %327 : vector<8x192xf32>
    %329 = vector.extract_strided_slice %322 {offsets = [0, 192], sizes = [8, 64], strides = [1, 1]} : vector<8x256xf32> to vector<8x64xf32>
    %330 = math.tanh %329 : vector<8x64xf32>
    %331 = vector.extract_strided_slice %328 {offsets = [0, 0], sizes = [8, 64], strides = [1, 1]} : vector<8x192xf32> to vector<8x64xf32>
    %332 = vector.extract_strided_slice %328 {offsets = [0, 64], sizes = [8, 64], strides = [1, 1]} : vector<8x192xf32> to vector<8x64xf32>
    %333 = vector.extract_strided_slice %328 {offsets = [0, 128], sizes = [8, 64], strides = [1, 1]} : vector<8x192xf32> to vector<8x64xf32>
    %334 = arith.mulf %332, %281 : vector<8x64xf32>
    %335 = arith.mulf %331, %330 : vector<8x64xf32>
    %336 = arith.addf %334, %335 : vector<8x64xf32>
    %337 = math.tanh %336 : vector<8x64xf32>
    %338 = arith.mulf %333, %337 : vector<8x64xf32>
    %339 = arith.index_cast %c5_i32 : i32 to index
    %c0_66 = arith.constant 0 : index
    %c0_67 = arith.constant 0 : index
    %340 = vector.load %arg6[%339, %c0_66, %c0_67] : memref<12x8x64xf32, #tpu.memory_space<vmem>>, vector<1x8x64xf32>
    %341 = vector.shape_cast %340 : vector<1x8x64xf32> to vector<8x64xf32>
    %342 = vector.shape_cast %338 : vector<8x64xf32> to vector<1x8x64xf32>
    tpu.vector_store %arg6[%339, %c0_66, %c0_67], %342 {strides = array<i32>} : memref<12x8x64xf32, #tpu.memory_space<vmem>>, vector<1x8x64xf32>,
    %c6_i32 = arith.constant 6 : i32
    %343 = arith.index_cast %c6_i32 : i32 to index
    %c0_68 = arith.constant 0 : index
    %c0_69 = arith.constant 0 : index
    %344 = vector.load %arg0[%343, %c0_68, %c0_69] : memref<8x8x1xf32, #tpu.memory_space<vmem>>, vector<1x8x1xf32>
    %345 = vector.shape_cast %344 : vector<1x8x1xf32> to vector<8x1xf32>
    %346 = vector.shape_cast %6 : vector<1x64xi1> to vector<1x64xi1>
    %347 = vector.broadcast %346 : vector<1x64xi1> to vector<8x64xi1>
    %348 = vector.shape_cast %345 : vector<8x1xf32> to vector<8x1xf32>
    %349 = vector.broadcast %348 : vector<8x1xf32> to vector<8x64xf32>
    %350 = arith.select %347, %349, %316 : vector<8x64xi1>, vector<8x64xf32>
    %cst_70 = arith.constant 1.000000e+00 : f32
    %351 = vector.shape_cast %8 : vector<1x64xi1> to vector<1x64xi1>
    %352 = vector.broadcast %351 : vector<1x64xi1> to vector<8x64xi1>
    %353 = vector.broadcast %cst_70 : f32 to vector<8x64xf32>
    %354 = arith.select %352, %353, %350 : vector<8x64xi1>, vector<8x64xf32>
    %cst_71 = arith.constant dense<0.000000e+00> : vector<8x256xf32>
    %355 = tpu.matmul %354, %0, %cst_71 {dimension_numbers = #tpu.dot_dimension_numbers<[1], [0], [0], [1], [0, 0, 1, 1], [], []>} : vector<8x64xf32>, vector<64x256xf32>, vector<8x256xf32> -> vector<8x256xf32>
    %356 = vector.extract_strided_slice %355 {offsets = [0, 0], sizes = [8, 192], strides = [1, 1]} : vector<8x256xf32> to vector<8x192xf32>
    %357 = arith.negf %356 : vector<8x192xf32>
    %358 = math.exp %357 : vector<8x192xf32>
    %cst_72 = arith.constant 1.000000e+00 : f32
    %359 = vector.broadcast %cst_72 : f32 to vector<8x192xf32>
    %360 = arith.addf %359, %358 : vector<8x192xf32>
    %361 = arith.divf %359, %360 : vector<8x192xf32>
    %362 = vector.extract_strided_slice %355 {offsets = [0, 192], sizes = [8, 64], strides = [1, 1]} : vector<8x256xf32> to vector<8x64xf32>
    %363 = math.tanh %362 : vector<8x64xf32>
    %364 = vector.extract_strided_slice %361 {offsets = [0, 0], sizes = [8, 64], strides = [1, 1]} : vector<8x192xf32> to vector<8x64xf32>
    %365 = vector.extract_strided_slice %361 {offsets = [0, 64], sizes = [8, 64], strides = [1, 1]} : vector<8x192xf32> to vector<8x64xf32>
    %366 = vector.extract_strided_slice %361 {offsets = [0, 128], sizes = [8, 64], strides = [1, 1]} : vector<8x192xf32> to vector<8x64xf32>
    %367 = arith.mulf %365, %314 : vector<8x64xf32>
    %368 = arith.mulf %364, %363 : vector<8x64xf32>
    %369 = arith.addf %367, %368 : vector<8x64xf32>
    %370 = math.tanh %369 : vector<8x64xf32>
    %371 = arith.mulf %366, %370 : vector<8x64xf32>
    %372 = tpu.concatenate %371, %338 in 1 : vector<8x64xf32>, vector<8x64xf32> -> vector<8x128xf32>
    %cst_73 = arith.constant 1.000000e+00 : f32
    %373 = vector.shape_cast %11 : vector<1x128xi1> to vector<1x128xi1>
    %374 = vector.broadcast %373 : vector<1x128xi1> to vector<8x128xi1>
    %375 = vector.broadcast %cst_73 : f32 to vector<8x128xf32>
    %376 = arith.select %374, %375, %372 : vector<8x128xi1>, vector<8x128xf32>
    %cst_74 = arith.constant dense<0.000000e+00> : vector<8x256xf32>
    %377 = tpu.matmul %376, %1, %cst_74 {dimension_numbers = #tpu.dot_dimension_numbers<[1], [0], [0], [1], [0, 0, 1, 1], [], []>} : vector<8x128xf32>, vector<128x256xf32>, vector<8x256xf32> -> vector<8x256xf32>
    %378 = vector.extract_strided_slice %377 {offsets = [0, 0], sizes = [8, 192], strides = [1, 1]} : vector<8x256xf32> to vector<8x192xf32>
    %379 = arith.negf %378 : vector<8x192xf32>
    %380 = math.exp %379 : vector<8x192xf32>
    %cst_75 = arith.constant 1.000000e+00 : f32
    %381 = vector.broadcast %cst_75 : f32 to vector<8x192xf32>
    %382 = arith.addf %381, %380 : vector<8x192xf32>
    %383 = arith.divf %381, %382 : vector<8x192xf32>
    %384 = vector.extract_strided_slice %377 {offsets = [0, 192], sizes = [8, 64], strides = [1, 1]} : vector<8x256xf32> to vector<8x64xf32>
    %385 = math.tanh %384 : vector<8x64xf32>
    %386 = vector.extract_strided_slice %383 {offsets = [0, 0], sizes = [8, 64], strides = [1, 1]} : vector<8x192xf32> to vector<8x64xf32>
    %387 = vector.extract_strided_slice %383 {offsets = [0, 64], sizes = [8, 64], strides = [1, 1]} : vector<8x192xf32> to vector<8x64xf32>
    %388 = vector.extract_strided_slice %383 {offsets = [0, 128], sizes = [8, 64], strides = [1, 1]} : vector<8x192xf32> to vector<8x64xf32>
    %389 = arith.mulf %387, %336 : vector<8x64xf32>
    %390 = arith.mulf %386, %385 : vector<8x64xf32>
    %391 = arith.addf %389, %390 : vector<8x64xf32>
    %392 = math.tanh %391 : vector<8x64xf32>
    %393 = arith.mulf %388, %392 : vector<8x64xf32>
    %394 = arith.index_cast %c6_i32 : i32 to index
    %c0_76 = arith.constant 0 : index
    %c0_77 = arith.constant 0 : index
    %395 = vector.load %arg6[%394, %c0_76, %c0_77] : memref<12x8x64xf32, #tpu.memory_space<vmem>>, vector<1x8x64xf32>
    %396 = vector.shape_cast %395 : vector<1x8x64xf32> to vector<8x64xf32>
    %397 = vector.shape_cast %393 : vector<8x64xf32> to vector<1x8x64xf32>
    tpu.vector_store %arg6[%394, %c0_76, %c0_77], %397 {strides = array<i32>} : memref<12x8x64xf32, #tpu.memory_space<vmem>>, vector<1x8x64xf32>,
    %c7_i32 = arith.constant 7 : i32
    %398 = arith.index_cast %c7_i32 : i32 to index
    %c0_78 = arith.constant 0 : index
    %c0_79 = arith.constant 0 : index
    %399 = vector.load %arg0[%398, %c0_78, %c0_79] : memref<8x8x1xf32, #tpu.memory_space<vmem>>, vector<1x8x1xf32>
    %400 = vector.shape_cast %399 : vector<1x8x1xf32> to vector<8x1xf32>
    %401 = vector.shape_cast %6 : vector<1x64xi1> to vector<1x64xi1>
    %402 = vector.broadcast %401 : vector<1x64xi1> to vector<8x64xi1>
    %403 = vector.shape_cast %400 : vector<8x1xf32> to vector<8x1xf32>
    %404 = vector.broadcast %403 : vector<8x1xf32> to vector<8x64xf32>
    %405 = arith.select %402, %404, %371 : vector<8x64xi1>, vector<8x64xf32>
    %cst_80 = arith.constant 1.000000e+00 : f32
    %406 = vector.shape_cast %8 : vector<1x64xi1> to vector<1x64xi1>
    %407 = vector.broadcast %406 : vector<1x64xi1> to vector<8x64xi1>
    %408 = vector.broadcast %cst_80 : f32 to vector<8x64xf32>
    %409 = arith.select %407, %408, %405 : vector<8x64xi1>, vector<8x64xf32>
    %cst_81 = arith.constant dense<0.000000e+00> : vector<8x256xf32>
    %410 = tpu.matmul %409, %0, %cst_81 {dimension_numbers = #tpu.dot_dimension_numbers<[1], [0], [0], [1], [0, 0, 1, 1], [], []>} : vector<8x64xf32>, vector<64x256xf32>, vector<8x256xf32> -> vector<8x256xf32>
    %411 = vector.extract_strided_slice %410 {offsets = [0, 0], sizes = [8, 192], strides = [1, 1]} : vector<8x256xf32> to vector<8x192xf32>
    %412 = arith.negf %411 : vector<8x192xf32>
    %413 = math.exp %412 : vector<8x192xf32>
    %cst_82 = arith.constant 1.000000e+00 : f32
    %414 = vector.broadcast %cst_82 : f32 to vector<8x192xf32>
    %415 = arith.addf %414, %413 : vector<8x192xf32>
    %416 = arith.divf %414, %415 : vector<8x192xf32>
    %417 = vector.extract_strided_slice %410 {offsets = [0, 192], sizes = [8, 64], strides = [1, 1]} : vector<8x256xf32> to vector<8x64xf32>
    %418 = math.tanh %417 : vector<8x64xf32>
    %419 = vector.extract_strided_slice %416 {offsets = [0, 0], sizes = [8, 64], strides = [1, 1]} : vector<8x192xf32> to vector<8x64xf32>
    %420 = vector.extract_strided_slice %416 {offsets = [0, 64], sizes = [8, 64], strides = [1, 1]} : vector<8x192xf32> to vector<8x64xf32>
    %421 = vector.extract_strided_slice %416 {offsets = [0, 128], sizes = [8, 64], strides = [1, 1]} : vector<8x192xf32> to vector<8x64xf32>
    %422 = arith.mulf %420, %369 : vector<8x64xf32>
    %423 = arith.mulf %419, %418 : vector<8x64xf32>
    %424 = arith.addf %422, %423 : vector<8x64xf32>
    %425 = math.tanh %424 : vector<8x64xf32>
    %426 = arith.mulf %421, %425 : vector<8x64xf32>
    %427 = tpu.concatenate %426, %393 in 1 : vector<8x64xf32>, vector<8x64xf32> -> vector<8x128xf32>
    %cst_83 = arith.constant 1.000000e+00 : f32
    %428 = vector.shape_cast %11 : vector<1x128xi1> to vector<1x128xi1>
    %429 = vector.broadcast %428 : vector<1x128xi1> to vector<8x128xi1>
    %430 = vector.broadcast %cst_83 : f32 to vector<8x128xf32>
    %431 = arith.select %429, %430, %427 : vector<8x128xi1>, vector<8x128xf32>
    %cst_84 = arith.constant dense<0.000000e+00> : vector<8x256xf32>
    %432 = tpu.matmul %431, %1, %cst_84 {dimension_numbers = #tpu.dot_dimension_numbers<[1], [0], [0], [1], [0, 0, 1, 1], [], []>} : vector<8x128xf32>, vector<128x256xf32>, vector<8x256xf32> -> vector<8x256xf32>
    %433 = vector.extract_strided_slice %432 {offsets = [0, 0], sizes = [8, 192], strides = [1, 1]} : vector<8x256xf32> to vector<8x192xf32>
    %434 = arith.negf %433 : vector<8x192xf32>
    %435 = math.exp %434 : vector<8x192xf32>
    %cst_85 = arith.constant 1.000000e+00 : f32
    %436 = vector.broadcast %cst_85 : f32 to vector<8x192xf32>
    %437 = arith.addf %436, %435 : vector<8x192xf32>
    %438 = arith.divf %436, %437 : vector<8x192xf32>
    %439 = vector.extract_strided_slice %432 {offsets = [0, 192], sizes = [8, 64], strides = [1, 1]} : vector<8x256xf32> to vector<8x64xf32>
    %440 = math.tanh %439 : vector<8x64xf32>
    %441 = vector.extract_strided_slice %438 {offsets = [0, 0], sizes = [8, 64], strides = [1, 1]} : vector<8x192xf32> to vector<8x64xf32>
    %442 = vector.extract_strided_slice %438 {offsets = [0, 64], sizes = [8, 64], strides = [1, 1]} : vector<8x192xf32> to vector<8x64xf32>
    %443 = vector.extract_strided_slice %438 {offsets = [0, 128], sizes = [8, 64], strides = [1, 1]} : vector<8x192xf32> to vector<8x64xf32>
    %444 = arith.mulf %442, %391 : vector<8x64xf32>
    %445 = arith.mulf %441, %440 : vector<8x64xf32>
    %446 = arith.addf %444, %445 : vector<8x64xf32>
    %447 = math.tanh %446 : vector<8x64xf32>
    %448 = arith.mulf %443, %447 : vector<8x64xf32>
    %449 = arith.index_cast %c7_i32 : i32 to index
    %c0_86 = arith.constant 0 : index
    %c0_87 = arith.constant 0 : index
    %450 = vector.load %arg6[%449, %c0_86, %c0_87] : memref<12x8x64xf32, #tpu.memory_space<vmem>>, vector<1x8x64xf32>
    %451 = vector.shape_cast %450 : vector<1x8x64xf32> to vector<8x64xf32>
    %452 = vector.shape_cast %448 : vector<8x64xf32> to vector<1x8x64xf32>
    tpu.vector_store %arg6[%449, %c0_86, %c0_87], %452 {strides = array<i32>} : memref<12x8x64xf32, #tpu.memory_space<vmem>>, vector<1x8x64xf32>,
    %c8_i32 = arith.constant 8 : i32
    %c8_i32_88 = arith.constant 8 : i32
    %453 = vector.broadcast %2 : vector<1x64xf32> to vector<8x64xf32>
    %454 = arith.mulf %448, %453 : vector<8x64xf32>
    %cst_89 = arith.constant dense<0.000000e+00> : vector<8xf32>
    %455 = vector.multi_reduction <add>, %454, %cst_89 [1] : vector<8x64xf32> to vector<8xf32>
    %456 = vector.shape_cast %455 : vector<8xf32> to vector<8x1xf32>
    %457 = vector.broadcast %3 : vector<1x1xf32> to vector<8x1xf32>
    %458 = arith.addf %456, %457 : vector<8x1xf32>
    %459 = vector.shape_cast %6 : vector<1x64xi1> to vector<1x64xi1>
    %460 = vector.broadcast %459 : vector<1x64xi1> to vector<8x64xi1>
    %461 = vector.shape_cast %458 : vector<8x1xf32> to vector<8x1xf32>
    %462 = vector.broadcast %461 : vector<8x1xf32> to vector<8x64xf32>
    %463 = arith.select %460, %462, %426 : vector<8x64xi1>, vector<8x64xf32>
    %cst_90 = arith.constant 1.000000e+00 : f32
    %464 = vector.shape_cast %8 : vector<1x64xi1> to vector<1x64xi1>
    %465 = vector.broadcast %464 : vector<1x64xi1> to vector<8x64xi1>
    %466 = vector.broadcast %cst_90 : f32 to vector<8x64xf32>
    %467 = arith.select %465, %466, %463 : vector<8x64xi1>, vector<8x64xf32>
    %cst_91 = arith.constant dense<0.000000e+00> : vector<8x256xf32>
    %468 = tpu.matmul %467, %0, %cst_91 {dimension_numbers = #tpu.dot_dimension_numbers<[1], [0], [0], [1], [0, 0, 1, 1], [], []>} : vector<8x64xf32>, vector<64x256xf32>, vector<8x256xf32> -> vector<8x256xf32>
    %469 = vector.extract_strided_slice %468 {offsets = [0, 0], sizes = [8, 192], strides = [1, 1]} : vector<8x256xf32> to vector<8x192xf32>
    %470 = arith.negf %469 : vector<8x192xf32>
    %471 = math.exp %470 : vector<8x192xf32>
    %cst_92 = arith.constant 1.000000e+00 : f32
    %472 = vector.broadcast %cst_92 : f32 to vector<8x192xf32>
    %473 = arith.addf %472, %471 : vector<8x192xf32>
    %474 = arith.divf %472, %473 : vector<8x192xf32>
    %475 = vector.extract_strided_slice %468 {offsets = [0, 192], sizes = [8, 64], strides = [1, 1]} : vector<8x256xf32> to vector<8x64xf32>
    %476 = math.tanh %475 : vector<8x64xf32>
    %477 = vector.extract_strided_slice %474 {offsets = [0, 0], sizes = [8, 64], strides = [1, 1]} : vector<8x192xf32> to vector<8x64xf32>
    %478 = vector.extract_strided_slice %474 {offsets = [0, 64], sizes = [8, 64], strides = [1, 1]} : vector<8x192xf32> to vector<8x64xf32>
    %479 = vector.extract_strided_slice %474 {offsets = [0, 128], sizes = [8, 64], strides = [1, 1]} : vector<8x192xf32> to vector<8x64xf32>
    %480 = arith.mulf %478, %424 : vector<8x64xf32>
    %481 = arith.mulf %477, %476 : vector<8x64xf32>
    %482 = arith.addf %480, %481 : vector<8x64xf32>
    %483 = math.tanh %482 : vector<8x64xf32>
    %484 = arith.mulf %479, %483 : vector<8x64xf32>
    %485 = tpu.concatenate %484, %448 in 1 : vector<8x64xf32>, vector<8x64xf32> -> vector<8x128xf32>
    %cst_93 = arith.constant 1.000000e+00 : f32
    %486 = vector.shape_cast %11 : vector<1x128xi1> to vector<1x128xi1>
    %487 = vector.broadcast %486 : vector<1x128xi1> to vector<8x128xi1>
    %488 = vector.broadcast %cst_93 : f32 to vector<8x128xf32>
    %489 = arith.select %487, %488, %485 : vector<8x128xi1>, vector<8x128xf32>
    %cst_94 = arith.constant dense<0.000000e+00> : vector<8x256xf32>
    %490 = tpu.matmul %489, %1, %cst_94 {dimension_numbers = #tpu.dot_dimension_numbers<[1], [0], [0], [1], [0, 0, 1, 1], [], []>} : vector<8x128xf32>, vector<128x256xf32>, vector<8x256xf32> -> vector<8x256xf32>
    %491 = vector.extract_strided_slice %490 {offsets = [0, 0], sizes = [8, 192], strides = [1, 1]} : vector<8x256xf32> to vector<8x192xf32>
    %492 = arith.negf %491 : vector<8x192xf32>
    %493 = math.exp %492 : vector<8x192xf32>
    %cst_95 = arith.constant 1.000000e+00 : f32
    %494 = vector.broadcast %cst_95 : f32 to vector<8x192xf32>
    %495 = arith.addf %494, %493 : vector<8x192xf32>
    %496 = arith.divf %494, %495 : vector<8x192xf32>
    %497 = vector.extract_strided_slice %490 {offsets = [0, 192], sizes = [8, 64], strides = [1, 1]} : vector<8x256xf32> to vector<8x64xf32>
    %498 = math.tanh %497 : vector<8x64xf32>
    %499 = vector.extract_strided_slice %496 {offsets = [0, 0], sizes = [8, 64], strides = [1, 1]} : vector<8x192xf32> to vector<8x64xf32>
    %500 = vector.extract_strided_slice %496 {offsets = [0, 64], sizes = [8, 64], strides = [1, 1]} : vector<8x192xf32> to vector<8x64xf32>
    %501 = vector.extract_strided_slice %496 {offsets = [0, 128], sizes = [8, 64], strides = [1, 1]} : vector<8x192xf32> to vector<8x64xf32>
    %502 = arith.mulf %500, %446 : vector<8x64xf32>
    %503 = arith.mulf %499, %498 : vector<8x64xf32>
    %504 = arith.addf %502, %503 : vector<8x64xf32>
    %505 = math.tanh %504 : vector<8x64xf32>
    %506 = arith.mulf %501, %505 : vector<8x64xf32>
    %507 = arith.index_cast %c8_i32_88 : i32 to index
    %c0_96 = arith.constant 0 : index
    %c0_97 = arith.constant 0 : index
    %508 = vector.load %arg6[%507, %c0_96, %c0_97] : memref<12x8x64xf32, #tpu.memory_space<vmem>>, vector<1x8x64xf32>
    %509 = vector.shape_cast %508 : vector<1x8x64xf32> to vector<8x64xf32>
    %510 = vector.shape_cast %506 : vector<8x64xf32> to vector<1x8x64xf32>
    tpu.vector_store %arg6[%507, %c0_96, %c0_97], %510 {strides = array<i32>} : memref<12x8x64xf32, #tpu.memory_space<vmem>>, vector<1x8x64xf32>,
    %c9_i32 = arith.constant 9 : i32
    %511 = vector.broadcast %2 : vector<1x64xf32> to vector<8x64xf32>
    %512 = arith.mulf %506, %511 : vector<8x64xf32>
    %cst_98 = arith.constant dense<0.000000e+00> : vector<8xf32>
    %513 = vector.multi_reduction <add>, %512, %cst_98 [1] : vector<8x64xf32> to vector<8xf32>
    %514 = vector.shape_cast %513 : vector<8xf32> to vector<8x1xf32>
    %515 = vector.broadcast %3 : vector<1x1xf32> to vector<8x1xf32>
    %516 = arith.addf %514, %515 : vector<8x1xf32>
    %517 = vector.shape_cast %6 : vector<1x64xi1> to vector<1x64xi1>
    %518 = vector.broadcast %517 : vector<1x64xi1> to vector<8x64xi1>
    %519 = vector.shape_cast %516 : vector<8x1xf32> to vector<8x1xf32>
    %520 = vector.broadcast %519 : vector<8x1xf32> to vector<8x64xf32>
    %521 = arith.select %518, %520, %484 : vector<8x64xi1>, vector<8x64xf32>
    %cst_99 = arith.constant 1.000000e+00 : f32
    %522 = vector.shape_cast %8 : vector<1x64xi1> to vector<1x64xi1>
    %523 = vector.broadcast %522 : vector<1x64xi1> to vector<8x64xi1>
    %524 = vector.broadcast %cst_99 : f32 to vector<8x64xf32>
    %525 = arith.select %523, %524, %521 : vector<8x64xi1>, vector<8x64xf32>
    %cst_100 = arith.constant dense<0.000000e+00> : vector<8x256xf32>
    %526 = tpu.matmul %525, %0, %cst_100 {dimension_numbers = #tpu.dot_dimension_numbers<[1], [0], [0], [1], [0, 0, 1, 1], [], []>} : vector<8x64xf32>, vector<64x256xf32>, vector<8x256xf32> -> vector<8x256xf32>
    %527 = vector.extract_strided_slice %526 {offsets = [0, 0], sizes = [8, 192], strides = [1, 1]} : vector<8x256xf32> to vector<8x192xf32>
    %528 = arith.negf %527 : vector<8x192xf32>
    %529 = math.exp %528 : vector<8x192xf32>
    %cst_101 = arith.constant 1.000000e+00 : f32
    %530 = vector.broadcast %cst_101 : f32 to vector<8x192xf32>
    %531 = arith.addf %530, %529 : vector<8x192xf32>
    %532 = arith.divf %530, %531 : vector<8x192xf32>
    %533 = vector.extract_strided_slice %526 {offsets = [0, 192], sizes = [8, 64], strides = [1, 1]} : vector<8x256xf32> to vector<8x64xf32>
    %534 = math.tanh %533 : vector<8x64xf32>
    %535 = vector.extract_strided_slice %532 {offsets = [0, 0], sizes = [8, 64], strides = [1, 1]} : vector<8x192xf32> to vector<8x64xf32>
    %536 = vector.extract_strided_slice %532 {offsets = [0, 64], sizes = [8, 64], strides = [1, 1]} : vector<8x192xf32> to vector<8x64xf32>
    %537 = vector.extract_strided_slice %532 {offsets = [0, 128], sizes = [8, 64], strides = [1, 1]} : vector<8x192xf32> to vector<8x64xf32>
    %538 = arith.mulf %536, %482 : vector<8x64xf32>
    %539 = arith.mulf %535, %534 : vector<8x64xf32>
    %540 = arith.addf %538, %539 : vector<8x64xf32>
    %541 = math.tanh %540 : vector<8x64xf32>
    %542 = arith.mulf %537, %541 : vector<8x64xf32>
    %543 = tpu.concatenate %542, %506 in 1 : vector<8x64xf32>, vector<8x64xf32> -> vector<8x128xf32>
    %cst_102 = arith.constant 1.000000e+00 : f32
    %544 = vector.shape_cast %11 : vector<1x128xi1> to vector<1x128xi1>
    %545 = vector.broadcast %544 : vector<1x128xi1> to vector<8x128xi1>
    %546 = vector.broadcast %cst_102 : f32 to vector<8x128xf32>
    %547 = arith.select %545, %546, %543 : vector<8x128xi1>, vector<8x128xf32>
    %cst_103 = arith.constant dense<0.000000e+00> : vector<8x256xf32>
    %548 = tpu.matmul %547, %1, %cst_103 {dimension_numbers = #tpu.dot_dimension_numbers<[1], [0], [0], [1], [0, 0, 1, 1], [], []>} : vector<8x128xf32>, vector<128x256xf32>, vector<8x256xf32> -> vector<8x256xf32>
    %549 = vector.extract_strided_slice %548 {offsets = [0, 0], sizes = [8, 192], strides = [1, 1]} : vector<8x256xf32> to vector<8x192xf32>
    %550 = arith.negf %549 : vector<8x192xf32>
    %551 = math.exp %550 : vector<8x192xf32>
    %cst_104 = arith.constant 1.000000e+00 : f32
    %552 = vector.broadcast %cst_104 : f32 to vector<8x192xf32>
    %553 = arith.addf %552, %551 : vector<8x192xf32>
    %554 = arith.divf %552, %553 : vector<8x192xf32>
    %555 = vector.extract_strided_slice %548 {offsets = [0, 192], sizes = [8, 64], strides = [1, 1]} : vector<8x256xf32> to vector<8x64xf32>
    %556 = math.tanh %555 : vector<8x64xf32>
    %557 = vector.extract_strided_slice %554 {offsets = [0, 0], sizes = [8, 64], strides = [1, 1]} : vector<8x192xf32> to vector<8x64xf32>
    %558 = vector.extract_strided_slice %554 {offsets = [0, 64], sizes = [8, 64], strides = [1, 1]} : vector<8x192xf32> to vector<8x64xf32>
    %559 = vector.extract_strided_slice %554 {offsets = [0, 128], sizes = [8, 64], strides = [1, 1]} : vector<8x192xf32> to vector<8x64xf32>
    %560 = arith.mulf %558, %504 : vector<8x64xf32>
    %561 = arith.mulf %557, %556 : vector<8x64xf32>
    %562 = arith.addf %560, %561 : vector<8x64xf32>
    %563 = math.tanh %562 : vector<8x64xf32>
    %564 = arith.mulf %559, %563 : vector<8x64xf32>
    %565 = arith.index_cast %c9_i32 : i32 to index
    %c0_105 = arith.constant 0 : index
    %c0_106 = arith.constant 0 : index
    %566 = vector.load %arg6[%565, %c0_105, %c0_106] : memref<12x8x64xf32, #tpu.memory_space<vmem>>, vector<1x8x64xf32>
    %567 = vector.shape_cast %566 : vector<1x8x64xf32> to vector<8x64xf32>
    %568 = vector.shape_cast %564 : vector<8x64xf32> to vector<1x8x64xf32>
    tpu.vector_store %arg6[%565, %c0_105, %c0_106], %568 {strides = array<i32>} : memref<12x8x64xf32, #tpu.memory_space<vmem>>, vector<1x8x64xf32>,
    %c10_i32 = arith.constant 10 : i32
    %569 = vector.broadcast %2 : vector<1x64xf32> to vector<8x64xf32>
    %570 = arith.mulf %564, %569 : vector<8x64xf32>
    %cst_107 = arith.constant dense<0.000000e+00> : vector<8xf32>
    %571 = vector.multi_reduction <add>, %570, %cst_107 [1] : vector<8x64xf32> to vector<8xf32>
    %572 = vector.shape_cast %571 : vector<8xf32> to vector<8x1xf32>
    %573 = vector.broadcast %3 : vector<1x1xf32> to vector<8x1xf32>
    %574 = arith.addf %572, %573 : vector<8x1xf32>
    %575 = vector.shape_cast %6 : vector<1x64xi1> to vector<1x64xi1>
    %576 = vector.broadcast %575 : vector<1x64xi1> to vector<8x64xi1>
    %577 = vector.shape_cast %574 : vector<8x1xf32> to vector<8x1xf32>
    %578 = vector.broadcast %577 : vector<8x1xf32> to vector<8x64xf32>
    %579 = arith.select %576, %578, %542 : vector<8x64xi1>, vector<8x64xf32>
    %cst_108 = arith.constant 1.000000e+00 : f32
    %580 = vector.shape_cast %8 : vector<1x64xi1> to vector<1x64xi1>
    %581 = vector.broadcast %580 : vector<1x64xi1> to vector<8x64xi1>
    %582 = vector.broadcast %cst_108 : f32 to vector<8x64xf32>
    %583 = arith.select %581, %582, %579 : vector<8x64xi1>, vector<8x64xf32>
    %cst_109 = arith.constant dense<0.000000e+00> : vector<8x256xf32>
    %584 = tpu.matmul %583, %0, %cst_109 {dimension_numbers = #tpu.dot_dimension_numbers<[1], [0], [0], [1], [0, 0, 1, 1], [], []>} : vector<8x64xf32>, vector<64x256xf32>, vector<8x256xf32> -> vector<8x256xf32>
    %585 = vector.extract_strided_slice %584 {offsets = [0, 0], sizes = [8, 192], strides = [1, 1]} : vector<8x256xf32> to vector<8x192xf32>
    %586 = arith.negf %585 : vector<8x192xf32>
    %587 = math.exp %586 : vector<8x192xf32>
    %cst_110 = arith.constant 1.000000e+00 : f32
    %588 = vector.broadcast %cst_110 : f32 to vector<8x192xf32>
    %589 = arith.addf %588, %587 : vector<8x192xf32>
    %590 = arith.divf %588, %589 : vector<8x192xf32>
    %591 = vector.extract_strided_slice %584 {offsets = [0, 192], sizes = [8, 64], strides = [1, 1]} : vector<8x256xf32> to vector<8x64xf32>
    %592 = math.tanh %591 : vector<8x64xf32>
    %593 = vector.extract_strided_slice %590 {offsets = [0, 0], sizes = [8, 64], strides = [1, 1]} : vector<8x192xf32> to vector<8x64xf32>
    %594 = vector.extract_strided_slice %590 {offsets = [0, 64], sizes = [8, 64], strides = [1, 1]} : vector<8x192xf32> to vector<8x64xf32>
    %595 = vector.extract_strided_slice %590 {offsets = [0, 128], sizes = [8, 64], strides = [1, 1]} : vector<8x192xf32> to vector<8x64xf32>
    %596 = arith.mulf %594, %540 : vector<8x64xf32>
    %597 = arith.mulf %593, %592 : vector<8x64xf32>
    %598 = arith.addf %596, %597 : vector<8x64xf32>
    %599 = math.tanh %598 : vector<8x64xf32>
    %600 = arith.mulf %595, %599 : vector<8x64xf32>
    %601 = tpu.concatenate %600, %564 in 1 : vector<8x64xf32>, vector<8x64xf32> -> vector<8x128xf32>
    %cst_111 = arith.constant 1.000000e+00 : f32
    %602 = vector.shape_cast %11 : vector<1x128xi1> to vector<1x128xi1>
    %603 = vector.broadcast %602 : vector<1x128xi1> to vector<8x128xi1>
    %604 = vector.broadcast %cst_111 : f32 to vector<8x128xf32>
    %605 = arith.select %603, %604, %601 : vector<8x128xi1>, vector<8x128xf32>
    %cst_112 = arith.constant dense<0.000000e+00> : vector<8x256xf32>
    %606 = tpu.matmul %605, %1, %cst_112 {dimension_numbers = #tpu.dot_dimension_numbers<[1], [0], [0], [1], [0, 0, 1, 1], [], []>} : vector<8x128xf32>, vector<128x256xf32>, vector<8x256xf32> -> vector<8x256xf32>
    %607 = vector.extract_strided_slice %606 {offsets = [0, 0], sizes = [8, 192], strides = [1, 1]} : vector<8x256xf32> to vector<8x192xf32>
    %608 = arith.negf %607 : vector<8x192xf32>
    %609 = math.exp %608 : vector<8x192xf32>
    %cst_113 = arith.constant 1.000000e+00 : f32
    %610 = vector.broadcast %cst_113 : f32 to vector<8x192xf32>
    %611 = arith.addf %610, %609 : vector<8x192xf32>
    %612 = arith.divf %610, %611 : vector<8x192xf32>
    %613 = vector.extract_strided_slice %606 {offsets = [0, 192], sizes = [8, 64], strides = [1, 1]} : vector<8x256xf32> to vector<8x64xf32>
    %614 = math.tanh %613 : vector<8x64xf32>
    %615 = vector.extract_strided_slice %612 {offsets = [0, 0], sizes = [8, 64], strides = [1, 1]} : vector<8x192xf32> to vector<8x64xf32>
    %616 = vector.extract_strided_slice %612 {offsets = [0, 64], sizes = [8, 64], strides = [1, 1]} : vector<8x192xf32> to vector<8x64xf32>
    %617 = vector.extract_strided_slice %612 {offsets = [0, 128], sizes = [8, 64], strides = [1, 1]} : vector<8x192xf32> to vector<8x64xf32>
    %618 = arith.mulf %616, %562 : vector<8x64xf32>
    %619 = arith.mulf %615, %614 : vector<8x64xf32>
    %620 = arith.addf %618, %619 : vector<8x64xf32>
    %621 = math.tanh %620 : vector<8x64xf32>
    %622 = arith.mulf %617, %621 : vector<8x64xf32>
    %623 = arith.index_cast %c10_i32 : i32 to index
    %c0_114 = arith.constant 0 : index
    %c0_115 = arith.constant 0 : index
    %624 = vector.load %arg6[%623, %c0_114, %c0_115] : memref<12x8x64xf32, #tpu.memory_space<vmem>>, vector<1x8x64xf32>
    %625 = vector.shape_cast %624 : vector<1x8x64xf32> to vector<8x64xf32>
    %626 = vector.shape_cast %622 : vector<8x64xf32> to vector<1x8x64xf32>
    tpu.vector_store %arg6[%623, %c0_114, %c0_115], %626 {strides = array<i32>} : memref<12x8x64xf32, #tpu.memory_space<vmem>>, vector<1x8x64xf32>,
    %c11_i32 = arith.constant 11 : i32
    %627 = vector.broadcast %2 : vector<1x64xf32> to vector<8x64xf32>
    %628 = arith.mulf %622, %627 : vector<8x64xf32>
    %cst_116 = arith.constant dense<0.000000e+00> : vector<8xf32>
    %629 = vector.multi_reduction <add>, %628, %cst_116 [1] : vector<8x64xf32> to vector<8xf32>
    %630 = vector.shape_cast %629 : vector<8xf32> to vector<8x1xf32>
    %631 = vector.broadcast %3 : vector<1x1xf32> to vector<8x1xf32>
    %632 = arith.addf %630, %631 : vector<8x1xf32>
    %633 = vector.shape_cast %6 : vector<1x64xi1> to vector<1x64xi1>
    %634 = vector.broadcast %633 : vector<1x64xi1> to vector<8x64xi1>
    %635 = vector.shape_cast %632 : vector<8x1xf32> to vector<8x1xf32>
    %636 = vector.broadcast %635 : vector<8x1xf32> to vector<8x64xf32>
    %637 = arith.select %634, %636, %600 : vector<8x64xi1>, vector<8x64xf32>
    %cst_117 = arith.constant 1.000000e+00 : f32
    %638 = vector.shape_cast %8 : vector<1x64xi1> to vector<1x64xi1>
    %639 = vector.broadcast %638 : vector<1x64xi1> to vector<8x64xi1>
    %640 = vector.broadcast %cst_117 : f32 to vector<8x64xf32>
    %641 = arith.select %639, %640, %637 : vector<8x64xi1>, vector<8x64xf32>
    %cst_118 = arith.constant dense<0.000000e+00> : vector<8x256xf32>
    %642 = tpu.matmul %641, %0, %cst_118 {dimension_numbers = #tpu.dot_dimension_numbers<[1], [0], [0], [1], [0, 0, 1, 1], [], []>} : vector<8x64xf32>, vector<64x256xf32>, vector<8x256xf32> -> vector<8x256xf32>
    %643 = vector.extract_strided_slice %642 {offsets = [0, 0], sizes = [8, 192], strides = [1, 1]} : vector<8x256xf32> to vector<8x192xf32>
    %644 = arith.negf %643 : vector<8x192xf32>
    %645 = math.exp %644 : vector<8x192xf32>
    %cst_119 = arith.constant 1.000000e+00 : f32
    %646 = vector.broadcast %cst_119 : f32 to vector<8x192xf32>
    %647 = arith.addf %646, %645 : vector<8x192xf32>
    %648 = arith.divf %646, %647 : vector<8x192xf32>
    %649 = vector.extract_strided_slice %642 {offsets = [0, 192], sizes = [8, 64], strides = [1, 1]} : vector<8x256xf32> to vector<8x64xf32>
    %650 = math.tanh %649 : vector<8x64xf32>
    %651 = vector.extract_strided_slice %648 {offsets = [0, 0], sizes = [8, 64], strides = [1, 1]} : vector<8x192xf32> to vector<8x64xf32>
    %652 = vector.extract_strided_slice %648 {offsets = [0, 64], sizes = [8, 64], strides = [1, 1]} : vector<8x192xf32> to vector<8x64xf32>
    %653 = vector.extract_strided_slice %648 {offsets = [0, 128], sizes = [8, 64], strides = [1, 1]} : vector<8x192xf32> to vector<8x64xf32>
    %654 = arith.mulf %652, %598 : vector<8x64xf32>
    %655 = arith.mulf %651, %650 : vector<8x64xf32>
    %656 = arith.addf %654, %655 : vector<8x64xf32>
    %657 = math.tanh %656 : vector<8x64xf32>
    %658 = arith.mulf %653, %657 : vector<8x64xf32>
    %659 = tpu.concatenate %658, %622 in 1 : vector<8x64xf32>, vector<8x64xf32> -> vector<8x128xf32>
    %cst_120 = arith.constant 1.000000e+00 : f32
    %660 = vector.shape_cast %11 : vector<1x128xi1> to vector<1x128xi1>
    %661 = vector.broadcast %660 : vector<1x128xi1> to vector<8x128xi1>
    %662 = vector.broadcast %cst_120 : f32 to vector<8x128xf32>
    %663 = arith.select %661, %662, %659 : vector<8x128xi1>, vector<8x128xf32>
    %cst_121 = arith.constant dense<0.000000e+00> : vector<8x256xf32>
    %664 = tpu.matmul %663, %1, %cst_121 {dimension_numbers = #tpu.dot_dimension_numbers<[1], [0], [0], [1], [0, 0, 1, 1], [], []>} : vector<8x128xf32>, vector<128x256xf32>, vector<8x256xf32> -> vector<8x256xf32>
    %665 = vector.extract_strided_slice %664 {offsets = [0, 0], sizes = [8, 192], strides = [1, 1]} : vector<8x256xf32> to vector<8x192xf32>
    %666 = arith.negf %665 : vector<8x192xf32>
    %667 = math.exp %666 : vector<8x192xf32>
    %cst_122 = arith.constant 1.000000e+00 : f32
    %668 = vector.broadcast %cst_122 : f32 to vector<8x192xf32>
    %669 = arith.addf %668, %667 : vector<8x192xf32>
    %670 = arith.divf %668, %669 : vector<8x192xf32>
    %671 = vector.extract_strided_slice %664 {offsets = [0, 192], sizes = [8, 64], strides = [1, 1]} : vector<8x256xf32> to vector<8x64xf32>
    %672 = math.tanh %671 : vector<8x64xf32>
    %673 = vector.extract_strided_slice %670 {offsets = [0, 0], sizes = [8, 64], strides = [1, 1]} : vector<8x192xf32> to vector<8x64xf32>
    %674 = vector.extract_strided_slice %670 {offsets = [0, 64], sizes = [8, 64], strides = [1, 1]} : vector<8x192xf32> to vector<8x64xf32>
    %675 = vector.extract_strided_slice %670 {offsets = [0, 128], sizes = [8, 64], strides = [1, 1]} : vector<8x192xf32> to vector<8x64xf32>
    %676 = arith.mulf %674, %620 : vector<8x64xf32>
    %677 = arith.mulf %673, %672 : vector<8x64xf32>
    %678 = arith.addf %676, %677 : vector<8x64xf32>
    %679 = math.tanh %678 : vector<8x64xf32>
    %680 = arith.mulf %675, %679 : vector<8x64xf32>
    %681 = arith.index_cast %c11_i32 : i32 to index
    %c0_123 = arith.constant 0 : index
    %c0_124 = arith.constant 0 : index
    %682 = vector.load %arg6[%681, %c0_123, %c0_124] : memref<12x8x64xf32, #tpu.memory_space<vmem>>, vector<1x8x64xf32>
    %683 = vector.shape_cast %682 : vector<1x8x64xf32> to vector<8x64xf32>
    %684 = vector.shape_cast %680 : vector<8x64xf32> to vector<1x8x64xf32>
    tpu.vector_store %arg6[%681, %c0_123, %c0_124], %684 {strides = array<i32>} : memref<12x8x64xf32, #tpu.memory_space<vmem>>, vector<1x8x64xf32>,
    %c4_i32_125 = arith.constant 4 : i32
    %c0_126 = arith.constant 0 : index
    %c0_127 = arith.constant 0 : index
    %c0_128 = arith.constant 0 : index
    %685 = vector.load %arg6[%c0_126, %c0_127, %c0_128] : memref<12x8x64xf32, #tpu.memory_space<vmem>>, vector<12x8x64xf32>
    %686 = vector.shape_cast %2 : vector<1x64xf32> to vector<1x1x64xf32>
    %687 = vector.broadcast %686 : vector<1x1x64xf32> to vector<12x8x64xf32>
    %688 = arith.mulf %685, %687 : vector<12x8x64xf32>
    %cst_129 = arith.constant dense<0.000000e+00> : vector<12x8xf32>
    %689 = vector.multi_reduction <add>, %688, %cst_129 [2] : vector<12x8x64xf32> to vector<12x8xf32>
    %690 = vector.broadcast %3 : vector<1x1xf32> to vector<12x8xf32>
    %691 = arith.addf %689, %690 : vector<12x8xf32>
    %c0_130 = arith.constant 0 : index
    %c0_131 = arith.constant 0 : index
    %692 = vector.load %arg5[%c0_130, %c0_131] : memref<12x8xf32, #tpu.memory_space<vmem>>, vector<12x8xf32>
    tpu.vector_store %arg5[%c0_130, %c0_131], %691 {strides = array<i32>} : memref<12x8xf32, #tpu.memory_space<vmem>>, vector<12x8xf32>,
    return
  }
}

</mosaic_0001>

<bundles_post_ra>
// kernel: sine_with_lstm.1
= control target key start
LH: loop header
LB: loop body
LE: loop exit
PB: predicated region body
PF: predicated region fallthrough
CT: control target
= control target key end

     0   :  { %s4763_s0 = inlined_call_operand.vmem [shape: f32[8,8,1], index: 0, kind: input, shape index: {}]   ;;  %s4764_s1 = inlined_call_operand.vmem [shape: f32[64,256], index: 1, kind: input, shape index: {}]   ;;  %s4765_s2 = inlined_call_operand.hbm [shape: f32[128,256], index: 2, kind: input, shape index: {}]   ;;  %s4766_s3 = inlined_call_operand.vmem [shape: f32[1,64], index: 3, kind: input, shape index: {}]   ;;  %s4767_s4 = inlined_call_operand.<no memory space> [shape: f32[1,1], index: 4, kind: input, shape index: {}]   ;;  %s4768_s5 = inlined_call_operand.vmem [shape: f32[12,8], index: 5, kind: output, shape index: {}]  }
   0x1   :  { %v10_v0 = vstv %s4767_s4 }
   0x2   :  { %11 = vst [vmem:[#allocation3] sm:$0x1] %v10_v0 }
   0x3   :  { %12 = vsyncpa [#allocation5], 0  ;;  %s3906_s20 = smov [#allocation4]   ;;  %s3882_s24 = scalar_lea.hbm %s4765_s2, 4096 }
   0x4   :  { %s22_s21 = sshll.u32 %s3906_s20, 4  ;;  %p3883_p0 = scmp.ne.s32.totalorder %s4765_s2, %s3882_s24  ;;  %s23_s21 = int_to_ptr.vmem [resolvable:$true] %s22_s21 }
   0x5   :  { %p3886_p1 = scmp.lt.u32.totalorder %s3882_s24, %s4765_s2 }
   0x7   :  { %p3888_p2 = pnand %p3886_p1, %p3883_p0 }
   0x9   :  { %3891 = shalt.err (!%p3888_p2)
}
   0xa   :  { %s3892_s4 = scalar_lea.vmem %s23_s21, 4096  ;;  %p3897_p4 = scmp.lt.s32.totalorder %s23_s21, %s23_s21 }
   0xb   :  { %p3893_p3 = scmp.ne.s32.totalorder %s23_s21, %s3892_s4  ;;  %p3898_p5 = scmp.lt.s32.totalorder %s3892_s4, %s3892_s4 }
   0xd   :  { %p3899_p6 = por %p3898_p5, %p3897_p4 }
   0xf   :  { %p3900_p7 = pnand %p3899_p6, %p3893_p3 }
  0x11   :  { %3903 = shalt.err (!%p3900_p7)
}
  0x12   :  { %s3907_s29 = smov 256   ;;  %s3908_s30 = smov 16  }
  0x13   :  { %28 = dma.hbm_to_vmem [thread:$0]  %s4765_s2, 4096, %s23_s21, [#allocation5], %s3907_s29, %s3907_s29, %s3908_s30  }
  0x14   :  { %3904 = dma.done.wait [#allocation5], 4096  }
  0x15   :  { %3905 = vsyncadd [#allocation5], 4294963200  ;;  %v86_v1 = vlaneseq  ;;  %v3909_v2 = vmov 0   ;;  %v90_v6 = vld [vmem:[%s4763_s0] sm:$0xff]  ;;  %v37_v7 = vld [vmem:[%s4764_s1 + $0x8] sm:$0xff]  ;;  %v3910_v17 = vmov 0.0  }
  0x16   :  { %3592 = vset.pattern.permute.xlu0 %v3909_v2  ;;  %3593 = vset.pattern.permute.xlu1 %v3909_v2  ;;  %v39_v8 = vld [vmem:[%s4764_s1 + $0x18] sm:$0xff]  ;;  %v36_v10 = vld [vmem:[%s4764_s1] sm:$0xff]  ;;  %v38_v11 = vld [vmem:[%s4764_s1 + $0x10] sm:$0xff]  ;;  %vm102_vm2 = vcmask 523264   ;;  %vm2913_vm3 = vcmask 1041409   ;;  %vm2915_vm4 = vcmask 1042434  }
  0x17   :  { %v3957_v3 = vand.u32 127, %v86_v1  ;;  %v2866_v4 = vshrl.u32 %v86_v1, 7  ;;  %95 = vperm.xlu0 %3592, %v90_v6   ;;  %v3971_v9 = vpack.c.bf16 %v39_v8, %v37_v7  ;;  %v41_v12 = vld [vmem:[%s4764_s1 + $0x28] sm:$0xff]  ;;  %v3982_v13 = vpack.c.bf16 %v38_v11, %v36_v10  ;;  %v43_v14 = vld [vmem:[%s4764_s1 + $0x38] sm:$0xff]  ;;  %v40_v15 = vld [vmem:[%s4764_s1 + $0x20] sm:$0xff]  ;;  %170 = vmatprep.mubr.f32.mxu1 %v3910_v17 }
  0x18   :  { %v42_v16 = vld [vmem:[%s4764_s1 + $0x30] sm:$0xff]  ;;  %387 = vmatprep.mubr.f32.mxu0 %v3910_v17  ;;  %v3996_v18 = vpack.c.bf16 %v43_v14, %v41_v12  ;;  %v45_v19 = vld [vmem:[%s4764_s1 + $0x48] sm:$0xff]  ;;  %v47_v20 = vld [vmem:[%s4764_s1 + $0x58] sm:$0xff]  ;;  %vm2917_vm5 = vcmask 1043459   ;;  %vm2919_vm6 = vcmask 1044484   ;;  %vm2921_vm7 = vcmask 1045509  }
  0x19   :  { %v3960_v5 = vsub.s32 %v3957_v3, %v2866_v4  ;;  %3011 = vmatprep.subr.bf16.mxu1 %v3971_v9  ;;  %3059 = vmatprep.subr.bf16.mxu0 %v3971_v9  ;;  %v4006_v21 = vpack.c.bf16 %v42_v16, %v40_v15  ;;  %v4010_v22 = vpack.c.bf16 %v47_v20, %v45_v19  ;;  %v44_v23 = vld [vmem:[%s4764_s1 + $0x40] sm:$0xff]  ;;  %v46_v24 = vld [vmem:[%s4764_s1 + $0x50] sm:$0xff]  ;;  %v49_v25 = vld [vmem:[%s4764_s1 + $0x68] sm:$0xff]  ;;  %vm88_vm0 = vcmp.eq.s32.totalorder %v3957_v3, 51 }
  0x1a   :  { %3013 = vmatpush1.bf16.msra.mxu1 %v3982_v13  ;;  %3061 = vmatpush1.bf16.msra.mxu0 %v3982_v13  ;;  %v51_v26 = vld [vmem:[%s4764_s1 + $0x78] sm:$0xff]  ;;  %v4026_v27 = vpack.c.bf16 %v46_v24, %v44_v23  ;;  %v48_v29 = vld [vmem:[%s4764_s1 + $0x60] sm:$0xff]  ;;  %v50_v30 = vld [vmem:[%s4764_s1 + $0x70] sm:$0xff]  ;;  %vm89_vm1 = vcmp.eq.s32.totalorder %v3957_v3, 52  ;;  %s3911_s1 = smov 64   ;;  %vm2923_vm8 = vcmask 1046534  }
  0x1b   :  { %3015 = vmatprep.subr.bf16.mxu1 %v3996_v18  ;;  %3063 = vmatprep.subr.bf16.mxu0 %v3996_v18  ;;  %v4030_v28 = vpack.c.bf16 %v51_v26, %v49_v25  ;;  %v4040_v31 = vpack.c.bf16 %v50_v30, %v48_v29  ;;  %v2946_v38 = vld [vmem:[%s4763_s0 + $0x8] sm:$0xff]  ;;  %v55_v46 = vld [vmem:[#allocation4 + $0x18] sm:$0xff]  ;;  %v54_v49 = vld [vmem:[#allocation4 + $0x10] sm:$0xff]  ;;  %vm2925_vm9 = vcmask 1047559   ;;  %vm2932_vm10 = vcmask 64512  }
  0x1c   :  { %v53_v45 = vld [vmem:[#allocation4 + $0x8] sm:$0xff]  ;;  %v52_v47 = vld [vmem:[#allocation4] sm:$0xff]  ;;  %v59_v51 = vld [vmem:[#allocation4 + $0x38] sm:$0xff]  ;;  %vm2934_vm11 = vcmask 60416  }
  0x1d   :  { %v4063_v48 = vpack.c.bf16 %v55_v46, %v53_v45  ;;  %v57_v50 = vld [vmem:[#allocation4 + $0x28] sm:$0xff]  ;;  %v4065_v52 = vpack.c.bf16 %v54_v49, %v52_v47  ;;  %v56_v54 = vld [vmem:[#allocation4 + $0x20] sm:$0xff]  ;;  %v58_v55 = vld [vmem:[#allocation4 + $0x30] sm:$0xff] }
  0x1e   :  { %3017 = vmatpush1.bf16.msra.mxu1 %v4006_v21  ;;  %3065 = vmatpush1.bf16.msra.mxu0 %v4006_v21  ;;  %v4067_v53 = vpack.c.bf16 %v59_v51, %v57_v50  ;;  %v61_v56 = vld [vmem:[#allocation4 + $0x48] sm:$0xff]  ;;  %v63_v57 = vld [vmem:[#allocation4 + $0x58] sm:$0xff]  ;;  %v4072_v58 = vpack.c.bf16 %v58_v55, %v56_v54  ;;  %v60_v60 = vld [vmem:[#allocation4 + $0x40] sm:$0xff] }
  0x1f   :  { %3019 = vmatprep.subr.bf16.mxu1 %v4010_v22  ;;  %3067 = vmatprep.subr.bf16.mxu0 %v4010_v22  ;;  %v4075_v59 = vpack.c.bf16 %v63_v57, %v61_v56  ;;  %v62_v61 = vld [vmem:[#allocation4 + $0x50] sm:$0xff]  ;;  %v65_v62 = vld [vmem:[#allocation4 + $0x68] sm:$0xff]  ;;  %v67_v63 = vld [vmem:[#allocation4 + $0x78] sm:$0xff] }
  0x20   :  { %v4078_v0 = vpack.c.bf16 %v62_v61, %v60_v60  ;;  %v4081_v1 = vpack.c.bf16 %v67_v63, %v65_v62  ;;  %v64_v2 = vld [vmem:[#allocation4 + $0x60] sm:$0xff]  ;;  %v66_v4 = vld [vmem:[#allocation4 + $0x70] sm:$0xff]  ;;  %v69_v6 = vld [vmem:[#allocation4 + $0x88] sm:$0xff] }
  0x21   :  { %v71_v7 = vld [vmem:[#allocation4 + $0x98] sm:$0xff]  ;;  %v4084_v8 = vpack.c.bf16 %v66_v4, %v64_v2  ;;  %v68_v11 = vld [vmem:[#allocation4 + $0x80] sm:$0xff]  ;;  %v70_v12 = vld [vmem:[#allocation4 + $0x90] sm:$0xff] }
  0x22   :  { %3021 = vmatpush1.bf16.msra.mxu1 %v4026_v27  ;;  %3069 = vmatpush1.bf16.msra.mxu0 %v4026_v27  ;;  %v4087_v10 = vpack.c.bf16 %v71_v7, %v69_v6  ;;  %v73_v14 = vld [vmem:[#allocation4 + $0xa8] sm:$0xff]  ;;  %v75_v15 = vld [vmem:[#allocation4 + $0xb8] sm:$0xff]  ;;  %v4090_v16 = vpack.c.bf16 %v70_v12, %v68_v11  ;;  %v72_v20 = vld [vmem:[#allocation4 + $0xa0] sm:$0xff] }
  0x23   :  { %3023 = vmatprep.subr.bf16.mxu1 %v4030_v28  ;;  %3071 = vmatprep.subr.bf16.mxu0 %v4030_v28  ;;  %v4093_v19 = vpack.c.bf16 %v75_v15, %v73_v14  ;;  %v74_v23 = vld [vmem:[#allocation4 + $0xb0] sm:$0xff]  ;;  %v77_v24 = vld [vmem:[#allocation4 + $0xc8] sm:$0xff]  ;;  %v79_v25 = vld [vmem:[#allocation4 + $0xd8] sm:$0xff] }
  0x24   :  { %v4096_v26 = vpack.c.bf16 %v74_v23, %v72_v20  ;;  %v4099_v29 = vpack.c.bf16 %v79_v25, %v77_v24  ;;  %v76_v30 = vld [vmem:[#allocation4 + $0xc0] sm:$0xff] }
  0x26   :  { %3025 = vmatpush1.bf16.msra.mxu1 %v4040_v31  ;;  %3073 = vmatpush1.bf16.msra.mxu0 %v4040_v31 }
  0x27   :  { %3027 = vmatprep.subr.bf16.mxu1 %v4063_v48  ;;  %3075 = vmatprep.subr.bf16.mxu0 %v4063_v48 }
  0x96   :  { %v96_v32 = vpop.permute.xlu0 %95 }
  0x97   :  { %v98_v33 = vsel %vm88_vm0, %v96_v32, 0.0  ;;  %v78_v32 = vld [vmem:[#allocation4 + $0xd0] sm:$0xff] }
  0x98   :  { %v101_v34 = vsel %vm89_vm1, 1.0, %v98_v33  ;;  %v4102_v33 = vpack.c.bf16 %v78_v32, %v76_v30 }
  0x99   :  { %2941 = vmatmul.mubr.msk.f32.vlgmr.msra.gmra.mrb[0].mxu1 %vm102_vm2, %v101_v34  ;;  %v81_v34 = vld [vmem:[#allocation4 + $0xe8] sm:$0xff] }
  0x9a   :  { %273 = vmatprep.mubr.f32.mxu1 %v3910_v17  ;;  %3029 = vmatpush1.bf16.msra.mxu1 %v4065_v52 }
  0x9b   :  { %3031 = vmatprep.subr.bf16.mxu1 %v4067_v53 }
  0x9e   :  { %3033 = vmatpush1.bf16.msra.mxu1 %v4072_v58 }
  0x9f   :  { %3035 = vmatprep.subr.bf16.mxu1 %v4075_v59 }
  0xa2   :  { %3037 = vmatpush1.bf16.msra.mxu1 %v4078_v0 }
  0xa3   :  { %3039 = vmatprep.subr.bf16.mxu1 %v4081_v1 }
  0xa6   :  { %3041 = vmatpush1.bf16.msra.mxu1 %v4084_v8 }
  0xa7   :  { %3043 = vmatprep.subr.bf16.mxu1 %v4087_v10 }
  0xaa   :  { %3045 = vmatpush1.bf16.msra.mxu1 %v4090_v16 }
  0xab   :  { %3047 = vmatprep.subr.bf16.mxu1 %v4093_v19 }
  0xae   :  { %3049 = vmatpush1.bf16.msra.mxu1 %v4096_v26 }
  0xaf   :  { %3051 = vmatprep.subr.bf16.mxu1 %v4099_v29 }
  0xb2   :  { %3053 = vmatpush1.bf16.msra.mxu1 %v4102_v33 }
 0x16c   :  { %v172_v35 = vpop.f32.mrb[0].mxu1 }
 0x16d   :  { %v4055_v36 = vpop.f32.mrb[1].mxu1  ;;  %v2942_v39 = vmul.f32 -1.442695, %v172_v35  ;;  %v83_v35 = vld [vmem:[#allocation4 + $0xf8] sm:$0xff] }
 0x16e   :  { %3594 = vtanh.f32 %v4055_v36 }
 0x16f   :  { %3596 = vpow2.f32 %v2942_v39  ;;  %v80_v39 = vld [vmem:[#allocation4 + $0xe0] sm:$0xff] }
 0x178   :  { %v3595_v37 = vpop.eup %3594 }
 0x179   :  { %192 = vrot.lane.b32.xlu0 %v3595_v37, %s3911_s1  ;;  %v3597_v40 = vpop.eup %3596 }
 0x17a   :  { %v183_v41 = vadd.f32 1.0, %v3597_v40  ;;  %v82_v40 = vld [vmem:[#allocation4 + $0xf0] sm:$0xff] }
 0x17c   :  { %3598 = vrcp.f32 %v183_v41 }
 0x17d   :  { %315 = vperm.xlu0 %3592, %v2946_v38   ;;  %v4106_v38 = vpack.c.bf16 %v83_v35, %v81_v34 }
 0x17f   :  { %3055 = vmatprep.subr.bf16.mxu1 %v4106_v38 }
 0x186   :  { %v3599_v42 = vpop.eup %3598 }
 0x187   :  { %v190_v37 = vmul.f32 0.0, %v3599_v42 }
 0x1eb   :  { %v193_v43 = vpop.permute.xlu0 %192 }
 0x1ec   :  { %v195_v44 = vmul.f32 %v3599_v42, %v193_v43  ;;  %v4108_v43 = vpack.c.bf16 %v82_v40, %v80_v39  ;;  %v2943_v42 = vmul.f32 -1.442695, %v4055_v36 }
 0x1ee   :  { %197 = vrot.lane.b32.xlu1 %v195_v44, %s3911_s1  ;;  %3057 = vmatpush1.bf16.msra.mxu1 %v4108_v43 }
 0x1ef   :  { %3107 = vmatprep.subr.bf16.mxu1 %v3971_v9 }
 0x1fc   :  { %v316_v54 = vpop.permute.xlu0 %315 }
 0x260   :  { %v198_v41 = vpop.permute.xlu1 %197 }
 0x261   :  { %v4110_v44 = vadd.f32 %v198_v41, %v190_v37 }
 0x263   :  { %3600 = vtanh.f32 %v4110_v44 }
 0x264   :  { %3602 = vpow2.f32 %v2943_v42 }
 0x26d   :  { %v3601_v45 = vpop.eup %3600 }
 0x26e   :  { %203 = vrot.lane.b32.xlu1 %v3601_v45, %s3911_s1  ;;  %v3603_v46 = vpop.eup %3602 }
 0x26f   :  { %v184_v47 = vadd.f32 1.0, %v3603_v46  ;;  %v2952_v46 = vld [vmem:[%s4763_s0 + $0x10] sm:$0xff] }
 0x271   :  { %3604 = vrcp.f32 %v184_v47 }
 0x27b   :  { %v3605_v49 = vpop.eup %3604 }
 0x2e0   :  { %v204_v50 = vpop.permute.xlu1 %203 }
 0x2e1   :  { %v206_v51 = vmul.f32 %v3605_v49, %v204_v50 }
 0x2e3   :  { %v207_v55 = vsel %vm102_vm2, %v206_v51, 0.0  ;;  %v318_v56 = vsel %vm88_vm0, %v316_v54, %v206_v51 }
 0x2e4   :  { %v208_v57 = vsel %vm88_vm0, 1.0, %v207_v55  ;;  %v319_v60 = vsel %vm89_vm1, 1.0, %v318_v56 }
 0x2e5   :  { %274 = vmatmul.mubr.f32.vlgmr.msra.gmra.mrb[2].mxu1 %v208_v57  ;;  %2947 = vmatmul.mubr.msk.f32.vlgmr.msra.gmra.mrb[0].mxu0 %vm102_vm2, %v319_v60 }
 0x2e6   :  { %3109 = vmatpush1.bf16.msra.mxu1 %v3982_v13  ;;  %609 = vmatprep.mubr.f32.mxu1 %v3910_v17 }
 0x2e7   :  { %3111 = vmatprep.subr.bf16.mxu1 %v3996_v18  ;;  %3077 = vmatpush1.bf16.msra.mxu0 %v4065_v52 }
 0x2e8   :  { %3079 = vmatprep.subr.bf16.mxu0 %v4067_v53  ;;  %494 = vmatprep.mubr.f32.mxu0 %v3910_v17 }
 0x2ea   :  { %3113 = vmatpush1.bf16.msra.mxu1 %v4006_v21 }
 0x2eb   :  { %3115 = vmatprep.subr.bf16.mxu1 %v4010_v22  ;;  %3081 = vmatpush1.bf16.msra.mxu0 %v4072_v58 }
 0x2ec   :  { %3083 = vmatprep.subr.bf16.mxu0 %v4075_v59 }
 0x2ee   :  { %3117 = vmatpush1.bf16.msra.mxu1 %v4026_v27 }
 0x2ef   :  { %3119 = vmatprep.subr.bf16.mxu1 %v4030_v28  ;;  %3085 = vmatpush1.bf16.msra.mxu0 %v4078_v0 }
 0x2f0   :  { %3087 = vmatprep.subr.bf16.mxu0 %v4081_v1 }
 0x2f2   :  { %3121 = vmatpush1.bf16.msra.mxu1 %v4040_v31 }
 0x2f3   :  { %3089 = vmatpush1.bf16.msra.mxu0 %v4084_v8  ;;  %3123 = vmatprep.subr.bf16.mxu1 %v4063_v48 }
 0x2f4   :  { %3091 = vmatprep.subr.bf16.mxu0 %v4087_v10 }
 0x2f7   :  { %3093 = vmatpush1.bf16.msra.mxu0 %v4090_v16 }
 0x2f8   :  { %3095 = vmatprep.subr.bf16.mxu0 %v4093_v19 }
 0x2fb   :  { %3097 = vmatpush1.bf16.msra.mxu0 %v4096_v26 }
 0x2fc   :  { %3099 = vmatprep.subr.bf16.mxu0 %v4099_v29 }
 0x2ff   :  { %3101 = vmatpush1.bf16.msra.mxu0 %v4102_v33 }
 0x300   :  { %3103 = vmatprep.subr.bf16.mxu0 %v4106_v38 }
 0x303   :  { %3105 = vmatpush1.bf16.msra.mxu0 %v4108_v43 }
 0x304   :  { %3155 = vmatprep.subr.bf16.mxu0 %v3971_v9 }
 0x3b8   :  { %v275_v36 = vpop.f32.mrb[2].mxu1  ;;  %v389_v61 = vpop.f32.mrb[0].mxu0 }
 0x3b9   :  { %v277_v62 = vpop.f32.mrb[3].mxu1  ;;  %v391_v63 = vpop.f32.mrb[1].mxu0  ;;  %v2944_v6 = vmul.f32 -1.442695, %v275_v36  ;;  %v2948_v7 = vmul.f32 -1.442695, %v389_v61 }
 0x3ba   :  { %3606 = vtanh.f32 %v277_v62  ;;  %v2945_v47 = vmul.f32 -1.442695, %v277_v62  ;;  %v2949_v50 = vmul.f32 -1.442695, %v391_v63 }
 0x3bb   :  { %3608 = vtanh.f32 %v391_v63 }
 0x3bc   :  { %3610 = vpow2.f32 %v2944_v6 }
 0x3bd   :  { %3612 = vpow2.f32 %v2948_v7 }
 0x3c4   :  { %v3607_v2 = vpop.eup %3606 }
 0x3c5   :  { %295 = vrot.lane.b32.xlu1 %v3607_v2, %s3911_s1  ;;  %v3609_v4 = vpop.eup %3608 }
 0x3c6   :  { %409 = vrot.lane.b32.xlu0 %v3609_v4, %s3911_s1  ;;  %v3611_v11 = vpop.eup %3610 }
 0x3c7   :  { %v286_v12 = vadd.f32 1.0, %v3611_v11  ;;  %v3613_v14 = vpop.eup %3612 }
 0x3c8   :  { %v400_v15 = vadd.f32 1.0, %v3613_v14 }
 0x3c9   :  { %3614 = vrcp.f32 %v286_v12 }
 0x3ca   :  { %3616 = vrcp.f32 %v400_v15 }
 0x3d3   :  { %v3615_v20 = vpop.eup %3614 }
 0x3d4   :  { %v3617_v25 = vpop.eup %3616  ;;  %v293_v34 = vmul.f32 0.0, %v3615_v20 }
 0x3d5   :  { %v407_v39 = vmul.f32 %v3617_v25, %v4110_v44 }
 0x437   :  { %v296_v23 = vpop.permute.xlu1 %295 }
 0x438   :  { %v298_v24 = vmul.f32 %v3615_v20, %v296_v23  ;;  %v410_v30 = vpop.permute.xlu0 %409 }
 0x439   :  { %v412_v32 = vmul.f32 %v3617_v25, %v410_v30 }
 0x43a   :  { %300 = vrot.lane.b32.xlu1 %v298_v24, %s3911_s1 }
 0x43b   :  { %414 = vrot.lane.b32.xlu0 %v412_v32, %s3911_s1 }
 0x4ac   :  { %v301_v35 = vpop.permute.xlu1 %300 }
 0x4ad   :  { %v4156_v37 = vadd.f32 %v301_v35, %v293_v34  ;;  %v415_v40 = vpop.permute.xlu0 %414 }
 0x4ae   :  { %v4160_v41 = vadd.f32 %v415_v40, %v407_v39 }
 0x4af   :  { %3618 = vtanh.f32 %v4156_v37 }
 0x4b0   :  { %3620 = vtanh.f32 %v4160_v41 }
 0x4b1   :  { %3622 = vpow2.f32 %v2945_v47 }
 0x4b9   :  { %v3619_v45 = vpop.eup %3618 }
 0x4ba   :  { %306 = vrot.lane.b32.xlu1 %v3619_v45, %s3911_s1  ;;  %v3621_v42 = vpop.eup %3620 }
 0x4bb   :  { %420 = vrot.lane.b32.xlu0 %v3621_v42, %s3911_s1  ;;  %v3623_v49 = vpop.eup %3622 }
 0x4bc   :  { %v287_v44 = vadd.f32 1.0, %v3623_v49 }
 0x4be   :  { %3624 = vrcp.f32 %v287_v44 }
 0x4bf   :  { %537 = vperm.xlu0 %3592, %v2952_v46   ;;  %3626 = vpow2.f32 %v2949_v50 }
 0x4c8   :  { %v3625_v51 = vpop.eup %3624 }
 0x4c9   :  { %v3627_v56 = vpop.eup %3626 }
 0x4ca   :  { %v401_v57 = vadd.f32 1.0, %v3627_v56 }
 0x4cc   :  { %3628 = vrcp.f32 %v401_v57 }
 0x4d6   :  { %v3629_v36 = vpop.eup %3628 }
 0x52c   :  { %v307_v54 = vpop.permute.xlu1 %306 }
 0x52d   :  { %v309_v55 = vmul.f32 %v3625_v51, %v307_v54  ;;  %v421_v60 = vpop.permute.xlu0 %420  ;;  %v2958_v54 = vld [vmem:[%s4763_s0 + $0x18] sm:$0xff] }
 0x52e   :  { %v423_v61 = vmul.f32 %v3629_v36, %v421_v60 }
 0x52f   :  { %310 = vst.msk [vmem:[#allocation2] sm:$0xff] %vm102_vm2, %v309_v55  ;;  %425 = vrot.lane.b32.xlu1 %v309_v55, %s3911_s1 }
 0x53e   :  { %v538_v62 = vpop.permute.xlu0 %537 }
 0x53f   :  { %v540_v2 = vsel %vm88_vm0, %v538_v62, %v423_v61 }
 0x540   :  { %v541_v63 = vsel %vm89_vm1, 1.0, %v540_v2 }
 0x541   :  { %2953 = vmatmul.mubr.msk.f32.vlgmr.msra.gmra.mrb[4].mxu1 %vm102_vm2, %v541_v63 }
 0x542   :  { %3125 = vmatpush1.bf16.msra.mxu1 %v4065_v52  ;;  %716 = vmatprep.mubr.f32.mxu1 %v3910_v17 }
 0x543   :  { %3127 = vmatprep.subr.bf16.mxu1 %v4067_v53 }
 0x546   :  { %3129 = vmatpush1.bf16.msra.mxu1 %v4072_v58 }
 0x547   :  { %3131 = vmatprep.subr.bf16.mxu1 %v4075_v59 }
 0x54a   :  { %3133 = vmatpush1.bf16.msra.mxu1 %v4078_v0 }
 0x54b   :  { %3135 = vmatprep.subr.bf16.mxu1 %v4081_v1 }
 0x54e   :  { %3137 = vmatpush1.bf16.msra.mxu1 %v4084_v8 }
 0x54f   :  { %3139 = vmatprep.subr.bf16.mxu1 %v4087_v10 }
 0x552   :  { %3141 = vmatpush1.bf16.msra.mxu1 %v4090_v16 }
 0x553   :  { %3143 = vmatprep.subr.bf16.mxu1 %v4093_v19 }
 0x556   :  { %3145 = vmatpush1.bf16.msra.mxu1 %v4096_v26 }
 0x557   :  { %3147 = vmatprep.subr.bf16.mxu1 %v4099_v29 }
 0x55a   :  { %3149 = vmatpush1.bf16.msra.mxu1 %v4102_v33 }
 0x55b   :  { %3151 = vmatprep.subr.bf16.mxu1 %v4106_v38 }
 0x55e   :  { %3153 = vmatpush1.bf16.msra.mxu1 %v4108_v43 }
 0x55f   :  { %3203 = vmatprep.subr.bf16.mxu1 %v3971_v9 }
 0x5a1   :  { %v426_v4 = vpop.permute.xlu1 %425 }
 0x5a2   :  { %v428_v6 = vsel %vm102_vm2, %v423_v61, %v426_v4 }
 0x5a3   :  { %v429_v7 = vsel %vm88_vm0, 1.0, %v428_v6 }
 0x5a4   :  { %495 = vmatmul.mubr.f32.vlgmr.msra.gmra.mrb[2].mxu0 %v429_v7 }
 0x5a5   :  { %3157 = vmatpush1.bf16.msra.mxu0 %v3982_v13  ;;  %831 = vmatprep.mubr.f32.mxu0 %v3910_v17 }
 0x5a6   :  { %3159 = vmatprep.subr.bf16.mxu0 %v3996_v18 }
 0x5a9   :  { %3161 = vmatpush1.bf16.msra.mxu0 %v4006_v21 }
 0x5aa   :  { %3163 = vmatprep.subr.bf16.mxu0 %v4010_v22 }
 0x5ad   :  { %3165 = vmatpush1.bf16.msra.mxu0 %v4026_v27 }
 0x5ae   :  { %3167 = vmatprep.subr.bf16.mxu0 %v4030_v28 }
 0x5b1   :  { %3169 = vmatpush1.bf16.msra.mxu0 %v4040_v31 }
 0x5b2   :  { %3171 = vmatprep.subr.bf16.mxu0 %v4063_v48 }
 0x614   :  { %v611_v11 = vpop.f32.mrb[4].mxu1 }
 0x615   :  { %v613_v12 = vpop.f32.mrb[5].mxu1  ;;  %v2954_v20 = vmul.f32 -1.442695, %v611_v11 }
 0x616   :  { %3630 = vtanh.f32 %v613_v12  ;;  %v2955_v60 = vmul.f32 -1.442695, %v613_v12 }
 0x620   :  { %v3631_v14 = vpop.eup %3630 }
 0x621   :  { %631 = vrot.lane.b32.xlu0 %v3631_v14, %s3911_s1 }
 0x677   :  { %v496_v15 = vpop.f32.mrb[2].mxu0 }
 0x678   :  { %v4205_v23 = vpop.f32.mrb[3].mxu0  ;;  %v2950_v39 = vmul.f32 -1.442695, %v496_v15 }
 0x679   :  { %3632 = vtanh.f32 %v4205_v23  ;;  %v2951_v7 = vmul.f32 -1.442695, %v4205_v23 }
 0x67a   :  { %3634 = vpow2.f32 %v2954_v20 }
 0x683   :  { %v3633_v24 = vpop.eup %3632 }
 0x684   :  { %516 = vrot.lane.b32.xlu1 %v3633_v24, %s3911_s1  ;;  %v3635_v25 = vpop.eup %3634 }
 0x685   :  { %v622_v30 = vadd.f32 1.0, %v3635_v25 }
 0x687   :  { %3636 = vrcp.f32 %v622_v30 }
 0x688   :  { %3638 = vpow2.f32 %v2950_v39 }
 0x691   :  { %v3637_v32 = vpop.eup %3636 }
 0x692   :  { %v3639_v40 = vpop.eup %3638  ;;  %v629_v49 = vmul.f32 %v3637_v32, %v4160_v41 }
 0x693   :  { %v632_v34 = vpop.permute.xlu0 %631  ;;  %v507_v45 = vadd.f32 1.0, %v3639_v40 }
 0x694   :  { %v634_v35 = vmul.f32 %v3637_v32, %v632_v34 }
 0x695   :  { %3640 = vrcp.f32 %v507_v45 }
 0x696   :  { %636 = vrot.lane.b32.xlu0 %v634_v35, %s3911_s1 }
 0x69f   :  { %v3641_v42 = vpop.eup %3640 }
 0x6a0   :  { %v514_v55 = vmul.f32 %v3641_v42, %v4156_v37 }
 0x6f6   :  { %v517_v46 = vpop.permute.xlu1 %516 }
 0x6f7   :  { %v519_v47 = vmul.f32 %v3641_v42, %v517_v46 }
 0x6f9   :  { %521 = vrot.lane.b32.xlu1 %v519_v47, %s3911_s1 }
 0x708   :  { %v637_v44 = vpop.permute.xlu0 %636 }
 0x709   :  { %v4212_v50 = vadd.f32 %v637_v44, %v629_v49 }
 0x70b   :  { %3642 = vtanh.f32 %v4212_v50 }
 0x715   :  { %v3643_v51 = vpop.eup %3642 }
 0x716   :  { %642 = vrot.lane.b32.xlu0 %v3643_v51, %s3911_s1 }
 0x71a   :  { %759 = vperm.xlu0 %3592, %v2958_v54  }
 0x76b   :  { %v522_v56 = vpop.permute.xlu1 %521 }
 0x76c   :  { %v4220_v57 = vadd.f32 %v522_v56, %v514_v55 }
 0x76e   :  { %3644 = vtanh.f32 %v4220_v57 }
 0x76f   :  { %3646 = vpow2.f32 %v2955_v60 }
 0x778   :  { %v3645_v41 = vpop.eup %3644 }
 0x779   :  { %527 = vrot.lane.b32.xlu1 %v3645_v41, %s3911_s1  ;;  %v3647_v36 = vpop.eup %3646  ;;  %v2964_v41 = vld [vmem:[%s4763_s0 + $0x20] sm:$0xff] }
 0x77a   :  { %v623_v61 = vadd.f32 1.0, %v3647_v36 }
 0x77c   :  { %3648 = vrcp.f32 %v623_v61 }
 0x77d   :  { %3650 = vpow2.f32 %v2951_v7 }
 0x786   :  { %v3649_v2 = vpop.eup %3648 }
 0x787   :  { %v3651_v11 = vpop.eup %3650 }
 0x788   :  { %v643_v62 = vpop.permute.xlu0 %642  ;;  %v508_v12 = vadd.f32 1.0, %v3651_v11 }
 0x789   :  { %v645_v63 = vmul.f32 %v3649_v2, %v643_v62 }
 0x78a   :  { %3652 = vrcp.f32 %v508_v12 }
 0x794   :  { %v3653_v14 = vpop.eup %3652 }
 0x799   :  { %v760_v4 = vpop.permute.xlu0 %759 }
 0x79a   :  { %v762_v37 = vsel %vm88_vm0, %v760_v4, %v645_v63 }
 0x79b   :  { %v763_v6 = vsel %vm89_vm1, 1.0, %v762_v37 }
 0x79c   :  { %2959 = vmatmul.mubr.msk.f32.vlgmr.msra.gmra.mrb[4].mxu0 %vm102_vm2, %v763_v6 }
 0x79d   :  { %3173 = vmatpush1.bf16.msra.mxu0 %v4065_v52  ;;  %938 = vmatprep.mubr.f32.mxu0 %v3910_v17 }
 0x79e   :  { %3175 = vmatprep.subr.bf16.mxu0 %v4067_v53 }
 0x7a1   :  { %3177 = vmatpush1.bf16.msra.mxu0 %v4072_v58 }
 0x7a2   :  { %3179 = vmatprep.subr.bf16.mxu0 %v4075_v59 }
 0x7a5   :  { %3181 = vmatpush1.bf16.msra.mxu0 %v4078_v0 }
 0x7a6   :  { %3183 = vmatprep.subr.bf16.mxu0 %v4081_v1 }
 0x7a9   :  { %3185 = vmatpush1.bf16.msra.mxu0 %v4084_v8 }
 0x7aa   :  { %3187 = vmatprep.subr.bf16.mxu0 %v4087_v10 }
 0x7ad   :  { %3189 = vmatpush1.bf16.msra.mxu0 %v4090_v16 }
 0x7ae   :  { %3191 = vmatprep.subr.bf16.mxu0 %v4093_v19 }
 0x7b1   :  { %3193 = vmatpush1.bf16.msra.mxu0 %v4096_v26 }
 0x7b2   :  { %3195 = vmatprep.subr.bf16.mxu0 %v4099_v29 }
 0x7b5   :  { %3197 = vmatpush1.bf16.msra.mxu0 %v4102_v33 }
 0x7b6   :  { %3199 = vmatprep.subr.bf16.mxu0 %v4106_v38 }
 0x7b9   :  { %3201 = vmatpush1.bf16.msra.mxu0 %v4108_v43 }
 0x7ba   :  { %3251 = vmatprep.subr.bf16.mxu0 %v3971_v9 }
 0x7eb   :  { %v528_v15 = vpop.permute.xlu1 %527 }
 0x7ec   :  { %v530_v20 = vmul.f32 %v3653_v14, %v528_v15 }
 0x7ee   :  { %532 = vst.msk [vmem:[#allocation2 + $0x8] sm:$0xff] %vm102_vm2, %v530_v20  ;;  %647 = vrot.lane.b32.xlu1 %v530_v20, %s3911_s1 }
 0x860   :  { %v648_v24 = vpop.permute.xlu1 %647 }
 0x861   :  { %v650_v25 = vsel %vm102_vm2, %v645_v63, %v648_v24 }
 0x862   :  { %v651_v30 = vsel %vm88_vm0, 1.0, %v650_v25 }
 0x863   :  { %717 = vmatmul.mubr.f32.vlgmr.msra.gmra.mrb[6].mxu1 %v651_v30 }
 0x864   :  { %3205 = vmatpush1.bf16.msra.mxu1 %v3982_v13  ;;  %1053 = vmatprep.mubr.f32.mxu1 %v3910_v17 }
 0x865   :  { %3207 = vmatprep.subr.bf16.mxu1 %v3996_v18 }
 0x868   :  { %3209 = vmatpush1.bf16.msra.mxu1 %v4006_v21 }
 0x869   :  { %3211 = vmatprep.subr.bf16.mxu1 %v4010_v22 }
 0x86c   :  { %3213 = vmatpush1.bf16.msra.mxu1 %v4026_v27 }
 0x86d   :  { %3215 = vmatprep.subr.bf16.mxu1 %v4030_v28 }
 0x86f   :  { %v833_v23 = vpop.f32.mrb[4].mxu0 }
 0x870   :  { %3217 = vmatpush1.bf16.msra.mxu1 %v4040_v31  ;;  %v835_v32 = vpop.f32.mrb[5].mxu0  ;;  %v2960_v35 = vmul.f32 -1.442695, %v833_v23 }
 0x871   :  { %3219 = vmatprep.subr.bf16.mxu1 %v4063_v48  ;;  %3654 = vtanh.f32 %v835_v32  ;;  %v2961_v63 = vmul.f32 -1.442695, %v835_v32 }
 0x872   :  { %3656 = vpow2.f32 %v2960_v35 }
 0x87b   :  { %v3655_v34 = vpop.eup %3654 }
 0x87c   :  { %853 = vrot.lane.b32.xlu0 %v3655_v34, %s3911_s1  ;;  %v3657_v39 = vpop.eup %3656 }
 0x87d   :  { %v844_v40 = vadd.f32 1.0, %v3657_v39 }
 0x87f   :  { %3658 = vrcp.f32 %v844_v40 }
 0x889   :  { %v3659_v45 = vpop.eup %3658 }
 0x88a   :  { %v851_v51 = vmul.f32 %v3659_v45, %v4212_v50 }
 0x8ee   :  { %v854_v42 = vpop.permute.xlu0 %853 }
 0x8ef   :  { %v856_v46 = vmul.f32 %v3659_v45, %v854_v42 }
 0x8f1   :  { %858 = vrot.lane.b32.xlu0 %v856_v46, %s3911_s1 }
 0x936   :  { %v718_v47 = vpop.f32.mrb[6].mxu1 }
 0x937   :  { %v720_v49 = vpop.f32.mrb[7].mxu1  ;;  %v2956_v60 = vmul.f32 -1.442695, %v718_v47 }
 0x938   :  { %3660 = vtanh.f32 %v720_v49  ;;  %v2957_v23 = vmul.f32 -1.442695, %v720_v49 }
 0x942   :  { %v3661_v44 = vpop.eup %3660 }
 0x943   :  { %738 = vrot.lane.b32.xlu1 %v3661_v44, %s3911_s1 }
 0x963   :  { %v859_v54 = vpop.permute.xlu0 %858 }
 0x964   :  { %v4265_v55 = vadd.f32 %v859_v54, %v851_v51 }
 0x966   :  { %3662 = vtanh.f32 %v4265_v55 }
 0x967   :  { %3664 = vpow2.f32 %v2956_v60 }
 0x970   :  { %v3663_v56 = vpop.eup %3662 }
 0x971   :  { %864 = vrot.lane.b32.xlu0 %v3663_v56, %s3911_s1  ;;  %v3665_v36 = vpop.eup %3664 }
 0x972   :  { %v729_v61 = vadd.f32 1.0, %v3665_v36 }
 0x974   :  { %3666 = vrcp.f32 %v729_v61 }
 0x975   :  { %981 = vperm.xlu0 %3592, %v2964_v41   ;;  %3668 = vpow2.f32 %v2961_v63 }
 0x97e   :  { %v3667_v62 = vpop.eup %3666 }
 0x97f   :  { %v3669_v4 = vpop.eup %3668  ;;  %v736_v20 = vmul.f32 %v3667_v62, %v4220_v57 }
 0x980   :  { %v845_v37 = vadd.f32 1.0, %v3669_v4 }
 0x982   :  { %3670 = vrcp.f32 %v845_v37 }
 0x98c   :  { %v3671_v7 = vpop.eup %3670 }
 0x9b5   :  { %v739_v50 = vpop.permute.xlu1 %738 }
 0x9b6   :  { %v741_v2 = vmul.f32 %v3667_v62, %v739_v50 }
 0x9b8   :  { %743 = vrot.lane.b32.xlu1 %v741_v2, %s3911_s1  ;;  %v2970_v2 = vld [vmem:[%s4763_s0 + $0x28] sm:$0xff] }
 0x9e3   :  { %v865_v6 = vpop.permute.xlu0 %864 }
 0x9e4   :  { %v867_v11 = vmul.f32 %v3671_v7, %v865_v6 }
 0x9f4   :  { %v982_v12 = vpop.permute.xlu0 %981 }
 0x9f5   :  { %v984_v14 = vsel %vm88_vm0, %v982_v12, %v867_v11 }
 0x9f6   :  { %v985_v15 = vsel %vm89_vm1, 1.0, %v984_v14 }
 0x9f7   :  { %2965 = vmatmul.mubr.msk.f32.vlgmr.msra.gmra.mrb[8].mxu1 %vm102_vm2, %v985_v15 }
 0x9f8   :  { %3221 = vmatpush1.bf16.msra.mxu1 %v4065_v52  ;;  %1160 = vmatprep.mubr.f32.mxu1 %v3910_v17 }
 0x9f9   :  { %3223 = vmatprep.subr.bf16.mxu1 %v4067_v53 }
 0x9fc   :  { %3225 = vmatpush1.bf16.msra.mxu1 %v4072_v58 }
 0x9fd   :  { %3227 = vmatprep.subr.bf16.mxu1 %v4075_v59 }
 0xa00   :  { %3229 = vmatpush1.bf16.msra.mxu1 %v4078_v0 }
 0xa01   :  { %3231 = vmatprep.subr.bf16.mxu1 %v4081_v1 }
 0xa04   :  { %3233 = vmatpush1.bf16.msra.mxu1 %v4084_v8 }
 0xa05   :  { %3235 = vmatprep.subr.bf16.mxu1 %v4087_v10 }
 0xa08   :  { %3237 = vmatpush1.bf16.msra.mxu1 %v4090_v16 }
 0xa09   :  { %3239 = vmatprep.subr.bf16.mxu1 %v4093_v19 }
 0xa0c   :  { %3241 = vmatpush1.bf16.msra.mxu1 %v4096_v26 }
 0xa0d   :  { %3243 = vmatprep.subr.bf16.mxu1 %v4099_v29 }
 0xa10   :  { %3245 = vmatpush1.bf16.msra.mxu1 %v4102_v33 }
 0xa11   :  { %3247 = vmatprep.subr.bf16.mxu1 %v4106_v38 }
 0xa14   :  { %3249 = vmatpush1.bf16.msra.mxu1 %v4108_v43 }
 0xa15   :  { %3299 = vmatprep.subr.bf16.mxu1 %v3971_v9 }
 0xa2a   :  { %v744_v24 = vpop.permute.xlu1 %743 }
 0xa2b   :  { %v4296_v25 = vadd.f32 %v744_v24, %v736_v20 }
 0xa2d   :  { %3672 = vtanh.f32 %v4296_v25 }
 0xa2e   :  { %3674 = vpow2.f32 %v2957_v23 }
 0xa37   :  { %v3673_v30 = vpop.eup %3672 }
 0xa38   :  { %749 = vrot.lane.b32.xlu1 %v3673_v30, %s3911_s1  ;;  %v3675_v32 = vpop.eup %3674 }
 0xa39   :  { %v730_v34 = vadd.f32 1.0, %v3675_v32 }
 0xa3b   :  { %3676 = vrcp.f32 %v730_v34 }
 0xa45   :  { %v3677_v35 = vpop.eup %3676 }
 0xaaa   :  { %v750_v39 = vpop.permute.xlu1 %749 }
 0xaab   :  { %v752_v40 = vmul.f32 %v3677_v35, %v750_v39 }
 0xaad   :  { %754 = vst.msk [vmem:[#allocation2 + $0x10] sm:$0xff] %vm102_vm2, %v752_v40  ;;  %869 = vrot.lane.b32.xlu1 %v752_v40, %s3911_s1 }
 0xaca   :  { %v1055_v57 = vpop.f32.mrb[8].mxu1 }
 0xacb   :  { %v1057_v45 = vpop.f32.mrb[9].mxu1  ;;  %v2966_v44 = vmul.f32 -1.442695, %v1055_v57 }
 0xacc   :  { %3678 = vtanh.f32 %v1057_v45 }
 0xacd   :  { %3680 = vpow2.f32 %v2966_v44 }
 0xad6   :  { %v3679_v42 = vpop.eup %3678 }
 0xad7   :  { %1075 = vrot.lane.b32.xlu0 %v3679_v42, %s3911_s1  ;;  %v3681_v51 = vpop.eup %3680 }
 0xad8   :  { %v1066_v54 = vadd.f32 1.0, %v3681_v51 }
 0xada   :  { %3682 = vrcp.f32 %v1066_v54 }
 0xae4   :  { %v3683_v56 = vpop.eup %3682 }
 0xae5   :  { %v1073_v36 = vmul.f32 %v3683_v56, %v4265_v55  ;;  %v2967_v55 = vmul.f32 -1.442695, %v1057_v45 }
 0xb1f   :  { %v870_v46 = vpop.permute.xlu1 %869 }
 0xb20   :  { %v872_v47 = vsel %vm102_vm2, %v867_v11, %v870_v46 }
 0xb21   :  { %v873_v49 = vsel %vm88_vm0, 1.0, %v872_v47 }
 0xb22   :  { %939 = vmatmul.mubr.f32.vlgmr.msra.gmra.mrb[6].mxu0 %v873_v49 }
 0xb23   :  { %3253 = vmatpush1.bf16.msra.mxu0 %v3982_v13  ;;  %1275 = vmatprep.mubr.f32.mxu0 %v3910_v17 }
 0xb24   :  { %3255 = vmatprep.subr.bf16.mxu0 %v3996_v18 }
 0xb27   :  { %3257 = vmatpush1.bf16.msra.mxu0 %v4006_v21 }
 0xb28   :  { %3259 = vmatprep.subr.bf16.mxu0 %v4010_v22 }
 0xb2b   :  { %3261 = vmatpush1.bf16.msra.mxu0 %v4026_v27 }
 0xb2c   :  { %3263 = vmatprep.subr.bf16.mxu0 %v4030_v28 }
 0xb2f   :  { %3265 = vmatpush1.bf16.msra.mxu0 %v4040_v31 }
 0xb30   :  { %3267 = vmatprep.subr.bf16.mxu0 %v4063_v48 }
 0xb49   :  { %v1076_v41 = vpop.permute.xlu0 %1075 }
 0xb4a   :  { %v1078_v60 = vmul.f32 %v3683_v56, %v1076_v41 }
 0xb4c   :  { %1080 = vrot.lane.b32.xlu0 %v1078_v60, %s3911_s1 }
 0xbbe   :  { %v1081_v61 = vpop.permute.xlu0 %1080 }
 0xbbf   :  { %v4317_v62 = vadd.f32 %v1081_v61, %v1073_v36 }
 0xbc1   :  { %3684 = vtanh.f32 %v4317_v62 }
 0xbcb   :  { %v3685_v50 = vpop.eup %3684 }
 0xbcc   :  { %1086 = vrot.lane.b32.xlu0 %v3685_v50, %s3911_s1 }
 0xbd0   :  { %1203 = vperm.xlu0 %3592, %v2970_v2  }
 0xbf5   :  { %v940_v63 = vpop.f32.mrb[6].mxu0 }
 0xbf6   :  { %v942_v4 = vpop.f32.mrb[7].mxu0  ;;  %v2962_v24 = vmul.f32 -1.442695, %v940_v63 }
 0xbf7   :  { %3686 = vtanh.f32 %v942_v4  ;;  %v2963_v44 = vmul.f32 -1.442695, %v942_v4 }
 0xbf8   :  { %3688 = vpow2.f32 %v2967_v55 }
 0xc01   :  { %v3687_v37 = vpop.eup %3686 }
 0xc02   :  { %960 = vrot.lane.b32.xlu1 %v3687_v37, %s3911_s1  ;;  %v3689_v6 = vpop.eup %3688 }
 0xc03   :  { %v1067_v7 = vadd.f32 1.0, %v3689_v6 }
 0xc05   :  { %3690 = vrcp.f32 %v1067_v7 }
 0xc06   :  { %3692 = vpow2.f32 %v2962_v24 }
 0xc0f   :  { %v3691_v12 = vpop.eup %3690 }
 0xc10   :  { %v3693_v23 = vpop.eup %3692 }
 0xc11   :  { %v951_v32 = vadd.f32 1.0, %v3693_v23 }
 0xc13   :  { %3694 = vrcp.f32 %v951_v32 }
 0xc1d   :  { %v3695_v34 = vpop.eup %3694 }
 0xc1e   :  { %v958_v40 = vmul.f32 %v3695_v34, %v4296_v25 }
 0xc3e   :  { %v1087_v11 = vpop.permute.xlu0 %1086 }
 0xc3f   :  { %v4325_v14 = vmul.f32 %v3691_v12, %v1087_v11 }
 0xc4f   :  { %v1204_v15 = vpop.permute.xlu0 %1203 }
 0xc50   :  { %v1206_v20 = vsel %vm88_vm0, %v1204_v15, %v4325_v14 }
 0xc51   :  { %v1207_v30 = vsel %vm89_vm1, 1.0, %v1206_v20 }
 0xc52   :  { %2971 = vmatmul.mubr.msk.f32.vlgmr.msra.gmra.mrb[8].mxu0 %vm102_vm2, %v1207_v30 }
 0xc53   :  { %3269 = vmatpush1.bf16.msra.mxu0 %v4065_v52  ;;  %1382 = vmatprep.mubr.f32.mxu0 %v3910_v17 }
 0xc54   :  { %3271 = vmatprep.subr.bf16.mxu0 %v4067_v53 }
 0xc57   :  { %3273 = vmatpush1.bf16.msra.mxu0 %v4072_v58 }
 0xc58   :  { %3275 = vmatprep.subr.bf16.mxu0 %v4075_v59 }
 0xc5b   :  { %3277 = vmatpush1.bf16.msra.mxu0 %v4078_v0 }
 0xc5c   :  { %3279 = vmatprep.subr.bf16.mxu0 %v4081_v1 }
 0xc5f   :  { %3281 = vmatpush1.bf16.msra.mxu0 %v4084_v8 }
 0xc60   :  { %3283 = vmatprep.subr.bf16.mxu0 %v4087_v10 }
 0xc63   :  { %3285 = vmatpush1.bf16.msra.mxu0 %v4090_v16 }
 0xc64   :  { %3287 = vmatprep.subr.bf16.mxu0 %v4093_v19 }
 0xc67   :  { %3289 = vmatpush1.bf16.msra.mxu0 %v4096_v26 }
 0xc68   :  { %3291 = vmatprep.subr.bf16.mxu0 %v4099_v29 }
 0xc6b   :  { %3293 = vmatpush1.bf16.msra.mxu0 %v4102_v33 }
 0xc6c   :  { %3295 = vmatprep.subr.bf16.mxu0 %v4106_v38 }
 0xc6f   :  { %3297 = vmatpush1.bf16.msra.mxu0 %v4108_v43 }
 0xc70   :  { %3347 = vmatprep.subr.bf16.mxu0 %v3971_v9 }
 0xc74   :  { %v961_v35 = vpop.permute.xlu1 %960 }
 0xc75   :  { %v963_v39 = vmul.f32 %v3695_v34, %v961_v35 }
 0xc77   :  { %965 = vrot.lane.b32.xlu1 %v963_v39, %s3911_s1 }
 0xce9   :  { %v966_v57 = vpop.permute.xlu1 %965 }
 0xcea   :  { %v4352_v45 = vadd.f32 %v966_v57, %v958_v40 }
 0xcec   :  { %3696 = vtanh.f32 %v4352_v45 }
 0xcf6   :  { %v3697_v42 = vpop.eup %3696 }
 0xcf7   :  { %971 = vrot.lane.b32.xlu1 %v3697_v42, %s3911_s1 }
 0xd25   :  { %v1277_v46 = vpop.f32.mrb[8].mxu0 }
 0xd26   :  { %v1279_v47 = vpop.f32.mrb[9].mxu0  ;;  %v2972_v60 = vmul.f32 -1.442695, %v1277_v46 }
 0xd27   :  { %3698 = vtanh.f32 %v1279_v47  ;;  %v2973_v15 = vmul.f32 -1.442695, %v1279_v47 }
 0xd28   :  { %3700 = vpow2.f32 %v2963_v44 }
 0xd31   :  { %v3699_v49 = vpop.eup %3698 }
 0xd32   :  { %1297 = vrot.lane.b32.xlu0 %v3699_v49, %s3911_s1  ;;  %v3701_v51 = vpop.eup %3700 }
 0xd33   :  { %v952_v54 = vadd.f32 1.0, %v3701_v51 }
 0xd35   :  { %3702 = vrcp.f32 %v952_v54 }
 0xd36   :  { %3704 = vpow2.f32 %v2972_v60 }
 0xd3f   :  { %v3703_v25 = vpop.eup %3702 }
 0xd40   :  { %v3705_v36 = vpop.eup %3704 }
 0xd41   :  { %v1288_v61 = vadd.f32 1.0, %v3705_v36 }
 0xd43   :  { %3706 = vrcp.f32 %v1288_v61 }
 0xd4d   :  { %v3707_v50 = vpop.eup %3706 }
 0xd4e   :  { %v1295_v6 = vmul.f32 %v3707_v50, %v4317_v62 }
 0xd69   :  { %v972_v56 = vpop.permute.xlu1 %971 }
 0xd6a   :  { %v974_v41 = vmul.f32 %v3703_v25, %v972_v56 }
 0xd6c   :  { %976 = vst.msk [vmem:[#allocation2 + $0x18] sm:$0xff] %vm102_vm2, %v974_v41  ;;  %1091 = vrot.lane.b32.xlu1 %v974_v41, %s3911_s1 }
 0xda4   :  { %v1298_v2 = vpop.permute.xlu0 %1297 }
 0xda5   :  { %v1300_v63 = vmul.f32 %v3707_v50, %v1298_v2 }
 0xda7   :  { %1302 = vrot.lane.b32.xlu0 %v1300_v63, %s3911_s1 }
 0xdde   :  { %v1092_v4 = vpop.permute.xlu1 %1091 }
 0xddf   :  { %v1094_v37 = vsel %vm102_vm2, %v4325_v14, %v1092_v4  ;;  %v2976_v14 = vld [vmem:[%s4763_s0 + $0x30] sm:$0xff] }
 0xde0   :  { %v1095_v55 = vsel %vm88_vm0, 1.0, %v1094_v37 }
 0xde1   :  { %1161 = vmatmul.mubr.f32.vlgmr.msra.gmra.mrb[10].mxu1 %v1095_v55 }
 0xde2   :  { %3301 = vmatpush1.bf16.msra.mxu1 %v3982_v13  ;;  %1497 = vmatprep.mubr.f32.mxu1 %v3910_v17 }
 0xde3   :  { %3303 = vmatprep.subr.bf16.mxu1 %v3996_v18 }
 0xde6   :  { %3305 = vmatpush1.bf16.msra.mxu1 %v4006_v21 }
 0xde7   :  { %3307 = vmatprep.subr.bf16.mxu1 %v4010_v22 }
 0xdea   :  { %3309 = vmatpush1.bf16.msra.mxu1 %v4026_v27 }
 0xdeb   :  { %3311 = vmatprep.subr.bf16.mxu1 %v4030_v28 }
 0xdee   :  { %3313 = vmatpush1.bf16.msra.mxu1 %v4040_v31 }
 0xdef   :  { %3315 = vmatprep.subr.bf16.mxu1 %v4063_v48 }
 0xe19   :  { %v1303_v7 = vpop.permute.xlu0 %1302 }
 0xe1a   :  { %v4374_v11 = vadd.f32 %v1303_v7, %v1295_v6 }
 0xe1c   :  { %3708 = vtanh.f32 %v4374_v11 }
 0xe1d   :  { %3710 = vpow2.f32 %v2973_v15 }
 0xe26   :  { %v3709_v12 = vpop.eup %3708 }
 0xe27   :  { %1308 = vrot.lane.b32.xlu0 %v3709_v12, %s3911_s1  ;;  %v3711_v20 = vpop.eup %3710 }
 0xe28   :  { %v1289_v24 = vadd.f32 1.0, %v3711_v20 }
 0xe2a   :  { %3712 = vrcp.f32 %v1289_v24 }
 0xe2b   :  { %1425 = vperm.xlu0 %3592, %v2976_v14  }
 0xe34   :  { %v3713_v62 = vpop.eup %3712 }
 0xe99   :  { %v1309_v30 = vpop.permute.xlu0 %1308 }
 0xe9a   :  { %v4381_v23 = vmul.f32 %v3713_v62, %v1309_v30 }
 0xeaa   :  { %v1426_v32 = vpop.permute.xlu0 %1425 }
 0xeab   :  { %v1428_v34 = vsel %vm88_vm0, %v1426_v32, %v4381_v23  ;;  %v2982_v32 = vld [vmem:[%s4763_s0 + $0x38] sm:$0xff] }
 0xeac   :  { %v1429_v35 = vsel %vm89_vm1, 1.0, %v1428_v34 }
 0xead   :  { %2977 = vmatmul.mubr.msk.f32.vlgmr.msra.gmra.mrb[12].mxu1 %vm102_vm2, %v1429_v35 }
 0xeae   :  { %3317 = vmatpush1.bf16.msra.mxu1 %v4065_v52  ;;  %1604 = vmatprep.mubr.f32.mxu1 %v3910_v17 }
 0xeaf   :  { %3319 = vmatprep.subr.bf16.mxu1 %v4067_v53 }
 0xeb2   :  { %3321 = vmatpush1.bf16.msra.mxu1 %v4072_v58 }
 0xeb3   :  { %3323 = vmatprep.subr.bf16.mxu1 %v4075_v59 }
 0xeb4   :  { %v1162_v39 = vpop.f32.mrb[10].mxu1 }
 0xeb5   :  { %v1164_v40 = vpop.f32.mrb[11].mxu1  ;;  %v2968_v42 = vmul.f32 -1.442695, %v1162_v39 }
 0xeb6   :  { %3714 = vtanh.f32 %v1164_v40  ;;  %3325 = vmatpush1.bf16.msra.mxu1 %v4078_v0  ;;  %v2969_v6 = vmul.f32 -1.442695, %v1164_v40 }
 0xeb7   :  { %3327 = vmatprep.subr.bf16.mxu1 %v4081_v1  ;;  %3716 = vpow2.f32 %v2968_v42 }
 0xeba   :  { %3329 = vmatpush1.bf16.msra.mxu1 %v4084_v8 }
 0xebb   :  { %3331 = vmatprep.subr.bf16.mxu1 %v4087_v10 }
 0xebe   :  { %3333 = vmatpush1.bf16.msra.mxu1 %v4090_v16 }
 0xebf   :  { %3335 = vmatprep.subr.bf16.mxu1 %v4093_v19 }
 0xec0   :  { %v3715_v57 = vpop.eup %3714 }
 0xec1   :  { %1182 = vrot.lane.b32.xlu1 %v3715_v57, %s3911_s1  ;;  %v3717_v46 = vpop.eup %3716 }
 0xec2   :  { %3337 = vmatpush1.bf16.msra.mxu1 %v4096_v26  ;;  %v1173_v47 = vadd.f32 1.0, %v3717_v46 }
 0xec3   :  { %3339 = vmatprep.subr.bf16.mxu1 %v4099_v29 }
 0xec4   :  { %3718 = vrcp.f32 %v1173_v47 }
 0xec6   :  { %3341 = vmatpush1.bf16.msra.mxu1 %v4102_v33 }
 0xec7   :  { %3343 = vmatprep.subr.bf16.mxu1 %v4106_v38 }
 0xeca   :  { %3345 = vmatpush1.bf16.msra.mxu1 %v4108_v43 }
 0xecb   :  { %3395 = vmatprep.subr.bf16.mxu1 %v3971_v9 }
 0xece   :  { %v3719_v49 = vpop.eup %3718 }
 0xecf   :  { %v1180_v41 = vmul.f32 %v3719_v49, %v4352_v45 }
 0xf33   :  { %v1183_v44 = vpop.permute.xlu1 %1182 }
 0xf34   :  { %v1185_v51 = vmul.f32 %v3719_v49, %v1183_v44 }
 0xf36   :  { %1187 = vrot.lane.b32.xlu1 %v1185_v51, %s3911_s1 }
 0xf80   :  { %v1499_v54 = vpop.f32.mrb[12].mxu1 }
 0xf81   :  { %v1501_v25 = vpop.f32.mrb[13].mxu1  ;;  %v2978_v50 = vmul.f32 -1.442695, %v1499_v54 }
 0xf82   :  { %3720 = vtanh.f32 %v1501_v25 }
 0xf8c   :  { %v3721_v56 = vpop.eup %3720 }
 0xf8d   :  { %1519 = vrot.lane.b32.xlu0 %v3721_v56, %s3911_s1 }
 0xfa8   :  { %v1188_v60 = vpop.permute.xlu1 %1187 }
 0xfa9   :  { %v4410_v36 = vadd.f32 %v1188_v60, %v1180_v41 }
 0xfab   :  { %3722 = vtanh.f32 %v4410_v36 }
 0xfac   :  { %3724 = vpow2.f32 %v2978_v50 }
 0xfb5   :  { %v3723_v61 = vpop.eup %3722 }
 0xfb6   :  { %1193 = vrot.lane.b32.xlu1 %v3723_v61, %s3911_s1  ;;  %v3725_v2 = vpop.eup %3724 }
 0xfb7   :  { %v1510_v63 = vadd.f32 1.0, %v3725_v2 }
 0xfb9   :  { %3726 = vrcp.f32 %v1510_v63 }
 0xfba   :  { %3728 = vpow2.f32 %v2969_v6 }
 0xfc3   :  { %v3727_v4 = vpop.eup %3726 }
 0xfc4   :  { %v3729_v45 = vpop.eup %3728  ;;  %v1517_v20 = vmul.f32 %v3727_v4, %v4374_v11 }
 0xfc5   :  { %v1174_v7 = vadd.f32 1.0, %v3729_v45 }
 0xfc7   :  { %3730 = vrcp.f32 %v1174_v7 }
 0xfd1   :  { %v3731_v12 = vpop.eup %3730 }
 0xfff   :  { %v1520_v37 = vpop.permute.xlu0 %1519 }
0x1000   :  { %v1522_v55 = vmul.f32 %v3727_v4, %v1520_v37 }
0x1002   :  { %1524 = vrot.lane.b32.xlu0 %v1522_v55, %s3911_s1 }
0x1028   :  { %v1194_v14 = vpop.permute.xlu1 %1193 }
0x1029   :  { %v1196_v15 = vmul.f32 %v3731_v12, %v1194_v14 }
0x102b   :  { %1198 = vst.msk [vmem:[#allocation2 + $0x20] sm:$0xff] %vm102_vm2, %v1196_v15  ;;  %1313 = vrot.lane.b32.xlu1 %v1196_v15, %s3911_s1 }
0x1074   :  { %v1525_v24 = vpop.permute.xlu0 %1524 }
0x1075   :  { %v4418_v30 = vadd.f32 %v1525_v24, %v1517_v20 }
0x1077   :  { %3732 = vtanh.f32 %v4418_v30 }
0x1081   :  { %v3733_v62 = vpop.eup %3732 }
0x1082   :  { %1530 = vrot.lane.b32.xlu0 %v3733_v62, %s3911_s1 }
0x1086   :  { %1647 = vperm.xlu0 %3592, %v2982_v32  }
0x109d   :  { %v1314_v34 = vpop.permute.xlu1 %1313 }
0x109e   :  { %v1316_v35 = vsel %vm102_vm2, %v4381_v23, %v1314_v34  ;;  %v2979_v23 = vmul.f32 -1.442695, %v1501_v25 }
0x109f   :  { %v1317_v11 = vsel %vm88_vm0, 1.0, %v1316_v35 }
0x10a0   :  { %1383 = vmatmul.mubr.f32.vlgmr.msra.gmra.mrb[10].mxu0 %v1317_v11  ;;  %3734 = vpow2.f32 %v2979_v23 }
0x10a1   :  { %3349 = vmatpush1.bf16.msra.mxu0 %v3982_v13  ;;  %1719 = vmatprep.mubr.f32.mxu0 %v3910_v17 }
0x10a2   :  { %3351 = vmatprep.subr.bf16.mxu0 %v3996_v18 }
0x10a5   :  { %3353 = vmatpush1.bf16.msra.mxu0 %v4006_v21 }
0x10a6   :  { %3355 = vmatprep.subr.bf16.mxu0 %v4010_v22 }
0x10a9   :  { %3357 = vmatpush1.bf16.msra.mxu0 %v4026_v27 }
0x10aa   :  { %3359 = vmatprep.subr.bf16.mxu0 %v4030_v28  ;;  %v3735_v39 = vpop.eup %3734 }
0x10ab   :  { %v1511_v40 = vadd.f32 1.0, %v3735_v39 }
0x10ad   :  { %3361 = vmatpush1.bf16.msra.mxu0 %v4040_v31  ;;  %3736 = vrcp.f32 %v1511_v40 }
0x10ae   :  { %3363 = vmatprep.subr.bf16.mxu0 %v4063_v48 }
0x10b7   :  { %v3737_v42 = vpop.eup %3736 }
0x10f4   :  { %v1531_v57 = vpop.permute.xlu0 %1530 }
0x10f5   :  { %v4438_v46 = vmul.f32 %v3737_v42, %v1531_v57 }
0x1105   :  { %v1648_v47 = vpop.permute.xlu0 %1647 }
0x1106   :  { %v1650_v49 = vsel %vm88_vm0, %v1648_v47, %v4438_v46 }
0x1107   :  { %v1651_v44 = vsel %vm89_vm1, 1.0, %v1650_v49 }
0x1108   :  { %2983 = vmatmul.mubr.msk.f32.vlgmr.msra.gmra.mrb[12].mxu0 %vm102_vm2, %v1651_v44 }
0x1109   :  { %3365 = vmatpush1.bf16.msra.mxu0 %v4065_v52  ;;  %1826 = vmatprep.mubr.f32.mxu0 %v3910_v17 }
0x110a   :  { %3367 = vmatprep.subr.bf16.mxu0 %v4067_v53 }
0x110d   :  { %3369 = vmatpush1.bf16.msra.mxu0 %v4072_v58 }
0x110e   :  { %3371 = vmatprep.subr.bf16.mxu0 %v4075_v59 }
0x1111   :  { %3373 = vmatpush1.bf16.msra.mxu0 %v4078_v0 }
0x1112   :  { %3375 = vmatprep.subr.bf16.mxu0 %v4081_v1 }
0x1115   :  { %3377 = vmatpush1.bf16.msra.mxu0 %v4084_v8 }
0x1116   :  { %3379 = vmatprep.subr.bf16.mxu0 %v4087_v10 }
0x1119   :  { %3381 = vmatpush1.bf16.msra.mxu0 %v4090_v16 }
0x111a   :  { %3383 = vmatprep.subr.bf16.mxu0 %v4093_v19 }
0x111d   :  { %3385 = vmatpush1.bf16.msra.mxu0 %v4096_v26 }
0x111e   :  { %3387 = vmatprep.subr.bf16.mxu0 %v4099_v29 }
0x1121   :  { %3389 = vmatpush1.bf16.msra.mxu0 %v4102_v33 }
0x1122   :  { %3391 = vmatprep.subr.bf16.mxu0 %v4106_v38 }
0x1125   :  { %3393 = vmatpush1.bf16.msra.mxu0 %v4108_v43 }
0x1126   :  { %3443 = vmatprep.subr.bf16.mxu0 %v3971_v9 }
0x1173   :  { %v1384_v51 = vpop.f32.mrb[10].mxu0 }
0x1174   :  { %v1386_v54 = vpop.f32.mrb[11].mxu0  ;;  %v2974_v56 = vmul.f32 -1.442695, %v1384_v51 }
0x1175   :  { %3738 = vtanh.f32 %v1386_v54  ;;  %v2975_v32 = vmul.f32 -1.442695, %v1386_v54 }
0x1176   :  { %3740 = vpow2.f32 %v2974_v56 }
0x117f   :  { %v3739_v25 = vpop.eup %3738 }
0x1180   :  { %1404 = vrot.lane.b32.xlu1 %v3739_v25, %s3911_s1  ;;  %v3741_v61 = vpop.eup %3740 }
0x1181   :  { %v1395_v50 = vadd.f32 1.0, %v3741_v61 }
0x11db   :  { %v1721_v41 = vpop.f32.mrb[12].mxu0 }
0x11dc   :  { %v4464_v60 = vpop.f32.mrb[13].mxu0  ;;  %v2984_v55 = vmul.f32 -1.442695, %v1721_v41 }
0x11dd   :  { %3742 = vtanh.f32 %v4464_v60 }
0x11de   :  { %3744 = vrcp.f32 %v1395_v50 }
0x11df   :  { %3746 = vpow2.f32 %v2984_v55 }
0x11e7   :  { %v3743_v2 = vpop.eup %3742 }
0x11e8   :  { %1741 = vrot.lane.b32.xlu0 %v3743_v2, %s3911_s1  ;;  %v3745_v63 = vpop.eup %3744 }
0x11e9   :  { %v3747_v6 = vpop.eup %3746  ;;  %v1402_v15 = vmul.f32 %v3745_v63, %v4410_v36 }
0x11ea   :  { %v1732_v45 = vadd.f32 1.0, %v3747_v6 }
0x11ec   :  { %3748 = vrcp.f32 %v1732_v45 }
0x11f2   :  { %v1405_v4 = vpop.permute.xlu1 %1404 }
0x11f3   :  { %v1407_v37 = vmul.f32 %v3745_v63, %v1405_v4 }
0x11f5   :  { %1409 = vrot.lane.b32.xlu1 %v1407_v37, %s3911_s1 }
0x11f6   :  { %v3749_v7 = vpop.eup %3748 }
0x11f7   :  { %v1739_v34 = vmul.f32 %v3749_v7, %v4418_v30 }
0x125a   :  { %v1742_v12 = vpop.permute.xlu0 %1741 }
0x125b   :  { %v1744_v14 = vmul.f32 %v3749_v7, %v1742_v12 }
0x125d   :  { %1746 = vrot.lane.b32.xlu0 %v1744_v14, %s3911_s1 }
0x1267   :  { %v1410_v20 = vpop.permute.xlu1 %1409 }
0x1268   :  { %v1412_v24 = vadd.f32 %v1410_v20, %v1402_v15  ;;  %v2985_v15 = vmul.f32 -1.442695, %v4464_v60 }
0x126a   :  { %3750 = vtanh.f32 %v1412_v24 }
0x126b   :  { %3752 = vpow2.f32 %v2975_v32 }
0x1274   :  { %v3751_v62 = vpop.eup %3750 }
0x1275   :  { %1415 = vrot.lane.b32.xlu1 %v3751_v62, %s3911_s1  ;;  %v3753_v23 = vpop.eup %3752 }
0x1276   :  { %v1396_v39 = vadd.f32 1.0, %v3753_v23 }
0x12cf   :  { %v1747_v35 = vpop.permute.xlu0 %1746 }
0x12d0   :  { %v4473_v11 = vadd.f32 %v1747_v35, %v1739_v34 }
0x12d2   :  { %3754 = vtanh.f32 %v4473_v11 }
0x12d3   :  { %3756 = vrcp.f32 %v1396_v39 }
0x12dc   :  { %v3755_v40 = vpop.eup %3754 }
0x12dd   :  { %1752 = vrot.lane.b32.xlu0 %v3755_v40, %s3911_s1  ;;  %v3757_v36 = vpop.eup %3756 }
0x12e7   :  { %v1416_v57 = vpop.permute.xlu1 %1415 }
0x12e8   :  { %v1418_v42 = vmul.f32 %v3757_v36, %v1416_v57 }
0x12ea   :  { %1420 = vst.msk [vmem:[#allocation2 + $0x28] sm:$0xff] %vm102_vm2, %v1418_v42  ;;  %1535 = vrot.lane.b32.xlu1 %v1418_v42, %s3911_s1 }
0x134f   :  { %v1753_v62 = vpop.permute.xlu0 %1752 }
0x135c   :  { %v1536_v47 = vpop.permute.xlu1 %1535 }
0x135d   :  { %v1538_v30 = vsel %vm102_vm2, %v4438_v46, %v1536_v47 }
0x135e   :  { %v1539_v49 = vsel %vm88_vm0, 1.0, %v1538_v30 }
0x135f   :  { %1605 = vmatmul.mubr.f32.vlgmr.msra.gmra.mrb[14].mxu1 %v1539_v49 }
0x1360   :  { %3397 = vmatpush1.bf16.msra.mxu1 %v3982_v13  ;;  %1956 = vmatprep.mubr.f32.mxu1 %v3910_v17 }
0x1361   :  { %3399 = vmatprep.subr.bf16.mxu1 %v3996_v18 }
0x1364   :  { %3401 = vmatpush1.bf16.msra.mxu1 %v4006_v21 }
0x1365   :  { %3403 = vmatprep.subr.bf16.mxu1 %v4010_v22 }
0x1368   :  { %3405 = vmatpush1.bf16.msra.mxu1 %v4026_v27 }
0x1369   :  { %3407 = vmatprep.subr.bf16.mxu1 %v4030_v28 }
0x136c   :  { %3409 = vmatpush1.bf16.msra.mxu1 %v4040_v31 }
0x136d   :  { %3411 = vmatprep.subr.bf16.mxu1 %v4063_v48 }
0x1432   :  { %v1606_v46 = vpop.f32.mrb[14].mxu1 }
0x1433   :  { %v1608_v44 = vpop.f32.mrb[15].mxu1  ;;  %v2980_v54 = vmul.f32 -1.442695, %v1606_v46 }
0x1434   :  { %3758 = vtanh.f32 %v1608_v44  ;;  %v2981_v55 = vmul.f32 -1.442695, %v1608_v44 }
0x1435   :  { %3760 = vpow2.f32 %v2980_v54 }
0x143e   :  { %v3759_v51 = vpop.eup %3758 }
0x143f   :  { %1626 = vrot.lane.b32.xlu1 %v3759_v51, %s3911_s1  ;;  %v3761_v25 = vpop.eup %3760 }
0x1440   :  { %v1617_v56 = vadd.f32 1.0, %v3761_v25 }
0x1442   :  { %3762 = vrcp.f32 %v1617_v56 }
0x144c   :  { %v3763_v41 = vpop.eup %3762 }
0x144d   :  { %v1624_v2 = vmul.f32 %v3763_v41, %v1412_v24 }
0x14b1   :  { %v1627_v61 = vpop.permute.xlu1 %1626 }
0x14b2   :  { %v1629_v50 = vmul.f32 %v3763_v41, %v1627_v61 }
0x14b4   :  { %1631 = vrot.lane.b32.xlu1 %v1629_v50, %s3911_s1 }
0x1526   :  { %v1632_v63 = vpop.permute.xlu1 %1631 }
0x1527   :  { %v1634_v4 = vadd.f32 %v1632_v63, %v1624_v2 }
0x1529   :  { %3764 = vtanh.f32 %v1634_v4 }
0x152a   :  { %3766 = vpow2.f32 %v2981_v55 }
0x1533   :  { %v3765_v37 = vpop.eup %3764 }
0x1534   :  { %1637 = vrot.lane.b32.xlu1 %v3765_v37, %s3911_s1  ;;  %v3767_v6 = vpop.eup %3766 }
0x1535   :  { %v1618_v45 = vadd.f32 1.0, %v3767_v6  ;;  %v4524_v6 = vld [vmem:[#allocation3] ss:$0 sm:$0xff] }
0x1537   :  { %3768 = vrcp.f32 %v1618_v45 }
0x1538   :  { %3770 = vpow2.f32 %v2985_v15 }
0x1541   :  { %v3769_v7 = vpop.eup %3768 }
0x1542   :  { %v3771_v20 = vpop.eup %3770 }
0x1543   :  { %v1733_v24 = vadd.f32 1.0, %v3771_v20 }
0x1545   :  { %3772 = vrcp.f32 %v1733_v24 }
0x154f   :  { %v3773_v32 = vpop.eup %3772 }
0x1550   :  { %v1755_v34 = vmul.f32 %v3773_v32, %v1753_v62 }
0x15a6   :  { %v1638_v12 = vpop.permute.xlu1 %1637 }
0x15a7   :  { %v1640_v14 = vmul.f32 %v3769_v7, %v1638_v12 }
0x15a9   :  { %1642 = vst.msk [vmem:[#allocation2 + $0x30] sm:$0xff] %vm102_vm2, %v1640_v14  ;;  %1757 = vrot.lane.b32.xlu1 %v1640_v14, %s3911_s1 }
0x161b   :  { %v1758_v35 = vpop.permute.xlu1 %1757 }
0x161c   :  { %v1760_v23 = vsel %vm102_vm2, %v1755_v34, %v1758_v35 }
0x161d   :  { %v1761_v39 = vsel %vm88_vm0, 1.0, %v1760_v23 }
0x161e   :  { %1827 = vmatmul.mubr.f32.vlgmr.msra.gmra.mrb[14].mxu0 %v1761_v39 }
0x161f   :  { %3445 = vmatpush1.bf16.msra.mxu0 %v3982_v13  ;;  %2181 = vmatprep.mubr.f32.mxu0 %v3910_v17 }
0x1620   :  { %3447 = vmatprep.subr.bf16.mxu0 %v3996_v18 }
0x1623   :  { %3449 = vmatpush1.bf16.msra.mxu0 %v4006_v21 }
0x1624   :  { %3451 = vmatprep.subr.bf16.mxu0 %v4010_v22 }
0x1627   :  { %3453 = vmatpush1.bf16.msra.mxu0 %v4026_v27 }
0x1628   :  { %3455 = vmatprep.subr.bf16.mxu0 %v4030_v28 }
0x162b   :  { %3457 = vmatpush1.bf16.msra.mxu0 %v4040_v31 }
0x162c   :  { %3459 = vmatprep.subr.bf16.mxu0 %v4063_v48 }
0x16f1   :  { %v1828_v60 = vpop.f32.mrb[14].mxu0 }
0x16f2   :  { %v1830_v40 = vpop.f32.mrb[15].mxu0  ;;  %v2986_v57 = vmul.f32 -1.442695, %v1828_v60 }
0x16f3   :  { %3774 = vtanh.f32 %v1830_v40  ;;  %v2987_v56 = vmul.f32 -1.442695, %v1830_v40 }
0x16f4   :  { %3776 = vpow2.f32 %v2986_v57 }
0x16fd   :  { %v3775_v36 = vpop.eup %3774 }
0x16fe   :  { %1848 = vrot.lane.b32.xlu0 %v3775_v36, %s3911_s1  ;;  %v3777_v42 = vpop.eup %3776 }
0x16ff   :  { %v1839_v47 = vadd.f32 1.0, %v3777_v42 }
0x1701   :  { %3778 = vrcp.f32 %v1839_v47 }
0x170b   :  { %v3779_v30 = vpop.eup %3778 }
0x170c   :  { %v1846_v44 = vmul.f32 %v3779_v30, %v1634_v4  ;;  %v4519_v4 = vld [vmem:[%s4766_s3] ss:$0 sm:$0xff] }
0x1770   :  { %v1849_v49 = vpop.permute.xlu0 %1848 }
0x1771   :  { %v1851_v46 = vmul.f32 %v3779_v30, %v1849_v49 }
0x1773   :  { %1853 = vrot.lane.b32.xlu1 %v1851_v46, %s3911_s1 }
0x17e5   :  { %v1854_v51 = vpop.permute.xlu1 %1853 }
0x17e6   :  { %v4512_v54 = vadd.f32 %v1854_v51, %v1846_v44 }
0x17e8   :  { %3780 = vtanh.f32 %v4512_v54 }
0x17e9   :  { %3782 = vpow2.f32 %v2987_v56 }
0x17f2   :  { %v3781_v25 = vpop.eup %3780 }
0x17f3   :  { %1859 = vrot.lane.b32.xlu0 %v3781_v25, %s3911_s1  ;;  %v3783_v41 = vpop.eup %3782 }
0x17f4   :  { %v1840_v61 = vadd.f32 1.0, %v3783_v41 }
0x17f6   :  { %3784 = vrcp.f32 %v1840_v61 }
0x1800   :  { %v3785_v50 = vpop.eup %3784 }
0x1865   :  { %v1860_v2 = vpop.permute.xlu0 %1859 }
0x1866   :  { %v1862_v63 = vmul.f32 %v3785_v50, %v1860_v2 }
0x1868   :  { %1864 = vst.msk [vmem:[#allocation2 + $0x38] sm:$0xff] %vm102_vm2, %v1862_v63  ;;  %v1871_v37 = vmul.f32 %v4519_v4, %v1862_v63 }
0x186a   :  { %v1872_v55 = vsel %vm102_vm2, %v1871_v37, 0.0 }
0x186b   :  { %1873 = vadd.xlane.f32.xlu1 %v1872_v55 }
0x18f8   :  { %v1874_v45 = vpop.xlane.xlu1 %1873 }
0x18f9   :  { %v1881_v7 = vadd.f32 %v4524_v6, %v1874_v45 }
0x18fb   :  { %1884 = vperm.xlu0 %3592, %v1881_v7  }
0x197a   :  { %v1885_v12 = vpop.permute.xlu0 %1884 }
0x197b   :  { %v1887_v14 = vsel %vm88_vm0, %v1885_v12, %v1755_v34 }
0x197c   :  { %v1888_v15 = vsel %vm89_vm1, 1.0, %v1887_v14 }
0x197d   :  { %2990 = vmatmul.mubr.msk.f32.vlgmr.msra.gmra.mrb[16].mxu1 %vm102_vm2, %v1888_v15 }
0x197e   :  { %3413 = vmatpush1.bf16.msra.mxu1 %v4065_v52  ;;  %2063 = vmatprep.mubr.f32.mxu1 %v3910_v17 }
0x197f   :  { %3415 = vmatprep.subr.bf16.mxu1 %v4067_v53 }
0x1982   :  { %3417 = vmatpush1.bf16.msra.mxu1 %v4072_v58 }
0x1983   :  { %3419 = vmatprep.subr.bf16.mxu1 %v4075_v59 }
0x1986   :  { %3421 = vmatpush1.bf16.msra.mxu1 %v4078_v0 }
0x1987   :  { %3423 = vmatprep.subr.bf16.mxu1 %v4081_v1 }
0x198a   :  { %3425 = vmatpush1.bf16.msra.mxu1 %v4084_v8 }
0x198b   :  { %3427 = vmatprep.subr.bf16.mxu1 %v4087_v10 }
0x198e   :  { %3429 = vmatpush1.bf16.msra.mxu1 %v4090_v16 }
0x198f   :  { %3431 = vmatprep.subr.bf16.mxu1 %v4093_v19 }
0x1992   :  { %3433 = vmatpush1.bf16.msra.mxu1 %v4096_v26 }
0x1993   :  { %3435 = vmatprep.subr.bf16.mxu1 %v4099_v29 }
0x1996   :  { %3437 = vmatpush1.bf16.msra.mxu1 %v4102_v33 }
0x1997   :  { %3439 = vmatprep.subr.bf16.mxu1 %v4106_v38 }
0x199a   :  { %3441 = vmatpush1.bf16.msra.mxu1 %v4108_v43 }
0x199b   :  { %3491 = vmatprep.subr.bf16.mxu1 %v3971_v9 }
0x1a50   :  { %v1958_v20 = vpop.f32.mrb[16].mxu1 }
0x1a51   :  { %v1960_v24 = vpop.f32.mrb[17].mxu1  ;;  %v2991_v32 = vmul.f32 -1.442695, %v1958_v20 }
0x1a52   :  { %3786 = vtanh.f32 %v1960_v24  ;;  %v2992_v47 = vmul.f32 -1.442695, %v1960_v24 }
0x1a53   :  { %3788 = vpow2.f32 %v2991_v32 }
0x1a5c   :  { %v3787_v62 = vpop.eup %3786 }
0x1a5d   :  { %1978 = vrot.lane.b32.xlu0 %v3787_v62, %s3911_s1  ;;  %v3789_v34 = vpop.eup %3788 }
0x1a5e   :  { %v1969_v35 = vadd.f32 1.0, %v3789_v34 }
0x1a60   :  { %3790 = vrcp.f32 %v1969_v35 }
0x1a6a   :  { %v3791_v23 = vpop.eup %3790 }
0x1a6b   :  { %v1976_v40 = vmul.f32 %v3791_v23, %v4473_v11 }
0x1acf   :  { %v1979_v39 = vpop.permute.xlu0 %1978 }
0x1ad0   :  { %v1981_v60 = vmul.f32 %v3791_v23, %v1979_v39 }
0x1ad2   :  { %1983 = vrot.lane.b32.xlu0 %v1981_v60, %s3911_s1 }
0x1b44   :  { %v1984_v36 = vpop.permute.xlu0 %1983 }
0x1b45   :  { %v4552_v57 = vadd.f32 %v1984_v36, %v1976_v40 }
0x1b47   :  { %3792 = vtanh.f32 %v4552_v57 }
0x1b48   :  { %3794 = vpow2.f32 %v2992_v47 }
0x1b51   :  { %v3793_v42 = vpop.eup %3792 }
0x1b52   :  { %1989 = vrot.lane.b32.xlu0 %v3793_v42, %s3911_s1  ;;  %v3795_v30 = vpop.eup %3794 }
0x1b53   :  { %v1970_v49 = vadd.f32 1.0, %v3795_v30 }
0x1b55   :  { %3796 = vrcp.f32 %v1970_v49 }
0x1b56   :  { %1994 = vrot.lane.b32.xlu0 %v1862_v63, %s3911_s1 }
0x1b5f   :  { %v3797_v44 = vpop.eup %3796 }
0x1bc4   :  { %v1990_v46 = vpop.permute.xlu0 %1989 }
0x1bc5   :  { %v1992_v51 = vmul.f32 %v3797_v44, %v1990_v46 }
0x1bc8   :  { %v1995_v25 = vpop.permute.xlu0 %1994 }
0x1bc9   :  { %v1997_v11 = vsel %vm102_vm2, %v1992_v51, %v1995_v25 }
0x1bca   :  { %v1998_v56 = vsel %vm88_vm0, 1.0, %v1997_v11 }
0x1bcb   :  { %2064 = vmatmul.mubr.f32.vlgmr.msra.gmra.mrb[18].mxu1 %v1998_v56 }
0x1bcc   :  { %3493 = vmatpush1.bf16.msra.mxu1 %v3982_v13  ;;  %2406 = vmatprep.mubr.f32.mxu1 %v3910_v17 }
0x1bcd   :  { %3495 = vmatprep.subr.bf16.mxu1 %v3996_v18 }
0x1bd0   :  { %3497 = vmatpush1.bf16.msra.mxu1 %v4006_v21 }
0x1bd1   :  { %3499 = vmatprep.subr.bf16.mxu1 %v4010_v22 }
0x1bd4   :  { %3501 = vmatpush1.bf16.msra.mxu1 %v4026_v27 }
0x1bd5   :  { %3503 = vmatprep.subr.bf16.mxu1 %v4030_v28 }
0x1bd8   :  { %3505 = vmatpush1.bf16.msra.mxu1 %v4040_v31 }
0x1bd9   :  { %3507 = vmatprep.subr.bf16.mxu1 %v4063_v48 }
0x1c9e   :  { %v2065_v41 = vpop.f32.mrb[18].mxu1 }
0x1c9f   :  { %v2067_v61 = vpop.f32.mrb[19].mxu1  ;;  %v2993_v2 = vmul.f32 -1.442695, %v2065_v41 }
0x1ca0   :  { %3798 = vtanh.f32 %v2067_v61  ;;  %v2994_v24 = vmul.f32 -1.442695, %v2067_v61 }
0x1ca1   :  { %3800 = vpow2.f32 %v2993_v2 }
0x1caa   :  { %v3799_v50 = vpop.eup %3798 }
0x1cab   :  { %2085 = vrot.lane.b32.xlu0 %v3799_v50, %s3911_s1  ;;  %v3801_v63 = vpop.eup %3800 }
0x1cac   :  { %v2076_v37 = vadd.f32 1.0, %v3801_v63 }
0x1cae   :  { %3802 = vrcp.f32 %v2076_v37 }
0x1cb8   :  { %v3803_v55 = vpop.eup %3802 }
0x1cb9   :  { %v2083_v12 = vmul.f32 %v3803_v55, %v4512_v54 }
0x1d1d   :  { %v2086_v45 = vpop.permute.xlu0 %2085 }
0x1d1e   :  { %v2088_v7 = vmul.f32 %v3803_v55, %v2086_v45 }
0x1d20   :  { %2090 = vrot.lane.b32.xlu0 %v2088_v7, %s3911_s1 }
0x1d92   :  { %v2091_v14 = vpop.permute.xlu0 %2090 }
0x1d93   :  { %v4572_v15 = vadd.f32 %v2091_v14, %v2083_v12 }
0x1d95   :  { %3804 = vtanh.f32 %v4572_v15 }
0x1d96   :  { %3806 = vpow2.f32 %v2994_v24 }
0x1d9f   :  { %v3805_v20 = vpop.eup %3804 }
0x1da0   :  { %2096 = vrot.lane.b32.xlu0 %v3805_v20, %s3911_s1  ;;  %v3807_v62 = vpop.eup %3806 }
0x1da1   :  { %v2077_v32 = vadd.f32 1.0, %v3807_v62 }
0x1da3   :  { %3808 = vrcp.f32 %v2077_v32 }
0x1dad   :  { %v3809_v34 = vpop.eup %3808 }
0x1e12   :  { %v2097_v35 = vpop.permute.xlu0 %2096 }
0x1e13   :  { %v2099_v23 = vmul.f32 %v3809_v34, %v2097_v35 }
0x1e15   :  { %2101 = vst.msk [vmem:[#allocation2 + $0x40] sm:$0xff] %vm102_vm2, %v2099_v23  ;;  %v2102_v54 = vmul.f32 %v4519_v4, %v2099_v23 }
0x1e17   :  { %v2103_v39 = vsel %vm102_vm2, %v2102_v54, 0.0 }
0x1e18   :  { %2104 = vadd.xlane.f32.xlu0 %v2103_v39 }
0x1e1c   :  { %v2785_v3 = vld [vmem:[#allocation2 + $0x40] sm:$0xff] }
0x1ea5   :  { %v2105_v60 = vpop.xlane.xlu0 %2104 }
0x1ea6   :  { %v2106_v40 = vadd.f32 %v4524_v6, %v2105_v60 }
0x1ea8   :  { %2109 = vperm.xlu1 %3593, %v2106_v40  }
0x1f27   :  { %v2110_v36 = vpop.permute.xlu1 %2109 }
0x1f28   :  { %v2112_v42 = vsel %vm88_vm0, %v2110_v36, %v1992_v51 }
0x1f29   :  { %v2113_v47 = vsel %vm89_vm1, 1.0, %v2112_v42 }
0x1f2a   :  { %2995 = vmatmul.mubr.msk.f32.vlgmr.msra.gmra.mrb[16].mxu0 %vm102_vm2, %v2113_v47 }
0x1f2b   :  { %3461 = vmatpush1.bf16.msra.mxu0 %v4065_v52  ;;  %2288 = vmatprep.mubr.f32.mxu0 %v3910_v17 }
0x1f2c   :  { %3463 = vmatprep.subr.bf16.mxu0 %v4067_v53 }
0x1f2f   :  { %3465 = vmatpush1.bf16.msra.mxu0 %v4072_v58 }
0x1f30   :  { %3467 = vmatprep.subr.bf16.mxu0 %v4075_v59 }
0x1f33   :  { %3469 = vmatpush1.bf16.msra.mxu0 %v4078_v0 }
0x1f34   :  { %3471 = vmatprep.subr.bf16.mxu0 %v4081_v1 }
0x1f37   :  { %3473 = vmatpush1.bf16.msra.mxu0 %v4084_v8 }
0x1f38   :  { %3475 = vmatprep.subr.bf16.mxu0 %v4087_v10 }
0x1f3b   :  { %3477 = vmatpush1.bf16.msra.mxu0 %v4090_v16 }
0x1f3c   :  { %3479 = vmatprep.subr.bf16.mxu0 %v4093_v19 }
0x1f3f   :  { %3481 = vmatpush1.bf16.msra.mxu0 %v4096_v26 }
0x1f40   :  { %3483 = vmatprep.subr.bf16.mxu0 %v4099_v29 }
0x1f43   :  { %3485 = vmatpush1.bf16.msra.mxu0 %v4102_v33 }
0x1f44   :  { %3487 = vmatprep.subr.bf16.mxu0 %v4106_v38 }
0x1f47   :  { %3489 = vmatpush1.bf16.msra.mxu0 %v4108_v43 }
0x1f48   :  { %3539 = vmatprep.subr.bf16.mxu0 %v3971_v9 }
0x1ffd   :  { %v2183_v30 = vpop.f32.mrb[16].mxu0 }
0x1ffe   :  { %v2185_v49 = vpop.f32.mrb[17].mxu0  ;;  %v2996_v44 = vmul.f32 -1.442695, %v2183_v30 }
0x1fff   :  { %3810 = vtanh.f32 %v2185_v49  ;;  %v2997_v63 = vmul.f32 -1.442695, %v2185_v49 }
0x2000   :  { %3812 = vpow2.f32 %v2996_v44 }
0x2009   :  { %v3811_v46 = vpop.eup %3810 }
0x200a   :  { %2203 = vrot.lane.b32.xlu1 %v3811_v46, %s3911_s1  ;;  %v3813_v51 = vpop.eup %3812 }
0x200b   :  { %v2194_v25 = vadd.f32 1.0, %v3813_v51 }
0x200d   :  { %3814 = vrcp.f32 %v2194_v25 }
0x2017   :  { %v3815_v11 = vpop.eup %3814 }
0x2018   :  { %v2201_v61 = vmul.f32 %v3815_v11, %v4552_v57 }
0x207c   :  { %v2204_v56 = vpop.permute.xlu1 %2203 }
0x207d   :  { %v2206_v41 = vmul.f32 %v3815_v11, %v2204_v56 }
0x207f   :  { %2208 = vrot.lane.b32.xlu1 %v2206_v41, %s3911_s1 }
0x20f1   :  { %v2209_v50 = vpop.permute.xlu1 %2208 }
0x20f2   :  { %v4605_v9 = vadd.f32 %v2209_v50, %v2201_v61 }
0x20f4   :  { %3816 = vtanh.f32 %v4605_v9 }
0x20f5   :  { %3818 = vpow2.f32 %v2997_v63 }
0x20fe   :  { %v3817_v2 = vpop.eup %3816 }
0x20ff   :  { %2214 = vrot.lane.b32.xlu1 %v3817_v2, %s3911_s1  ;;  %v3819_v37 = vpop.eup %3818 }
0x2100   :  { %v2195_v55 = vadd.f32 1.0, %v3819_v37 }
0x2102   :  { %3820 = vrcp.f32 %v2195_v55 }
0x2103   :  { %2219 = vrot.lane.b32.xlu1 %v2099_v23, %s3911_s1 }
0x210c   :  { %v3821_v7 = vpop.eup %3820 }
0x2171   :  { %v2215_v45 = vpop.permute.xlu1 %2214 }
0x2172   :  { %v2217_v12 = vmul.f32 %v3821_v7, %v2215_v45 }
0x2175   :  { %v2220_v14 = vpop.permute.xlu1 %2219 }
0x2176   :  { %v2222_v57 = vsel %vm102_vm2, %v2217_v12, %v2220_v14 }
0x2177   :  { %v2223_v20 = vsel %vm88_vm0, 1.0, %v2222_v57 }
0x2178   :  { %2289 = vmatmul.mubr.f32.vlgmr.msra.gmra.mrb[18].mxu0 %v2223_v20 }
0x2179   :  { %3541 = vmatpush1.bf16.msra.mxu0 %v3982_v13  ;;  %2631 = vmatprep.mubr.f32.mxu0 %v3910_v17 }
0x217a   :  { %3543 = vmatprep.subr.bf16.mxu0 %v3996_v18 }
0x217d   :  { %3545 = vmatpush1.bf16.msra.mxu0 %v4006_v21 }
0x217e   :  { %3547 = vmatprep.subr.bf16.mxu0 %v4010_v22 }
0x2181   :  { %3549 = vmatpush1.bf16.msra.mxu0 %v4026_v27 }
0x2182   :  { %3551 = vmatprep.subr.bf16.mxu0 %v4030_v28 }
0x2185   :  { %3553 = vmatpush1.bf16.msra.mxu0 %v4040_v31 }
0x2186   :  { %3555 = vmatprep.subr.bf16.mxu0 %v4063_v48 }
0x224b   :  { %v2290_v24 = vpop.f32.mrb[18].mxu0 }
0x224c   :  { %v2292_v62 = vpop.f32.mrb[19].mxu0  ;;  %v2998_v32 = vmul.f32 -1.442695, %v2290_v24 }
0x224d   :  { %3822 = vtanh.f32 %v2292_v62  ;;  %v2999_v23 = vmul.f32 -1.442695, %v2292_v62 }
0x224e   :  { %3824 = vpow2.f32 %v2998_v32 }
0x2257   :  { %v3823_v13 = vpop.eup %3822 }
0x2258   :  { %2310 = vrot.lane.b32.xlu0 %v3823_v13, %s3911_s1  ;;  %v3825_v18 = vpop.eup %3824 }
0x2259   :  { %v2301_v21 = vadd.f32 1.0, %v3825_v18 }
0x225b   :  { %3826 = vrcp.f32 %v2301_v21 }
0x2265   :  { %v3827_v22 = vpop.eup %3826 }
0x2266   :  { %v2308_v28 = vmul.f32 %v3827_v22, %v4572_v15 }
0x22ca   :  { %v2311_v34 = vpop.permute.xlu0 %2310 }
0x22cb   :  { %v2313_v27 = vmul.f32 %v3827_v22, %v2311_v34 }
0x22cd   :  { %2315 = vrot.lane.b32.xlu1 %v2313_v27, %s3911_s1 }
0x233f   :  { %v2316_v31 = vpop.permute.xlu1 %2315 }
0x2340   :  { %v4625_v48 = vadd.f32 %v2316_v31, %v2308_v28 }
0x2342   :  { %3828 = vtanh.f32 %v4625_v48 }
0x2343   :  { %3830 = vpow2.f32 %v2999_v23 }
0x234c   :  { %v3829_v35 = vpop.eup %3828 }
0x234d   :  { %2321 = vrot.lane.b32.xlu1 %v3829_v35, %s3911_s1  ;;  %v3831_v54 = vpop.eup %3830 }
0x234e   :  { %v2302_v39 = vadd.f32 1.0, %v3831_v54 }
0x2350   :  { %3832 = vrcp.f32 %v2302_v39 }
0x235a   :  { %v3833_v60 = vpop.eup %3832 }
0x23bf   :  { %v2322_v40 = vpop.permute.xlu1 %2321 }
0x23c0   :  { %v2324_v36 = vmul.f32 %v3833_v60, %v2322_v40 }
0x23c2   :  { %2326 = vst.msk [vmem:[#allocation2 + $0x48] sm:$0xff] %vm102_vm2, %v2324_v36  ;;  %v2327_v15 = vmul.f32 %v4519_v4, %v2324_v36 }
0x23c4   :  { %v2328_v42 = vsel %vm102_vm2, %v2327_v15, 0.0 }
0x23c5   :  { %2329 = vadd.xlane.f32.xlu1 %v2328_v42 }
0x2452   :  { %v2330_v47 = vpop.xlane.xlu1 %2329 }
0x2453   :  { %v2331_v30 = vadd.f32 %v4524_v6, %v2330_v47 }
0x2455   :  { %2334 = vperm.xlu0 %3592, %v2331_v30  }
0x24d4   :  { %v2335_v49 = vpop.permute.xlu0 %2334 }
0x24d5   :  { %v2337_v46 = vsel %vm88_vm0, %v2335_v49, %v2217_v12 }
0x24d6   :  { %v2338_v44 = vsel %vm89_vm1, 1.0, %v2337_v46 }
0x24d7   :  { %3000 = vmatmul.mubr.msk.f32.vlgmr.msra.gmra.mrb[20].mxu1 %vm102_vm2, %v2338_v44 }
0x24d8   :  { %3509 = vmatpush1.bf16.msra.mxu1 %v4065_v52  ;;  %2513 = vmatprep.mubr.f32.mxu1 %v3910_v17 }
0x24d9   :  { %3511 = vmatprep.subr.bf16.mxu1 %v4067_v53 }
0x24dc   :  { %3513 = vmatpush1.bf16.msra.mxu1 %v4072_v58 }
0x24dd   :  { %3515 = vmatprep.subr.bf16.mxu1 %v4075_v59 }
0x24e0   :  { %3517 = vmatpush1.bf16.msra.mxu1 %v4078_v0 }
0x24e1   :  { %3519 = vmatprep.subr.bf16.mxu1 %v4081_v1 }
0x24e4   :  { %3521 = vmatpush1.bf16.msra.mxu1 %v4084_v8 }
0x24e5   :  { %3523 = vmatprep.subr.bf16.mxu1 %v4087_v10 }
0x24e8   :  { %3525 = vmatpush1.bf16.msra.mxu1 %v4090_v16 }
0x24e9   :  { %3527 = vmatprep.subr.bf16.mxu1 %v4093_v19 }
0x24ec   :  { %3529 = vmatpush1.bf16.msra.mxu1 %v4096_v26 }
0x24ed   :  { %3531 = vmatprep.subr.bf16.mxu1 %v4099_v29 }
0x24f0   :  { %3533 = vmatpush1.bf16.msra.mxu1 %v4102_v33 }
0x24f1   :  { %3535 = vmatprep.subr.bf16.mxu1 %v4106_v38 }
0x24f4   :  { %3537 = vmatpush1.bf16.msra.mxu1 %v4108_v43 }
0x25aa   :  { %v2408_v51 = vpop.f32.mrb[20].mxu1 }
0x25ab   :  { %v2410_v25 = vpop.f32.mrb[21].mxu1  ;;  %v3001_v56 = vmul.f32 -1.442695, %v2408_v51 }
0x25ac   :  { %3834 = vtanh.f32 %v2410_v25  ;;  %v3002_v12 = vmul.f32 -1.442695, %v2410_v25 }
0x25ad   :  { %3836 = vpow2.f32 %v3001_v56 }
0x25b6   :  { %v3835_v11 = vpop.eup %3834 }
0x25b7   :  { %2428 = vrot.lane.b32.xlu0 %v3835_v11, %s3911_s1  ;;  %v3837_v41 = vpop.eup %3836 }
0x25b8   :  { %v2419_v61 = vadd.f32 1.0, %v3837_v41 }
0x25ba   :  { %3838 = vrcp.f32 %v2419_v61 }
0x25c4   :  { %v3839_v50 = vpop.eup %3838 }
0x25c5   :  { %v2426_v37 = vmul.f32 %v3839_v50, %v4605_v9 }
0x2629   :  { %v2429_v2 = vpop.permute.xlu0 %2428 }
0x262a   :  { %v2431_v63 = vmul.f32 %v3839_v50, %v2429_v2 }
0x262c   :  { %2433 = vrot.lane.b32.xlu0 %v2431_v63, %s3911_s1 }
0x269e   :  { %v2434_v55 = vpop.permute.xlu0 %2433 }
0x269f   :  { %v4657_v45 = vadd.f32 %v2434_v55, %v2426_v37 }
0x26a1   :  { %3840 = vtanh.f32 %v4657_v45 }
0x26a2   :  { %3842 = vpow2.f32 %v3002_v12  ;;  %v2778_v12 = vld [vmem:[#allocation2 + $0x8] sm:$0xff] }
0x26ab   :  { %v3841_v7 = vpop.eup %3840 }
0x26ac   :  { %2439 = vrot.lane.b32.xlu0 %v3841_v7, %s3911_s1  ;;  %v3843_v14 = vpop.eup %3842 }
0x26ad   :  { %v2420_v57 = vadd.f32 1.0, %v3843_v14  ;;  %v2790_v14 = vmul.f32 %v4519_v4, %v2778_v12 }
0x26af   :  { %3844 = vrcp.f32 %v2420_v57  ;;  %v2781_v57 = vld [vmem:[#allocation2 + $0x20] sm:$0xff] }
0x26b0   :  { %2444 = vrot.lane.b32.xlu0 %v2324_v36, %s3911_s1 }
0x26b9   :  { %v3845_v24 = vpop.eup %3844 }
0x271e   :  { %v2440_v20 = vpop.permute.xlu0 %2439 }
0x271f   :  { %v2442_v62 = vmul.f32 %v3845_v24, %v2440_v20  ;;  %v2804_v20 = vsel %vm102_vm2, %v2790_v14, 0.0  ;;  %v2793_v24 = vmul.f32 %v4519_v4, %v2781_v57 }
0x2722   :  { %v2445_v13 = vpop.permute.xlu0 %2444 }
0x2723   :  { %v2447_v9 = vsel %vm102_vm2, %v2442_v62, %v2445_v13  ;;  %v2797_v13 = vmul.f32 %v4519_v4, %v2785_v3 }
0x2724   :  { %v2448_v32 = vsel %vm88_vm0, 1.0, %v2447_v9  ;;  %v2783_v9 = vld [vmem:[#allocation2 + $0x30] sm:$0xff] }
0x2725   :  { %2514 = vmatmul.mubr.f32.vlgmr.msra.gmra.mrb[22].mxu1 %v2448_v32  ;;  %v2825_v32 = vsel %vm102_vm2, %v2797_v13, 0.0 }
0x27f8   :  { %v2515_v18 = vpop.f32.mrb[22].mxu1 }
0x27f9   :  { %v2517_v21 = vpop.f32.mrb[23].mxu1  ;;  %v3003_v34 = vmul.f32 -1.442695, %v2515_v18  ;;  %v2795_v18 = vmul.f32 %v4519_v4, %v2783_v9 }
0x27fa   :  { %3846 = vtanh.f32 %v2517_v21  ;;  %v3004_v36 = vmul.f32 -1.442695, %v2517_v21  ;;  %v2784_v21 = vld [vmem:[#allocation2 + $0x38] sm:$0xff] }
0x27fb   :  { %3848 = vpow2.f32 %v3003_v34  ;;  %v2796_v34 = vmul.f32 %v4519_v4, %v2784_v21 }
0x2804   :  { %v3847_v22 = vpop.eup %3846 }
0x2805   :  { %2535 = vrot.lane.b32.xlu0 %v3847_v22, %s3911_s1  ;;  %v3849_v27 = vpop.eup %3848  ;;  %v2819_v22 = vsel %vm102_vm2, %v2795_v18, 0.0 }
0x2806   :  { %v2526_v28 = vadd.f32 1.0, %v3849_v27  ;;  %v2822_v27 = vsel %vm102_vm2, %v2796_v34, 0.0 }
0x2808   :  { %3850 = vrcp.f32 %v2526_v28 }
0x2812   :  { %v3851_v31 = vpop.eup %3850 }
0x2813   :  { %v2533_v54 = vmul.f32 %v3851_v31, %v4625_v48 }
0x2877   :  { %v2536_v35 = vpop.permute.xlu0 %2535 }
0x2878   :  { %v2538_v23 = vmul.f32 %v3851_v31, %v2536_v35 }
0x287a   :  { %2540 = vrot.lane.b32.xlu0 %v2538_v23, %s3911_s1 }
0x28ec   :  { %v2541_v39 = vpop.permute.xlu0 %2540 }
0x28ed   :  { %v4668_v60 = vadd.f32 %v2541_v39, %v2533_v54 }
0x28ef   :  { %3852 = vtanh.f32 %v4668_v60 }
0x28f0   :  { %3854 = vpow2.f32 %v3004_v36 }
0x28f9   :  { %v3853_v40 = vpop.eup %3852 }
0x28fa   :  { %2546 = vrot.lane.b32.xlu1 %v3853_v40, %s3911_s1  ;;  %v3855_v15 = vpop.eup %3854 }
0x28fb   :  { %v2527_v42 = vadd.f32 1.0, %v3855_v15 }
0x28fd   :  { %3856 = vrcp.f32 %v2527_v42 }
0x2907   :  { %v3857_v47 = vpop.eup %3856 }
0x296c   :  { %v2547_v30 = vpop.permute.xlu1 %2546 }
0x296d   :  { %v2549_v49 = vmul.f32 %v3857_v47, %v2547_v30  ;;  %v2777_v47 = vld [vmem:[#allocation2] sm:$0xff]  ;;  %v2779_v30 = vld [vmem:[#allocation2 + $0x10] sm:$0xff] }
0x296f   :  { %2551 = vst.msk [vmem:[#allocation2 + $0x50] sm:$0xff] %vm102_vm2, %v2549_v49  ;;  %v2552_v48 = vmul.f32 %v4519_v4, %v2549_v49 }
0x2971   :  { %v2553_v46 = vsel %vm102_vm2, %v2552_v48, 0.0  ;;  %v2791_v48 = vmul.f32 %v4519_v4, %v2779_v30 }
0x2972   :  { %2554 = vadd.xlane.f32.xlu0 %v2553_v46  ;;  %v2780_v46 = vld [vmem:[#allocation2 + $0x18] sm:$0xff] }
0x29ff   :  { %v2555_v44 = vpop.xlane.xlu0 %2554 }
0x2a00   :  { %v2556_v51 = vadd.f32 %v4524_v6, %v2555_v44  ;;  %v2807_v44 = vsel %vm102_vm2, %v2791_v48, 0.0 }
0x2a02   :  { %2559 = vperm.xlu1 %3593, %v2556_v51   ;;  %v2782_v51 = vld [vmem:[#allocation2 + $0x28] sm:$0xff] }
0x2a81   :  { %v2560_v25 = vpop.permute.xlu1 %2559 }
0x2a82   :  { %v2562_v11 = vsel %vm88_vm0, %v2560_v25, %v2442_v62  ;;  %v2813_v62 = vsel %vm102_vm2, %v2793_v24, 0.0 }
0x2a83   :  { %v2563_v56 = vsel %vm89_vm1, 1.0, %v2562_v11  ;;  %v2794_v11 = vmul.f32 %v4519_v4, %v2782_v51 }
0x2a84   :  { %3005 = vmatmul.mubr.msk.f32.vlgmr.msra.gmra.mrb[20].mxu0 %vm102_vm2, %v2563_v56  ;;  %v2786_v56 = vld [vmem:[#allocation2 + $0x48] sm:$0xff] }
0x2a85   :  { %3557 = vmatpush1.bf16.msra.mxu0 %v4065_v52  ;;  %2738 = vmatprep.mubr.f32.mxu0 %v3910_v17 }
0x2a86   :  { %3559 = vmatprep.subr.bf16.mxu0 %v4067_v53 }
0x2a89   :  { %3561 = vmatpush1.bf16.msra.mxu0 %v4072_v58 }
0x2a8a   :  { %3563 = vmatprep.subr.bf16.mxu0 %v4075_v59 }
0x2a8d   :  { %3565 = vmatpush1.bf16.msra.mxu0 %v4078_v0 }
0x2a8e   :  { %3567 = vmatprep.subr.bf16.mxu0 %v4081_v1 }
0x2a91   :  { %3569 = vmatpush1.bf16.msra.mxu0 %v4084_v8 }
0x2a92   :  { %3571 = vmatprep.subr.bf16.mxu0 %v4087_v10 }
0x2a95   :  { %3573 = vmatpush1.bf16.msra.mxu0 %v4090_v16 }
0x2a96   :  { %3575 = vmatprep.subr.bf16.mxu0 %v4093_v19 }
0x2a99   :  { %3577 = vmatpush1.bf16.msra.mxu0 %v4096_v26 }
0x2a9a   :  { %3579 = vmatprep.subr.bf16.mxu0 %v4099_v29 }
0x2a9d   :  { %3581 = vmatpush1.bf16.msra.mxu0 %v4102_v33 }
0x2a9e   :  { %3583 = vmatprep.subr.bf16.mxu0 %v4106_v38 }
0x2aa1   :  { %3585 = vmatpush1.bf16.msra.mxu0 %v4108_v43 }
0x2b57   :  { %v2633_v17 = vpop.f32.mrb[20].mxu0 }
0x2b58   :  { %v2635_v52 = vpop.f32.mrb[21].mxu0  ;;  %v3006_v58 = vmul.f32 -1.442695, %v2633_v17  ;;  %v2816_v17 = vsel %vm102_vm2, %v2794_v11, 0.0 }
0x2b59   :  { %3858 = vtanh.f32 %v2635_v52  ;;  %v3007_v33 = vmul.f32 -1.442695, %v2635_v52  ;;  %v2798_v52 = vmul.f32 %v4519_v4, %v2786_v56 }
0x2b5a   :  { %3860 = vpow2.f32 %v3006_v58 }
0x2b5b   :  { %v2828_v58 = vsel %vm102_vm2, %v2798_v52, 0.0 }
0x2b63   :  { %v3859_v53 = vpop.eup %3858 }
0x2b64   :  { %2653 = vrot.lane.b32.xlu1 %v3859_v53, %s3911_s1  ;;  %v3861_v59 = vpop.eup %3860  ;;  %v2787_v53 = vld [vmem:[#allocation2 + $0x50] sm:$0xff] }
0x2b65   :  { %v2644_v0 = vadd.f32 1.0, %v3861_v59  ;;  %v2799_v59 = vmul.f32 %v4519_v4, %v2787_v53 }
0x2b67   :  { %3862 = vrcp.f32 %v2644_v0  ;;  %v2831_v0 = vsel %vm102_vm2, %v2799_v59, 0.0 }
0x2b71   :  { %v3863_v1 = vpop.eup %3862 }
0x2b72   :  { %v2651_v16 = vmul.f32 %v3863_v1, %v4657_v45 }
0x2bd6   :  { %v2654_v8 = vpop.permute.xlu1 %2653 }
0x2bd7   :  { %v2656_v10 = vmul.f32 %v3863_v1, %v2654_v8 }
0x2bd9   :  { %2658 = vrot.lane.b32.xlu1 %v2656_v10, %s3911_s1 }
0x2c4b   :  { %v2659_v19 = vpop.permute.xlu1 %2658 }
0x2c4c   :  { %v2661_v26 = vadd.f32 %v2659_v19, %v2651_v16 }
0x2c4e   :  { %3864 = vtanh.f32 %v2661_v26 }
0x2c4f   :  { %3866 = vpow2.f32 %v3007_v33 }
0x2c58   :  { %v3865_v29 = vpop.eup %3864 }
0x2c59   :  { %2664 = vrot.lane.b32.xlu1 %v3865_v29, %s3911_s1  ;;  %v3867_v38 = vpop.eup %3866 }
0x2c5a   :  { %v2645_v43 = vadd.f32 1.0, %v3867_v38 }
0x2c5c   :  { %3868 = vrcp.f32 %v2645_v43 }
0x2c5d   :  { %2669 = vrot.lane.b32.xlu1 %v2549_v49, %s3911_s1 }
0x2c66   :  { %v3869_v61 = vpop.eup %3868 }
0x2ccb   :  { %v2665_v41 = vpop.permute.xlu1 %2664 }
0x2ccc   :  { %v2667_v50 = vmul.f32 %v3869_v61, %v2665_v41 }
0x2ccf   :  { %v2670_v2 = vpop.permute.xlu1 %2669 }
0x2cd0   :  { %v2672_v63 = vsel %vm102_vm2, %v2667_v50, %v2670_v2 }
0x2cd1   :  { %v2673_v37 = vsel %vm88_vm0, 1.0, %v2672_v63 }
0x2cd2   :  { %2739 = vmatmul.mubr.f32.vlgmr.msra.gmra.mrb[22].mxu0 %v2673_v37 }
0x2da5   :  { %v2740_v55 = vpop.f32.mrb[22].mxu0 }
0x2da6   :  { %v4705_v45 = vpop.f32.mrb[23].mxu0  ;;  %v3008_v28 = vmul.f32 -1.442695, %v2740_v55 }
0x2da7   :  { %3870 = vtanh.f32 %v4705_v45  ;;  %v3009_v1 = vmul.f32 -1.442695, %v4705_v45 }
0x2da8   :  { %3872 = vpow2.f32 %v3008_v28 }
0x2db1   :  { %v3871_v7 = vpop.eup %3870 }
0x2db2   :  { %2760 = vrot.lane.b32.xlu0 %v3871_v7, %s3911_s1  ;;  %v3873_v31 = vpop.eup %3872 }
0x2db3   :  { %v2751_v35 = vadd.f32 1.0, %v3873_v31 }
0x2db5   :  { %3874 = vrcp.f32 %v2751_v35 }
0x2dbf   :  { %v3875_v23 = vpop.eup %3874 }
0x2dc0   :  { %v2758_v40 = vmul.f32 %v3875_v23, %v4668_v60  ;;  %v2792_v60 = vmul.f32 %v4519_v4, %v2780_v46 }
0x2dc2   :  { %v2810_v25 = vsel %vm102_vm2, %v2792_v60, 0.0 }
0x2dd1   :  { %2805 = vadd.xlane.f32.xlu0 %v2804_v20 }
0x2dd5   :  { %2814 = vadd.xlane.f32.xlu0 %v2813_v62 }
0x2dd9   :  { %2826 = vadd.xlane.f32.xlu0 %v2825_v32 }
0x2ddd   :  { %2820 = vadd.xlane.f32.xlu0 %v2819_v22 }
0x2de1   :  { %2823 = vadd.xlane.f32.xlu0 %v2822_v27 }
0x2df7   :  { %2838 = vperm.xlu0 %3592, %v4524_v6   ;;  %v2789_v6 = vmul.f32 %v4519_v4, %v2777_v47 }
0x2df9   :  { %v2801_v49 = vsel %vm102_vm2, %v2789_v6, 0.0 }
0x2e24   :  { %v2761_v54 = vpop.permute.xlu0 %2760 }
0x2e25   :  { %v2763_v39 = vmul.f32 %v3875_v23, %v2761_v54 }
0x2e27   :  { %2765 = vrot.lane.b32.xlu1 %v2763_v39, %s3911_s1 }
0x2e5e   :  { %v2806_v43 = vpop.xlane.xlu0 %2805 }
0x2e62   :  { %v2815_v41 = vpop.xlane.xlu0 %2814 }
0x2e66   :  { %v2827_v61 = vpop.xlane.xlu0 %2826 }
0x2e6a   :  { %v2821_v50 = vpop.xlane.xlu0 %2820 }
0x2e6e   :  { %v2824_v2 = vpop.xlane.xlu0 %2823 }
0x2e76   :  { %v2839_v37 = vpop.permute.xlu0 %2838 }
0x2e77   :  { %v2842_v7 = vadd.f32 %v2839_v37, %v2806_v43  ;;  %v2845_v3 = vadd.f32 %v2839_v37, %v2815_v41  ;;  %v2847_v32 = vadd.f32 %v2839_v37, %v2821_v50  ;;  %v2848_v22 = vadd.f32 %v2839_v37, %v2824_v2 }
0x2e78   :  { %v2849_v31 = vadd.f32 %v2839_v37, %v2827_v61 }
0x2e79   :  { %v2872_v20 = vrot.slane %v2842_v7, %v3960_v5  ;;  %v2884_v27 = vrot.slane %v2845_v3, %v3960_v5  ;;  %v2892_v35 = vrot.slane %v2847_v32, %v3960_v5  ;;  %v2896_v39 = vrot.slane %v2848_v22, %v3960_v5 }
0x2e7a   :  { %v2900_v47 = vrot.slane %v2849_v31, %v3960_v5 }
0x2e99   :  { %v2766_v36 = vpop.permute.xlu1 %2765 }
0x2e9a   :  { %v2768_v15 = vadd.f32 %v2766_v36, %v2758_v40 }
0x2e9c   :  { %3876 = vtanh.f32 %v2768_v15 }
0x2e9d   :  { %3878 = vpow2.f32 %v3009_v1 }
0x2ea6   :  { %v3877_v42 = vpop.eup %3876 }
0x2ea7   :  { %2771 = vrot.lane.b32.xlu1 %v3877_v42, %s3911_s1  ;;  %v3879_v8 = vpop.eup %3878 }
0x2ea8   :  { %v2752_v10 = vadd.f32 1.0, %v3879_v8 }
0x2eaa   :  { %3880 = vrcp.f32 %v2752_v10 }
0x2eb4   :  { %v3881_v16 = vpop.eup %3880 }
0x2ecb   :  { %2802 = vadd.xlane.f32.xlu1 %v2801_v49 }
0x2ecf   :  { %2808 = vadd.xlane.f32.xlu1 %v2807_v44 }
0x2ed3   :  { %2811 = vadd.xlane.f32.xlu1 %v2810_v25 }
0x2ed7   :  { %2817 = vadd.xlane.f32.xlu1 %v2816_v17 }
0x2edb   :  { %2829 = vadd.xlane.f32.xlu1 %v2828_v58 }
0x2edf   :  { %2832 = vadd.xlane.f32.xlu1 %v2831_v0 }
0x2f19   :  { %v2772_v19 = vpop.permute.xlu1 %2771 }
0x2f1a   :  { %v2774_v26 = vmul.f32 %v3881_v16, %v2772_v19 }
0x2f1c   :  { %2776 = vst.msk [vmem:[#allocation2 + $0x58] sm:$0xff] %vm102_vm2, %v2774_v26 }
0x2f23   :  { %v2788_v29 = vld [vmem:[#allocation2 + $0x58] sm:$0xff] }
0x2f24   :  { %v2800_v33 = vmul.f32 %v4519_v4, %v2788_v29 }
0x2f26   :  { %v2834_v38 = vsel %vm102_vm2, %v2800_v33, 0.0 }
0x2f27   :  { %2835 = vadd.xlane.f32.xlu1 %v2834_v38 }
0x2f58   :  { %v2803_v63 = vpop.xlane.xlu1 %2802 }
0x2f59   :  { %v2841_v55 = vadd.f32 %v2839_v37, %v2803_v63 }
0x2f5b   :  { %v2868_v14 = vrot.slane %v2841_v55, %v3960_v5 }
0x2f5c   :  { %v2809_v45 = vpop.xlane.xlu1 %2808 }
0x2f5d   :  { %v2843_v12 = vadd.f32 %v2839_v37, %v2809_v45  ;;  %v2914_v62 = vsel %vm2913_vm3, %v2872_v20, %v2868_v14 }
0x2f5f   :  { %v2876_v57 = vrot.slane %v2843_v12, %v3960_v5 }
0x2f60   :  { %v2812_v4 = vpop.xlane.xlu1 %2811 }
0x2f61   :  { %v2844_v24 = vadd.f32 %v2839_v37, %v2812_v4  ;;  %v2916_v9 = vsel %vm2915_vm4, %v2876_v57, %v2914_v62 }
0x2f63   :  { %v2880_v13 = vrot.slane %v2844_v24, %v3960_v5 }
0x2f64   :  { %v2818_v18 = vpop.xlane.xlu1 %2817 }
0x2f65   :  { %v2918_v21 = vsel %vm2917_vm5, %v2880_v13, %v2916_v9  ;;  %v2846_v34 = vadd.f32 %v2839_v37, %v2818_v18 }
0x2f66   :  { %v2920_v23 = vsel %vm2919_vm6, %v2884_v27, %v2918_v21 }
0x2f67   :  { %v2888_v28 = vrot.slane %v2846_v34, %v3960_v5 }
0x2f68   :  { %v2830_v54 = vpop.xlane.xlu1 %2829 }
0x2f69   :  { %v2922_v40 = vsel %vm2921_vm7, %v2888_v28, %v2920_v23  ;;  %v2850_v36 = vadd.f32 %v2839_v37, %v2830_v54 }
0x2f6a   :  { %v2924_v15 = vsel %vm2923_vm8, %v2892_v35, %v2922_v40 }
0x2f6b   :  { %v2926_v42 = vsel %vm2925_vm9, %v2896_v39, %v2924_v15  ;;  %v2904_v6 = vrot.slane %v2850_v36, %v3960_v5 }
0x2f6c   :  { %2933 = vst.msk [vmem:[%s4768_s5] sm:$0xff] %vm2932_vm10, %v2926_v42  ;;  %v2833_v30 = vpop.xlane.xlu1 %2832 }
0x2f6d   :  { %v2927_v49 = vsel %vm2913_vm3, %v2904_v6, %v2900_v47  ;;  %v2851_v48 = vadd.f32 %v2839_v37, %v2833_v30 }
0x2f6f   :  { %v2908_v46 = vrot.slane %v2851_v48, %v3960_v5 }
0x2f71   :  { %v2928_v44 = vsel %vm2915_vm4, %v2908_v46, %v2927_v49 }
0x2fb4   :  { %v2836_v60 = vpop.xlane.xlu1 %2835 }
0x2fb5   :  { %v2852_v51 = vadd.f32 %v2839_v37, %v2836_v60 }
0x2fb7   :  { %v2912_v25 = vrot.slane %v2852_v51, %v3960_v5 }
0x2fb9   :  { %v2929_v11 = vsel %vm2917_vm5, %v2912_v25, %v2928_v44 }
0x2fba   :  { %2935 = vst.msk [vmem:[%s4768_s5 + $0x8] sm:$0xf] %vm2934_vm11, %v2929_v11 }
0x2fbb   :  { %2940 = vsyncpa [#allocation5], 1 }

</bundles_post_ra>
